<compile_context>
chip_gen: v6e
topology: v6e:2x2x1
jax: 0.10.0
libtpu: 0.0.40
codegen_flags: <defaults>
</compile_context>

<pallas_src>
import jax
import jax.numpy as jnp
from jax.experimental import pallas as pl
from jax.experimental.pallas import tpu as pltpu

IN_FEATURES = 3 * 32 * 32  # 3072
H1 = 512
H2 = 128


def _round_up(n, m):
    return ((n + m - 1) // m) * m


def _mlp_kernel(x_ref, w1_ref, b1_ref, w2_ref, b2_ref, w3_ref, b3_ref, o_ref):
    # Layer 1: (TB,3072) @ (3072,512) + (1,512), ReLU   (MXU)
    h1 = jnp.dot(x_ref[...], w1_ref[...], preferred_element_type=jnp.float32)
    h1 = jnp.maximum(h1 + b1_ref[...], 0.0)
    # Layer 2: (TB,512) @ (512,128) + (1,128), ReLU     (MXU)
    h2 = jnp.dot(h1, w2_ref[...], preferred_element_type=jnp.float32)
    h2 = jnp.maximum(h2 + b2_ref[...], 0.0)
    # Layer 3: N=1 matmul replaced by VPU multiply + lane reduce.
    # w3_ref is the lane-dense (1,128) row of the (128,1) weight.
    logits = jnp.sum(h2 * w3_ref[...], axis=-1, keepdims=True) + b3_ref[...]
    # Sigmoid (EUP) and store; tail-tile rows beyond B are masked on write.
    o_ref[...] = jax.nn.sigmoid(logits)


def discriminator_forward(x, params, *, tb=512):
    """x: (B, 3, 32, 32) float32. Returns (B, 1) float32."""
    w1, b1, w2, b2, w3, b3 = params
    B = x.shape[0]
    x_flat = x.reshape(B, IN_FEATURES)  # same semantics as torch .view
    w3_row = w3.reshape(1, H2)          # lane-dense row for the VPU reduce

    # Batch tile: multiple of 8 (sublane), MXU-friendly; shrink for tiny B.
    TB = min(tb, _round_up(B, 8))
    grid = (pl.cdiv(B, TB),)

    # Weights/biases: constant block index -> VMEM-resident across grid steps.
    resident = lambda shape: pl.BlockSpec(shape, lambda i: (0,) * len(shape))

    return pl.pallas_call(
        _mlp_kernel,
        out_shape=jax.ShapeDtypeStruct((B, 1), jnp.float32),
        grid_spec=pltpu.PrefetchScalarGridSpec(
            num_scalar_prefetch=0,
            grid=grid,
            in_specs=[
                pl.BlockSpec((TB, IN_FEATURES), lambda i: (i, 0)),  # x tile
                resident(w1.shape),       # (3072, 512) ~6 MiB, resident
                resident(b1.shape),       # (1, 512)
                resident(w2.shape),       # (512, 128)
                resident(b2.shape),       # (1, 128)
                resident(w3_row.shape),   # (1, 128)
                resident(b3.shape),       # (1, 1)
            ],
            out_specs=pl.BlockSpec((TB, 1), lambda i: (i, 0)),
        ),
        compiler_params=pltpu.CompilerParams(
            # Independent batch tiles -> parallel (v7x megacore sharding).
            dimension_semantics=("parallel",),
            # Above v5e's 16 MiB scoped default; within v7x's 64 MiB physical.
            vmem_limit_bytes=48 << 20,
        ),
    )(x_flat, w1, b1, w2, b2, w3_row, b3)


def init_params(key):
    """Deterministic synthetic parameters with the same shapes as the PyTorch
    module (stored transposed: (in, out))."""
    k1, k2, k3, k4, k5, k6 = jax.random.split(key, 6)

    def lin(kw, kb, fan_in, fan_out):
        bound = 1.0 / jnp.sqrt(fan_in)
        w = jax.random.uniform(kw, (fan_in, fan_out), jnp.float32, -bound, bound)
        b = jax.random.uniform(kb, (1, fan_out), jnp.float32, -bound, bound)
        return w, b

    w1, b1 = lin(k1, k2, IN_FEATURES, H1)
    w2, b2 = lin(k3, k4, H1, H2)
    w3, b3 = lin(k5, k6, H2, 1)
    return (w1, b1, w2, b2, w3, b3)


def _reference(x, params):
    w1, b1, w2, b2, w3, b3 = params
    h = x.reshape(x.shape[0], -1)
    h = jnp.maximum(h @ w1 + b1, 0.0)
    h = jnp.maximum(h @ w2 + b2, 0.0)
    return jax.nn.sigmoid(h @ w3 + b3)


if __name__ == "__main__":
    key = jax.random.PRNGKey(0)
    k_param, k_x = jax.random.split(key)

    params = init_params(k_param)
    x = jax.random.normal(k_x, (2, 3, 32, 32), jnp.float32)

    out = discriminator_forward(x, params)
    out = jax.block_until_ready(out)

    ref = _reference(x, params)
    assert out.shape == (2, 1), out.shape
    assert jnp.allclose(out, ref, atol=1e-5, rtol=1e-5), (out, ref)

    # Also exercise a batch that is not a multiple of the tile (masked tail).
    x2 = jax.random.normal(jax.random.PRNGKey(1), (13, 3, 32, 32), jnp.float32)
    out2 = jax.block_until_ready(discriminator_forward(x2, params))
    ref2 = _reference(x2, params)
    assert out2.shape == (13, 1), out2.shape
    assert jnp.allclose(out2, ref2, atol=1e-5, rtol=1e-5)

    print("KERNEL_OK")
</pallas_src>

<mosaic_0001>
module attributes {stable_mosaic.version = 11 : i64} {
  func.func @_mlp_kernel(%arg0: i32, %arg1: memref<8x3072xf32, #tpu.memory_space<vmem>>, %arg2: memref<3072x512xf32, #tpu.memory_space<vmem>>, %arg3: memref<1x512xf32, #tpu.memory_space<vmem>>, %arg4: memref<512x128xf32, #tpu.memory_space<vmem>>, %arg5: memref<1x128xf32, #tpu.memory_space<vmem>>, %arg6: memref<1x128xf32, #tpu.memory_space<vmem>>, %arg7: memref<1x1xf32, #tpu.memory_space<vmem>>, %arg8: memref<8x1xf32, #tpu.memory_space<vmem>>) attributes {dimension_semantics = [#tpu.dimension_semantics<parallel>], iteration_bounds = array<i64: 1>, scalar_prefetch = 0 : i64, scratch_operands = 0 : i64, tpu.core_type = #tpu.core_type<tc>, window_params = [{transform_indices = @transform_0, window_bounds = array<i64: 8, 3072>}, {pipeline_mode = #tpu.pipeline_mode<synchronous>, transform_indices = @transform_1, window_bounds = array<i64: 3072, 512>}, {pipeline_mode = #tpu.pipeline_mode<synchronous>, transform_indices = @transform_2, window_bounds = array<i64: 1, 512>}, {pipeline_mode = #tpu.pipeline_mode<synchronous>, transform_indices = @transform_3, window_bounds = array<i64: 512, 128>}, {pipeline_mode = #tpu.pipeline_mode<synchronous>, transform_indices = @transform_4, window_bounds = array<i64: 1, 128>}, {pipeline_mode = #tpu.pipeline_mode<synchronous>, transform_indices = @transform_5, window_bounds = array<i64: 1, 128>}, {pipeline_mode = #tpu.pipeline_mode<synchronous>, transform_indices = @transform_6, window_bounds = array<i64: 1, 1>}, {transform_indices = @transform_7, window_bounds = array<i64: 8, 1>}]} {
    %c0 = arith.constant 0 : index
    %c0_0 = arith.constant 0 : index
    %0 = vector.load %arg1[%c0, %c0_0] : memref<8x3072xf32, #tpu.memory_space<vmem>>, vector<8x3072xf32>
    %c0_1 = arith.constant 0 : index
    %c0_2 = arith.constant 0 : index
    %1 = vector.load %arg2[%c0_1, %c0_2] : memref<3072x512xf32, #tpu.memory_space<vmem>>, vector<3072x512xf32>
    %cst = arith.constant dense<0.000000e+00> : vector<8x512xf32>
    %2 = tpu.matmul %0, %1, %cst {dimension_numbers = #tpu.dot_dimension_numbers<[1], [0], [0], [1], [0, 0, 1, 1], [], []>} : vector<8x3072xf32>, vector<3072x512xf32>, vector<8x512xf32> -> vector<8x512xf32>
    %c0_3 = arith.constant 0 : index
    %c0_4 = arith.constant 0 : index
    %3 = vector.load %arg3[%c0_3, %c0_4] : memref<1x512xf32, #tpu.memory_space<vmem>>, vector<1x512xf32>
    %4 = vector.broadcast %3 : vector<1x512xf32> to vector<8x512xf32>
    %5 = arith.addf %2, %4 : vector<8x512xf32>
    %cst_5 = arith.constant 0.000000e+00 : f32
    %6 = vector.broadcast %cst_5 : f32 to vector<8x512xf32>
    %7 = arith.maximumf %5, %6 : vector<8x512xf32>
    %c0_6 = arith.constant 0 : index
    %c0_7 = arith.constant 0 : index
    %8 = vector.load %arg4[%c0_6, %c0_7] : memref<512x128xf32, #tpu.memory_space<vmem>>, vector<512x128xf32>
    %cst_8 = arith.constant dense<0.000000e+00> : vector<8x128xf32>
    %9 = tpu.matmul %7, %8, %cst_8 {dimension_numbers = #tpu.dot_dimension_numbers<[1], [0], [0], [1], [0, 0, 1, 1], [], []>} : vector<8x512xf32>, vector<512x128xf32>, vector<8x128xf32> -> vector<8x128xf32>
    %c0_9 = arith.constant 0 : index
    %c0_10 = arith.constant 0 : index
    %10 = vector.load %arg5[%c0_9, %c0_10] : memref<1x128xf32, #tpu.memory_space<vmem>>, vector<1x128xf32>
    %11 = vector.broadcast %10 : vector<1x128xf32> to vector<8x128xf32>
    %12 = arith.addf %9, %11 : vector<8x128xf32>
    %cst_11 = arith.constant 0.000000e+00 : f32
    %13 = vector.broadcast %cst_11 : f32 to vector<8x128xf32>
    %14 = arith.maximumf %12, %13 : vector<8x128xf32>
    %c0_12 = arith.constant 0 : index
    %c0_13 = arith.constant 0 : index
    %15 = vector.load %arg6[%c0_12, %c0_13] : memref<1x128xf32, #tpu.memory_space<vmem>>, vector<1x128xf32>
    %16 = vector.broadcast %15 : vector<1x128xf32> to vector<8x128xf32>
    %17 = arith.mulf %14, %16 : vector<8x128xf32>
    %cst_14 = arith.constant dense<0.000000e+00> : vector<8xf32>
    %18 = vector.multi_reduction <add>, %17, %cst_14 [1] : vector<8x128xf32> to vector<8xf32>
    %19 = vector.shape_cast %18 : vector<8xf32> to vector<8x1xf32>
    %c0_15 = arith.constant 0 : index
    %c0_16 = arith.constant 0 : index
    %20 = vector.load %arg7[%c0_15, %c0_16] : memref<1x1xf32, #tpu.memory_space<vmem>>, vector<1x1xf32>
    %21 = vector.broadcast %20 : vector<1x1xf32> to vector<8x1xf32>
    %22 = arith.addf %19, %21 : vector<8x1xf32>
    %23 = arith.negf %22 : vector<8x1xf32>
    %24 = math.exp %23 : vector<8x1xf32>
    %cst_17 = arith.constant 1.000000e+00 : f32
    %25 = vector.broadcast %cst_17 : f32 to vector<8x1xf32>
    %26 = arith.addf %25, %24 : vector<8x1xf32>
    %27 = arith.divf %25, %26 : vector<8x1xf32>
    %c0_18 = arith.constant 0 : index
    %c0_19 = arith.constant 0 : index
    %28 = vector.load %arg8[%c0_18, %c0_19] : memref<8x1xf32, #tpu.memory_space<vmem>>, vector<8x1xf32>
    tpu.vector_store %arg8[%c0_18, %c0_19], %27 {strides = array<i32>} : memref<8x1xf32, #tpu.memory_space<vmem>>, vector<8x1xf32>,
    return
  }
  func.func @transform_0(%arg0: i32) -> (i32, i32) {
    %c0_i32 = arith.constant 0 : i32
    %c0_i32_0 = arith.constant 0 : i32
    return %arg0, %c0_i32 : i32, i32
  }
  func.func @transform_1(%arg0: i32) -> (i32, i32) {
    %c0_i32 = arith.constant 0 : i32
    %c0_i32_0 = arith.constant 0 : i32
    %c0_i32_1 = arith.constant 0 : i32
    return %c0_i32, %c0_i32_0 : i32, i32
  }
  func.func @transform_2(%arg0: i32) -> (i32, i32) {
    %c0_i32 = arith.constant 0 : i32
    %c0_i32_0 = arith.constant 0 : i32
    %c0_i32_1 = arith.constant 0 : i32
    return %c0_i32, %c0_i32_0 : i32, i32
  }
  func.func @transform_3(%arg0: i32) -> (i32, i32) {
    %c0_i32 = arith.constant 0 : i32
    %c0_i32_0 = arith.constant 0 : i32
    %c0_i32_1 = arith.constant 0 : i32
    return %c0_i32, %c0_i32_0 : i32, i32
  }
  func.func @transform_4(%arg0: i32) -> (i32, i32) {
    %c0_i32 = arith.constant 0 : i32
    %c0_i32_0 = arith.constant 0 : i32
    %c0_i32_1 = arith.constant 0 : i32
    return %c0_i32, %c0_i32_0 : i32, i32
  }
  func.func @transform_5(%arg0: i32) -> (i32, i32) {
    %c0_i32 = arith.constant 0 : i32
    %c0_i32_0 = arith.constant 0 : i32
    %c0_i32_1 = arith.constant 0 : i32
    return %c0_i32, %c0_i32_0 : i32, i32
  }
  func.func @transform_6(%arg0: i32) -> (i32, i32) {
    %c0_i32 = arith.constant 0 : i32
    %c0_i32_0 = arith.constant 0 : i32
    %c0_i32_1 = arith.constant 0 : i32
    return %c0_i32, %c0_i32_0 : i32, i32
  }
  func.func @transform_7(%arg0: i32) -> (i32, i32) {
    %c0_i32 = arith.constant 0 : i32
    %c0_i32_0 = arith.constant 0 : i32
    return %arg0, %c0_i32 : i32, i32
  }
}

</mosaic_0001>

<bundles_post_ra>
// kernel: tpu_custom_call.1
= control target key start
LH: loop header
LB: loop body
LE: loop exit
PB: predicated region body
PF: predicated region fallthrough
CT: control target
= control target key end

     0   :  { %s4444_s0 = inlined_call_operand.hbm [shape: f32[2,3072], index: 0, kind: input, shape index: {}]   ;;  %s4445_s1 = inlined_call_operand.hbm [shape: f32[3072,512], index: 1, kind: input, shape index: {}]   ;;  %s4446_s2 = inlined_call_operand.hbm [shape: f32[1,512], index: 2, kind: input, shape index: {}]   ;;  %s4447_s3 = inlined_call_operand.hbm [shape: f32[512,128], index: 3, kind: input, shape index: {}]   ;;  %s4448_s4 = inlined_call_operand.hbm [shape: f32[1,128], index: 4, kind: input, shape index: {}]   ;;  %s4449_s5 = inlined_call_operand.hbm [shape: f32[1,128], index: 5, kind: input, shape index: {}]   ;;  %s4450_s6 = inlined_call_operand.<no memory space> [shape: f32[1,1], index: 6, kind: input, shape index: {}]   ;;  %s4451_s7 = inlined_call_operand.vmem [shape: f32[2,1], index: 7, kind: output, shape index: {}]  }
   0x1   :  { %v12_v0 = vstv %s4450_s6 }
   0x2   :  { %13 = vst [vmem:[#allocation2] sm:$0x1] %v12_v0 }
   0x3   :  { %14 = vsyncpa [#allocation4], 0 }
   0x4   :  { %15 = vsyncpa [#allocation6], 0 }
   0x5   :  { %16 = vsyncpa [#allocation9], 0 }
   0x6   :  { %17 = vsyncpa [#allocation12], 0 }
   0x7   :  { %22 = vsyncadd [#allocation4], 2304  ;;  %s4196_s26 = smov [#allocation5]  }
   0x8   :  { %s35_s27 = sshll.u32 %s4196_s26, 4  ;;  %s36_s27 = int_to_ptr.vmem [resolvable:$true] %s35_s27 }
   0x9   :  { %s4076_s28 = scalar_lea.vmem %s36_s27, 196608  ;;  %p4081_p1 = scmp.lt.s32.totalorder %s36_s27, %s36_s27 }
   0xa   :  { %p4077_p0 = scmp.ne.s32.totalorder %s36_s27, %s4076_s28  ;;  %p4082_p2 = scmp.lt.s32.totalorder %s4076_s28, %s4076_s28 }
   0xc   :  { %p4083_p3 = por %p4082_p2, %p4081_p1 }
   0xe   :  { %p4084_p4 = pnand %p4083_p3, %p4077_p0 }
  0x10   :  { %4087 = shalt.err (!%p4084_p4)
}
  0x11   :  { %s4197_s29 = smov 512   ;;  %s4198_s30 = smov 32  }
  0x12   :  { %41 = dma.hbm_to_vmem [thread:$0]  %s4445_s1, 196608, %s36_s27, [#allocation6], %s4197_s29, %s4197_s29, %s4198_s30  }
  0x13   :  { %s4199_s9 = smov [#allocation8]  }
  0x14   :  { %s57_s10 = sshll.u32 %s4199_s9, 4  ;;  %s58_s10 = int_to_ptr.vmem [resolvable:$true] %s57_s10 }
  0x15   :  { %s4096_s11 = scalar_lea.vmem %s58_s10, 8192  ;;  %p4101_p6 = scmp.lt.s32.totalorder %s58_s10, %s58_s10 }
  0x16   :  { %p4097_p5 = scmp.ne.s32.totalorder %s58_s10, %s4096_s11  ;;  %p4102_p7 = scmp.lt.s32.totalorder %s4096_s11, %s4096_s11 }
  0x18   :  { %p4103_p8 = por %p4102_p7, %p4101_p6 }
  0x1a   :  { %p4104_p9 = pnand %p4103_p8, %p4097_p5 }
  0x1c   :  { %4107 = shalt.err (!%p4104_p9)
}
  0x1d   :  { %s4200_s12 = smov 128   ;;  %s4201_s13 = smov 8  }
  0x1e   :  { %63 = dma.hbm_to_vmem [thread:$0]  %s4447_s3, 8192, %s58_s10, [#allocation9], %s4200_s12, %s4200_s12, %s4201_s13  }
  0x1f   :  { %s4202_s16 = smov [#allocation3]  }
  0x20   :  { %s23_s17 = sshll.u32 %s4202_s16, 4  ;;  %s24_s17 = int_to_ptr.vmem [resolvable:$true] %s23_s17 }
  0x21   :  { %s4116_s1 = scalar_lea.vmem %s24_s17, 768  ;;  %s4120_s18 = scalar_lea.vmem %s24_s17, 3072 }
  0x22   :  { %p4117_p10 = scmp.ne.s32.totalorder %s24_s17, %s4116_s1  ;;  %p4121_p11 = scmp.lt.s32.totalorder %s24_s17, %s24_s17 }
  0x23   :  { %p4122_p12 = scmp.lt.s32.totalorder %s4120_s18, %s4116_s1 }
  0x25   :  { %p4123_p13 = por %p4122_p12, %p4121_p11 }
  0x27   :  { %p4124_p0 = pnand %p4123_p13, %p4117_p10 }
  0x29   :  { %4127 = shalt.err (!%p4124_p0)
}
  0x2a   :  { %s4203_s19 = smov 768   ;;  %s4204_s20 = smov 48  }
  0x2b   :  { %29 = dma.hbm_to_vmem [thread:$0]  %s4444_s0, 768, %s24_s17, [#allocation4], %s4203_s19, %s4203_s19, %s4204_s20  }
  0x2c   :  { %s4205_s23 = smov [#allocation7]   ;;  %s4206_s3 = smov [#allocation10]  }
  0x2d   :  { %s48_s24 = sshll.u32 %s4205_s23, 4  ;;  %s70_s25 = sshll.u32 %s4206_s3, 4  ;;  %s49_s24 = int_to_ptr.vmem [resolvable:$true] %s48_s24  ;;  %s71_s25 = int_to_ptr.vmem [resolvable:$true] %s70_s25 }
  0x2e   :  { %s4136_s26 = scalar_lea.vmem %s49_s24, 64  ;;  %p4141_p2 = scmp.lt.s32.totalorder %s49_s24, %s49_s24 }
  0x2f   :  { %p4137_p1 = scmp.ne.s32.totalorder %s49_s24, %s4136_s26  ;;  %p4142_p3 = scmp.lt.s32.totalorder %s4136_s26, %s4136_s26 }
  0x31   :  { %p4143_p4 = por %p4142_p3, %p4141_p2 }
  0x33   :  { %p4144_p5 = pnand %p4143_p4, %p4137_p1 }
  0x35   :  { %4147 = shalt.err (!%p4144_p5)
}
  0x36   :  { %51 = dma.hbm_to_vmem [thread:$0]  %s4446_s2, 64, %s49_s24, [#allocation6]  }
  0x37   :  { %s4156_s29 = scalar_lea.vmem %s71_s25, 16  ;;  %s4160_s0 = scalar_lea.vmem %s71_s25, 32 }
  0x38   :  { %p4157_p6 = scmp.ne.s32.totalorder %s71_s25, %s4156_s29  ;;  %p4161_p7 = scmp.lt.s32.totalorder %s71_s25, %s71_s25 }
  0x39   :  { %p4162_p8 = scmp.lt.s32.totalorder %s4160_s0, %s4156_s29 }
  0x3b   :  { %p4163_p9 = por %p4162_p8, %p4161_p7 }
  0x3d   :  { %p4164_p10 = pnand %p4163_p9, %p4157_p6 }
  0x3f   :  { %4167 = shalt.err (!%p4164_p10)
}
  0x40   :  { %73 = dma.hbm_to_vmem [thread:$0]  %s4448_s4, 16, %s71_s25, [#allocation9]  }
  0x41   :  { %s4207_s6 = smov [#allocation11]  }
  0x42   :  { %s80_s9 = sshll.u32 %s4207_s6, 4  ;;  %s81_s9 = int_to_ptr.vmem [resolvable:$true] %s80_s9 }
  0x43   :  { %s4176_s10 = scalar_lea.vmem %s81_s9, 16  ;;  %s4180_s11 = scalar_lea.vmem %s81_s9, 32 }
  0x44   :  { %p4177_p11 = scmp.ne.s32.totalorder %s81_s9, %s4176_s10  ;;  %p4181_p12 = scmp.lt.s32.totalorder %s81_s9, %s81_s9 }
  0x45   :  { %p4182_p13 = scmp.lt.s32.totalorder %s4180_s11, %s4176_s10 }
  0x47   :  { %p4183_p0 = por %p4182_p13, %p4181_p12 }
  0x49   :  { %p4184_p1 = pnand %p4183_p0, %p4177_p11 }
  0x4b   :  { %4187 = shalt.err (!%p4184_p1)
}
  0x4c   :  { %83 = dma.hbm_to_vmem [thread:$0]  %s4449_s5, 16, %s81_s9, [#allocation12]  }
  0x4d   :  { %4188 = dma.done.wait [#allocation4], 3072  }
  0x4e   :  { %4189 = vsyncadd [#allocation4], 4294964224 }
  0x4f   :  { %4190 = dma.done.wait [#allocation6], 196672  }
  0x50   :  { %4191 = vsyncadd [#allocation6], 4294770624 }
  0x51   :  { %4192 = dma.done.wait [#allocation9], 8208  }
  0x52   :  { %4193 = vsyncadd [#allocation9], 4294959088 }
  0x53   :  { %4194 = dma.done.wait [#allocation12], 16  }
  0x54   :  { %4195 = vsyncadd [#allocation12], 4294967280  ;;  %v189_v1 = vld [vmem:[#allocation5 + $0x1e8] sm:$0xff]  ;;  %v188_v3 = vld [vmem:[#allocation5 + $0x1e0] sm:$0xff]  ;;  %vm3894_vm0 = vcmask 7168  }
  0x55   :  { %v317_v2 = vld [vmem:[#allocation5 + $0x5e8] sm:$0xff]  ;;  %1950 = vmatprep.subr.mxu0 %v189_v1  ;;  %v316_v4 = vld [vmem:[#allocation5 + $0x5e0] sm:$0xff] }
  0x56   :  { %2021 = vmatprep.subr.mxu1 %v317_v2  ;;  %v185_v5 = vld [vmem:[#allocation5 + $0x1c8] sm:$0xff]  ;;  %1951 = vmatpush1.msra.mxu0 %v188_v3  ;;  %v184_v7 = vld [vmem:[#allocation5 + $0x1c0] sm:$0xff] }
  0x57   :  { %v313_v6 = vld [vmem:[#allocation5 + $0x5c8] sm:$0xff]  ;;  %2022 = vmatpush1.msra.mxu1 %v316_v4  ;;  %v312_v8 = vld [vmem:[#allocation5 + $0x5c0] sm:$0xff]  ;;  %1952 = vmatprep.subr.mxu0 %v185_v5 }
  0x58   :  { %v181_v9 = vld [vmem:[#allocation5 + $0x1a8] sm:$0xff]  ;;  %2023 = vmatprep.subr.mxu1 %v313_v6  ;;  %v180_v11 = vld [vmem:[#allocation5 + $0x1a0] sm:$0xff]  ;;  %1953 = vmatpush1.msra.mxu0 %v184_v7 }
  0x59   :  { %v309_v10 = vld [vmem:[#allocation5 + $0x5a8] sm:$0xff]  ;;  %v308_v12 = vld [vmem:[#allocation5 + $0x5a0] sm:$0xff]  ;;  %2024 = vmatpush1.msra.mxu1 %v312_v8  ;;  %1954 = vmatprep.subr.mxu0 %v181_v9 }
  0x5a   :  { %v177_v13 = vld [vmem:[#allocation5 + $0x188] sm:$0xff]  ;;  %2025 = vmatprep.subr.mxu1 %v309_v10  ;;  %v176_v15 = vld [vmem:[#allocation5 + $0x180] sm:$0xff]  ;;  %1955 = vmatpush1.msra.mxu0 %v180_v11 }
  0x5b   :  { %v305_v14 = vld [vmem:[#allocation5 + $0x588] sm:$0xff]  ;;  %v304_v16 = vld [vmem:[#allocation5 + $0x580] sm:$0xff]  ;;  %2026 = vmatpush1.msra.mxu1 %v308_v12  ;;  %1956 = vmatprep.subr.mxu0 %v177_v13 }
  0x5c   :  { %v173_v17 = vld [vmem:[#allocation5 + $0x168] sm:$0xff]  ;;  %2027 = vmatprep.subr.mxu1 %v305_v14  ;;  %v172_v19 = vld [vmem:[#allocation5 + $0x160] sm:$0xff]  ;;  %1957 = vmatpush1.msra.mxu0 %v176_v15 }
  0x5d   :  { %v301_v18 = vld [vmem:[#allocation5 + $0x568] sm:$0xff]  ;;  %v300_v20 = vld [vmem:[#allocation5 + $0x560] sm:$0xff]  ;;  %2028 = vmatpush1.msra.mxu1 %v304_v16  ;;  %1958 = vmatprep.subr.mxu0 %v173_v17 }
  0x5e   :  { %v169_v21 = vld [vmem:[#allocation5 + $0x148] sm:$0xff]  ;;  %2029 = vmatprep.subr.mxu1 %v301_v18  ;;  %v168_v23 = vld [vmem:[#allocation5 + $0x140] sm:$0xff]  ;;  %1959 = vmatpush1.msra.mxu0 %v172_v19 }
  0x5f   :  { %v297_v22 = vld [vmem:[#allocation5 + $0x548] sm:$0xff]  ;;  %v296_v24 = vld [vmem:[#allocation5 + $0x540] sm:$0xff]  ;;  %2030 = vmatpush1.msra.mxu1 %v300_v20  ;;  %1960 = vmatprep.subr.mxu0 %v169_v21 }
  0x60   :  { %v165_v25 = vld [vmem:[#allocation5 + $0x128] sm:$0xff]  ;;  %2031 = vmatprep.subr.mxu1 %v297_v22  ;;  %v164_v27 = vld [vmem:[#allocation5 + $0x120] sm:$0xff]  ;;  %1961 = vmatpush1.msra.mxu0 %v168_v23 }
  0x61   :  { %v293_v26 = vld [vmem:[#allocation5 + $0x528] sm:$0xff]  ;;  %v292_v28 = vld [vmem:[#allocation5 + $0x520] sm:$0xff]  ;;  %2032 = vmatpush1.msra.mxu1 %v296_v24  ;;  %1962 = vmatprep.subr.mxu0 %v165_v25 }
  0x62   :  { %v161_v29 = vld [vmem:[#allocation5 + $0x108] sm:$0xff]  ;;  %2033 = vmatprep.subr.mxu1 %v293_v26  ;;  %v160_v31 = vld [vmem:[#allocation5 + $0x100] sm:$0xff]  ;;  %1963 = vmatpush1.msra.mxu0 %v164_v27 }
  0x63   :  { %v289_v30 = vld [vmem:[#allocation5 + $0x508] sm:$0xff]  ;;  %v288_v32 = vld [vmem:[#allocation5 + $0x500] sm:$0xff]  ;;  %2034 = vmatpush1.msra.mxu1 %v292_v28  ;;  %1964 = vmatprep.subr.mxu0 %v161_v29 }
  0x64   :  { %v157_v33 = vld [vmem:[#allocation5 + $0xe8] sm:$0xff]  ;;  %2035 = vmatprep.subr.mxu1 %v289_v30  ;;  %v156_v35 = vld [vmem:[#allocation5 + $0xe0] sm:$0xff]  ;;  %1965 = vmatpush1.msra.mxu0 %v160_v31  ;;  %v1666_v31 = vlaneseq }
  0x65   :  { %v285_v34 = vld [vmem:[#allocation5 + $0x4e8] sm:$0xff]  ;;  %v284_v36 = vld [vmem:[#allocation5 + $0x4e0] sm:$0xff]  ;;  %2036 = vmatpush1.msra.mxu1 %v288_v32  ;;  %1966 = vmatprep.subr.mxu0 %v157_v33  ;;  %v4208_v32 = vmov 1983009808  }
  0x66   :  { %v153_v37 = vld [vmem:[#allocation5 + $0xc8] sm:$0xff]  ;;  %2037 = vmatprep.subr.mxu1 %v285_v34  ;;  %v152_v39 = vld [vmem:[#allocation5 + $0xc0] sm:$0xff]  ;;  %1967 = vmatpush1.msra.mxu0 %v156_v35  ;;  %v1715_v33 = vunpack.c.l.s4 %v4208_v32 }
  0x67   :  { %v281_v38 = vld [vmem:[#allocation5 + $0x4c8] sm:$0xff]  ;;  %v280_v40 = vld [vmem:[#allocation5 + $0x4c0] sm:$0xff]  ;;  %2038 = vmatpush1.msra.mxu1 %v284_v36  ;;  %1968 = vmatprep.subr.mxu0 %v153_v37 }
  0x68   :  { %v149_v41 = vld [vmem:[#allocation5 + $0xa8] sm:$0xff]  ;;  %2039 = vmatprep.subr.mxu1 %v281_v38  ;;  %v148_v43 = vld [vmem:[#allocation5 + $0xa0] sm:$0xff]  ;;  %1969 = vmatpush1.msra.mxu0 %v152_v39 }
  0x69   :  { %v277_v42 = vld [vmem:[#allocation5 + $0x4a8] sm:$0xff]  ;;  %v276_v44 = vld [vmem:[#allocation5 + $0x4a0] sm:$0xff]  ;;  %2040 = vmatpush1.msra.mxu1 %v280_v40  ;;  %1970 = vmatprep.subr.mxu0 %v149_v41 }
  0x6a   :  { %v145_v45 = vld [vmem:[#allocation5 + $0x88] sm:$0xff]  ;;  %2041 = vmatprep.subr.mxu1 %v277_v42  ;;  %v144_v47 = vld [vmem:[#allocation5 + $0x80] sm:$0xff]  ;;  %1971 = vmatpush1.msra.mxu0 %v148_v43  ;;  %v4270_v42 = vshrl.u32 %v1666_v31, 7  ;;  %v1716_v43 = vunpack.c.0.s8 %v1715_v33 }
  0x6b   :  { %v273_v46 = vld [vmem:[#allocation5 + $0x488] sm:$0xff]  ;;  %v272_v48 = vld [vmem:[#allocation5 + $0x480] sm:$0xff]  ;;  %2042 = vmatpush1.msra.mxu1 %v276_v44  ;;  %1972 = vmatprep.subr.mxu0 %v145_v45 }
  0x6c   :  { %v141_v49 = vld [vmem:[#allocation5 + $0x68] sm:$0xff]  ;;  %2043 = vmatprep.subr.mxu1 %v273_v46  ;;  %v140_v51 = vld [vmem:[#allocation5 + $0x60] sm:$0xff]  ;;  %1973 = vmatpush1.msra.mxu0 %v144_v47 }
  0x6d   :  { %v269_v50 = vld [vmem:[#allocation5 + $0x468] sm:$0xff]  ;;  %v268_v52 = vld [vmem:[#allocation5 + $0x460] sm:$0xff]  ;;  %2044 = vmatpush1.msra.mxu1 %v272_v48  ;;  %1974 = vmatprep.subr.mxu0 %v141_v49 }
  0x6e   :  { %v137_v53 = vld [vmem:[#allocation5 + $0x48] sm:$0xff]  ;;  %2045 = vmatprep.subr.mxu1 %v269_v50  ;;  %v136_v55 = vld [vmem:[#allocation5 + $0x40] sm:$0xff]  ;;  %1975 = vmatpush1.msra.mxu0 %v140_v51 }
  0x6f   :  { %v265_v54 = vld [vmem:[#allocation5 + $0x448] sm:$0xff]  ;;  %v264_v56 = vld [vmem:[#allocation5 + $0x440] sm:$0xff]  ;;  %2046 = vmatpush1.msra.mxu1 %v268_v52  ;;  %1976 = vmatprep.subr.mxu0 %v137_v53 }
  0x70   :  { %v133_v57 = vld [vmem:[#allocation5 + $0x28] sm:$0xff]  ;;  %2047 = vmatprep.subr.mxu1 %v265_v54  ;;  %v132_v59 = vld [vmem:[#allocation5 + $0x20] sm:$0xff]  ;;  %1977 = vmatpush1.msra.mxu0 %v136_v55  ;;  %v4273_v54 = vsub.s32 %v1716_v43, %v4270_v42 }
  0x71   :  { %v261_v58 = vld [vmem:[#allocation5 + $0x428] sm:$0xff]  ;;  %v260_v60 = vld [vmem:[#allocation5 + $0x420] sm:$0xff]  ;;  %2048 = vmatpush1.msra.mxu1 %v264_v56  ;;  %1978 = vmatprep.subr.mxu0 %v133_v57 }
  0x72   :  { %v129_v61 = vld [vmem:[#allocation5 + $0x8] sm:$0xff]  ;;  %2049 = vmatprep.subr.mxu1 %v261_v58  ;;  %v128_v63 = vld [vmem:[#allocation5] sm:$0xff]  ;;  %1979 = vmatpush1.msra.mxu0 %v132_v59 }
  0x73   :  { %v257_v62 = vld [vmem:[#allocation5 + $0x408] sm:$0xff]  ;;  %v256_v0 = vld [vmem:[#allocation5 + $0x400] sm:$0xff]  ;;  %2050 = vmatpush1.msra.mxu1 %v260_v60  ;;  %1980 = vmatprep.subr.mxu0 %v129_v61 }
  0x74   :  { %v253_v1 = vld [vmem:[#allocation5 + $0x3e8] sm:$0xff]  ;;  %2051 = vmatprep.subr.mxu1 %v257_v62  ;;  %v252_v3 = vld [vmem:[#allocation5 + $0x3e0] sm:$0xff]  ;;  %1981 = vmatpush1.msra.mxu0 %v128_v63 }
  0x75   :  { %v381_v2 = vld [vmem:[#allocation5 + $0x7e8] sm:$0xff]  ;;  %v380_v4 = vld [vmem:[#allocation5 + $0x7e0] sm:$0xff]  ;;  %2052 = vmatpush1.msra.mxu1 %v256_v0  ;;  %1982 = vmatprep.subr.mxu0 %v253_v1 }
  0x76   :  { %v249_v5 = vld [vmem:[#allocation5 + $0x3c8] sm:$0xff]  ;;  %2053 = vmatprep.subr.mxu1 %v381_v2  ;;  %v248_v7 = vld [vmem:[#allocation5 + $0x3c0] sm:$0xff]  ;;  %1983 = vmatpush2.msra.mxu0 %v252_v3 }
  0x77   :  { %v377_v6 = vld [vmem:[#allocation5 + $0x7c8] sm:$0xff]  ;;  %v376_v8 = vld [vmem:[#allocation5 + $0x7c0] sm:$0xff]  ;;  %2054 = vmatpush2.msra.mxu1 %v380_v4  ;;  %1984 = vmatprep.subr.mxu0 %v249_v5 }
  0x78   :  { %v245_v9 = vld [vmem:[#allocation5 + $0x3a8] sm:$0xff]  ;;  %2055 = vmatprep.subr.mxu1 %v377_v6  ;;  %v244_v11 = vld [vmem:[#allocation5 + $0x3a0] sm:$0xff]  ;;  %1985 = vmatpush2.msra.mxu0 %v248_v7 }
  0x79   :  { %v373_v10 = vld [vmem:[#allocation5 + $0x7a8] sm:$0xff]  ;;  %v372_v12 = vld [vmem:[#allocation5 + $0x7a0] sm:$0xff]  ;;  %2056 = vmatpush2.msra.mxu1 %v376_v8  ;;  %1986 = vmatprep.subr.mxu0 %v245_v9 }
  0x7a   :  { %v241_v13 = vld [vmem:[#allocation5 + $0x388] sm:$0xff]  ;;  %2057 = vmatprep.subr.mxu1 %v373_v10  ;;  %v240_v15 = vld [vmem:[#allocation5 + $0x380] sm:$0xff]  ;;  %1987 = vmatpush2.msra.mxu0 %v244_v11 }
  0x7b   :  { %v369_v14 = vld [vmem:[#allocation5 + $0x788] sm:$0xff]  ;;  %v368_v16 = vld [vmem:[#allocation5 + $0x780] sm:$0xff]  ;;  %2058 = vmatpush2.msra.mxu1 %v372_v12  ;;  %1988 = vmatprep.subr.mxu0 %v241_v13 }
  0x7c   :  { %v237_v17 = vld [vmem:[#allocation5 + $0x368] sm:$0xff]  ;;  %2059 = vmatprep.subr.mxu1 %v369_v14  ;;  %v236_v19 = vld [vmem:[#allocation5 + $0x360] sm:$0xff]  ;;  %1989 = vmatpush2.msra.mxu0 %v240_v15 }
  0x7d   :  { %v365_v18 = vld [vmem:[#allocation5 + $0x768] sm:$0xff]  ;;  %v364_v20 = vld [vmem:[#allocation5 + $0x760] sm:$0xff]  ;;  %2060 = vmatpush2.msra.mxu1 %v368_v16  ;;  %1990 = vmatprep.subr.mxu0 %v237_v17 }
  0x7e   :  { %v233_v21 = vld [vmem:[#allocation5 + $0x348] sm:$0xff]  ;;  %v232_v23 = vld [vmem:[#allocation5 + $0x340] sm:$0xff]  ;;  %2061 = vmatprep.subr.mxu1 %v365_v18  ;;  %1991 = vmatpush2.msra.mxu0 %v236_v19 }
  0x7f   :  { %v361_v22 = vld [vmem:[#allocation5 + $0x748] sm:$0xff]  ;;  %v360_v24 = vld [vmem:[#allocation5 + $0x740] sm:$0xff]  ;;  %2062 = vmatpush2.msra.mxu1 %v364_v20  ;;  %1992 = vmatprep.subr.mxu0 %v233_v21 }
  0x80   :  { %v229_v25 = vld [vmem:[#allocation5 + $0x328] sm:$0xff]  ;;  %v228_v27 = vld [vmem:[#allocation5 + $0x320] sm:$0xff]  ;;  %2063 = vmatprep.subr.mxu1 %v361_v22  ;;  %1993 = vmatpush2.msra.mxu0 %v232_v23 }
  0x81   :  { %v357_v26 = vld [vmem:[#allocation5 + $0x728] sm:$0xff]  ;;  %v356_v28 = vld [vmem:[#allocation5 + $0x720] sm:$0xff]  ;;  %2064 = vmatpush2.msra.mxu1 %v360_v24  ;;  %1994 = vmatprep.subr.mxu0 %v229_v25 }
  0x82   :  { %v225_v29 = vld [vmem:[#allocation5 + $0x308] sm:$0xff]  ;;  %2065 = vmatprep.subr.mxu1 %v357_v26  ;;  %v224_v34 = vld [vmem:[#allocation5 + $0x300] sm:$0xff]  ;;  %1995 = vmatpush2.msra.mxu0 %v228_v27 }
  0x83   :  { %v353_v30 = vld [vmem:[#allocation5 + $0x708] sm:$0xff]  ;;  %v352_v35 = vld [vmem:[#allocation5 + $0x700] sm:$0xff]  ;;  %2066 = vmatpush2.msra.mxu1 %v356_v28  ;;  %1996 = vmatprep.subr.mxu0 %v225_v29 }
  0x84   :  { %v221_v36 = vld [vmem:[#allocation5 + $0x2e8] sm:$0xff]  ;;  %2067 = vmatprep.subr.mxu1 %v353_v30  ;;  %v220_v38 = vld [vmem:[#allocation5 + $0x2e0] sm:$0xff]  ;;  %1997 = vmatpush2.msra.mxu0 %v224_v34 }
  0x85   :  { %v349_v37 = vld [vmem:[#allocation5 + $0x6e8] sm:$0xff]  ;;  %v348_v39 = vld [vmem:[#allocation5 + $0x6e0] sm:$0xff]  ;;  %2068 = vmatpush2.msra.mxu1 %v352_v35  ;;  %1998 = vmatprep.subr.mxu0 %v221_v36 }
  0x86   :  { %v217_v40 = vld [vmem:[#allocation5 + $0x2c8] sm:$0xff]  ;;  %2069 = vmatprep.subr.mxu1 %v349_v37  ;;  %v216_v44 = vld [vmem:[#allocation5 + $0x2c0] sm:$0xff]  ;;  %1999 = vmatpush2.msra.mxu0 %v220_v38 }
  0x87   :  { %v345_v41 = vld [vmem:[#allocation5 + $0x6c8] sm:$0xff]  ;;  %v344_v45 = vld [vmem:[#allocation5 + $0x6c0] sm:$0xff]  ;;  %2070 = vmatpush2.msra.mxu1 %v348_v39  ;;  %2000 = vmatprep.subr.mxu0 %v217_v40 }
  0x88   :  { %v213_v46 = vld [vmem:[#allocation5 + $0x2a8] sm:$0xff]  ;;  %2071 = vmatprep.subr.mxu1 %v345_v41  ;;  %v212_v48 = vld [vmem:[#allocation5 + $0x2a0] sm:$0xff]  ;;  %2001 = vmatpush2.msra.mxu0 %v216_v44 }
  0x89   :  { %v341_v47 = vld [vmem:[#allocation5 + $0x6a8] sm:$0xff]  ;;  %v340_v49 = vld [vmem:[#allocation5 + $0x6a0] sm:$0xff]  ;;  %2072 = vmatpush2.msra.mxu1 %v344_v45  ;;  %2002 = vmatprep.subr.mxu0 %v213_v46 }
  0x8a   :  { %v209_v50 = vld [vmem:[#allocation5 + $0x288] sm:$0xff]  ;;  %v4028_v52 = vld [vmem:[#allocation3] ss:$48 sps:$4 sm:$0xff]   ;;  %2073 = vmatprep.subr.mxu1 %v341_v47  ;;  %2003 = vmatpush2.msra.mxu0 %v212_v48  ;;  %v4032_v59 = vld [vmem:[#allocation3 + $0x4] ss:$48 sps:$4 sm:$0xff]  }
  0x8b   :  { %v337_v51 = vld [vmem:[#allocation5 + $0x688] sm:$0xff]  ;;  %v4030_v53 = vld [vmem:[#allocation3 + $0x60] ss:$48 sps:$4 sm:$0xff]   ;;  %2074 = vmatpush2.msra.mxu1 %v340_v49  ;;  %v4033_v60 = vld [vmem:[#allocation3 + $0x64] ss:$48 sps:$4 sm:$0xff]   ;;  %2004 = vmatprep.subr.mxu0 %v209_v50  ;;  %v1720_v1 = vrot.slane %v4028_v52, %v4273_v54  ;;  %v1727_v7 = vrot.slane %v4032_v59, %v4273_v54 }
  0x8c   :  { %v208_v55 = vld [vmem:[#allocation5 + $0x280] sm:$0xff]  ;;  %v205_v57 = vld [vmem:[#allocation5 + $0x268] sm:$0xff]  ;;  %2075 = vmatprep.subr.mxu1 %v337_v51  ;;  %v1734_v2 = vrot.slane %v4030_v53, %v4273_v54  ;;  %v1741_v8 = vrot.slane %v4033_v60, %v4273_v54 }
  0x8d   :  { %v336_v56 = vld [vmem:[#allocation5 + $0x680] sm:$0xff]  ;;  %v333_v58 = vld [vmem:[#allocation5 + $0x668] sm:$0xff]  ;;  %2005 = vmatpush2.msra.mxu0 %v208_v55 }
  0x8e   :  { %v204_v61 = vld [vmem:[#allocation5 + $0x260] sm:$0xff]  ;;  %2076 = vmatpush2.msra.mxu1 %v336_v56  ;;  %v201_v63 = vld [vmem:[#allocation5 + $0x248] sm:$0xff]  ;;  %2006 = vmatprep.subr.mxu0 %v205_v57  ;;  %v4279_v13 = vcombine.high %v1720_v1, %v1734_v2  ;;  %v4281_v15 = vcombine.low %v1720_v1, %v1734_v2  ;;  %v4283_v17 = vcombine.high %v1727_v7, %v1741_v8 }
  0x8f   :  { %v332_v62 = vld [vmem:[#allocation5 + $0x660] sm:$0xff]  ;;  %v329_v0 = vld [vmem:[#allocation5 + $0x648] sm:$0xff]  ;;  %2077 = vmatprep.subr.mxu1 %v333_v58  ;;  %2007 = vmatpush2.msra.mxu0 %v204_v61  ;;  %v4285_v19 = vcombine.low %v1727_v7, %v1741_v8 }
  0x90   :  { %v200_v3 = vld [vmem:[#allocation5 + $0x240] sm:$0xff]  ;;  %2078 = vmatpush2.msra.mxu1 %v332_v62  ;;  %v197_v5 = vld [vmem:[#allocation5 + $0x228] sm:$0xff]  ;;  %2008 = vmatprep.subr.mxu0 %v201_v63 }
  0x91   :  { %v328_v4 = vld [vmem:[#allocation5 + $0x640] sm:$0xff]  ;;  %v325_v6 = vld [vmem:[#allocation5 + $0x628] sm:$0xff]  ;;  %2079 = vmatprep.subr.mxu1 %v329_v0  ;;  %2009 = vmatpush2.msra.mxu0 %v200_v3 }
  0x92   :  { %v196_v9 = vld [vmem:[#allocation5 + $0x220] sm:$0xff]  ;;  %2080 = vmatpush2.msra.mxu1 %v328_v4  ;;  %v193_v11 = vld [vmem:[#allocation5 + $0x208] sm:$0xff]  ;;  %2010 = vmatprep.subr.mxu0 %v197_v5 }
  0x93   :  { %v324_v10 = vld [vmem:[#allocation5 + $0x620] sm:$0xff]  ;;  %v321_v12 = vld [vmem:[#allocation5 + $0x608] sm:$0xff]  ;;  %2081 = vmatprep.subr.mxu1 %v325_v6  ;;  %2011 = vmatpush2.msra.mxu0 %v196_v9 }
  0x94   :  { %v192_v14 = vld [vmem:[#allocation5 + $0x200] sm:$0xff]  ;;  %2082 = vmatpush2.msra.mxu1 %v324_v10  ;;  %2012 = vmatprep.subr.mxu0 %v193_v11  ;;  %v445_v18 = vld [vmem:[#allocation5 + $0x9e8] sm:$0xff] }
  0x95   :  { %v320_v16 = vld [vmem:[#allocation5 + $0x600] sm:$0xff]  ;;  %2083 = vmatprep.subr.mxu1 %v321_v12  ;;  %2013 = vmatpush2.msra.mxu0 %v192_v14  ;;  %v573_v20 = vld [vmem:[#allocation5 + $0xde8] sm:$0xff] }
  0x96   :  { %2014 = vmatprep.mubr.f32.mxu0 %v4279_v13  ;;  %2084 = vmatpush2.msra.mxu1 %v320_v16  ;;  %v444_v21 = vld [vmem:[#allocation5 + $0x9e0] sm:$0xff]  ;;  %v441_v23 = vld [vmem:[#allocation5 + $0x9c8] sm:$0xff] }
  0x97   :  { %2015 = vmatmul.mubr.f32.vlgmr.msra.gmra.mxu0 %v4281_v15  ;;  %v572_v22 = vld [vmem:[#allocation5 + $0xde0] sm:$0xff]  ;;  %2085 = vmatprep.mubr.f32.mxu1 %v4283_v17  ;;  %v569_v24 = vld [vmem:[#allocation5 + $0xdc8] sm:$0xff] }
  0x98   :  { %2092 = vmatprep.subr.mxu0 %v445_v18  ;;  %2163 = vmatprep.subr.mxu1 %v573_v20  ;;  %v440_v25 = vld [vmem:[#allocation5 + $0x9c0] sm:$0xff]  ;;  %v437_v27 = vld [vmem:[#allocation5 + $0x9a8] sm:$0xff] }
  0x99   :  { %2086 = vmatmul.mubr.f32.vlgmr.msra.gmra.mxu1 %v4285_v19  ;;  %v568_v26 = vld [vmem:[#allocation5 + $0xdc0] sm:$0xff]  ;;  %2093 = vmatpush1.msra.mxu0 %v444_v21  ;;  %v565_v28 = vld [vmem:[#allocation5 + $0xda8] sm:$0xff] }
  0x9a   :  { %2164 = vmatpush1.msra.mxu1 %v572_v22  ;;  %2094 = vmatprep.subr.mxu0 %v441_v23  ;;  %v436_v29 = vld [vmem:[#allocation5 + $0x9a0] sm:$0xff]  ;;  %v433_v31 = vld [vmem:[#allocation5 + $0x988] sm:$0xff] }
  0x9b   :  { %2165 = vmatprep.subr.mxu1 %v569_v24  ;;  %v564_v30 = vld [vmem:[#allocation5 + $0xda0] sm:$0xff]  ;;  %2095 = vmatpush1.msra.mxu0 %v440_v25  ;;  %v561_v32 = vld [vmem:[#allocation5 + $0xd88] sm:$0xff] }
  0x9c   :  { %2166 = vmatpush1.msra.mxu1 %v568_v26  ;;  %2096 = vmatprep.subr.mxu0 %v437_v27  ;;  %v432_v33 = vld [vmem:[#allocation5 + $0x980] sm:$0xff]  ;;  %v429_v35 = vld [vmem:[#allocation5 + $0x968] sm:$0xff] }
  0x9d   :  { %2167 = vmatprep.subr.mxu1 %v565_v28  ;;  %v560_v34 = vld [vmem:[#allocation5 + $0xd80] sm:$0xff]  ;;  %2097 = vmatpush1.msra.mxu0 %v436_v29  ;;  %v557_v36 = vld [vmem:[#allocation5 + $0xd68] sm:$0xff] }
  0x9e   :  { %2168 = vmatpush1.msra.mxu1 %v564_v30  ;;  %2098 = vmatprep.subr.mxu0 %v433_v31  ;;  %v428_v37 = vld [vmem:[#allocation5 + $0x960] sm:$0xff]  ;;  %v425_v39 = vld [vmem:[#allocation5 + $0x948] sm:$0xff] }
  0x9f   :  { %2169 = vmatprep.subr.mxu1 %v561_v32  ;;  %v556_v38 = vld [vmem:[#allocation5 + $0xd60] sm:$0xff]  ;;  %2099 = vmatpush1.msra.mxu0 %v432_v33  ;;  %v553_v40 = vld [vmem:[#allocation5 + $0xd48] sm:$0xff] }
  0xa0   :  { %2170 = vmatpush1.msra.mxu1 %v560_v34  ;;  %2100 = vmatprep.subr.mxu0 %v429_v35  ;;  %v424_v41 = vld [vmem:[#allocation5 + $0x940] sm:$0xff]  ;;  %v421_v44 = vld [vmem:[#allocation5 + $0x928] sm:$0xff] }
  0xa1   :  { %2171 = vmatprep.subr.mxu1 %v557_v36  ;;  %v552_v43 = vld [vmem:[#allocation5 + $0xd40] sm:$0xff]  ;;  %2101 = vmatpush1.msra.mxu0 %v428_v37  ;;  %v549_v45 = vld [vmem:[#allocation5 + $0xd28] sm:$0xff] }
  0xa2   :  { %2172 = vmatpush1.msra.mxu1 %v556_v38  ;;  %2102 = vmatprep.subr.mxu0 %v425_v39  ;;  %v420_v46 = vld [vmem:[#allocation5 + $0x920] sm:$0xff]  ;;  %v417_v48 = vld [vmem:[#allocation5 + $0x908] sm:$0xff] }
  0xa3   :  { %2173 = vmatprep.subr.mxu1 %v553_v40  ;;  %v548_v47 = vld [vmem:[#allocation5 + $0xd20] sm:$0xff]  ;;  %2103 = vmatpush1.msra.mxu0 %v424_v41  ;;  %v545_v49 = vld [vmem:[#allocation5 + $0xd08] sm:$0xff] }
  0xa4   :  { %2174 = vmatpush1.msra.mxu1 %v552_v43  ;;  %2104 = vmatprep.subr.mxu0 %v421_v44  ;;  %v416_v50 = vld [vmem:[#allocation5 + $0x900] sm:$0xff]  ;;  %v413_v52 = vld [vmem:[#allocation5 + $0x8e8] sm:$0xff] }
  0xa5   :  { %2175 = vmatprep.subr.mxu1 %v549_v45  ;;  %v544_v51 = vld [vmem:[#allocation5 + $0xd00] sm:$0xff]  ;;  %2105 = vmatpush1.msra.mxu0 %v420_v46  ;;  %v541_v53 = vld [vmem:[#allocation5 + $0xce8] sm:$0xff] }
  0xa6   :  { %2176 = vmatpush1.msra.mxu1 %v548_v47  ;;  %2106 = vmatprep.subr.mxu0 %v417_v48  ;;  %v412_v55 = vld [vmem:[#allocation5 + $0x8e0] sm:$0xff]  ;;  %v409_v57 = vld [vmem:[#allocation5 + $0x8c8] sm:$0xff] }
  0xa7   :  { %2177 = vmatprep.subr.mxu1 %v545_v49  ;;  %v540_v56 = vld [vmem:[#allocation5 + $0xce0] sm:$0xff]  ;;  %2107 = vmatpush1.msra.mxu0 %v416_v50  ;;  %v537_v58 = vld [vmem:[#allocation5 + $0xcc8] sm:$0xff] }
  0xa8   :  { %2178 = vmatpush1.msra.mxu1 %v544_v51  ;;  %2108 = vmatprep.subr.mxu0 %v413_v52  ;;  %v408_v59 = vld [vmem:[#allocation5 + $0x8c0] sm:$0xff]  ;;  %v405_v61 = vld [vmem:[#allocation5 + $0x8a8] sm:$0xff] }
  0xa9   :  { %2179 = vmatprep.subr.mxu1 %v541_v53  ;;  %v536_v60 = vld [vmem:[#allocation5 + $0xcc0] sm:$0xff]  ;;  %2109 = vmatpush1.msra.mxu0 %v412_v55  ;;  %v533_v62 = vld [vmem:[#allocation5 + $0xca8] sm:$0xff] }
  0xaa   :  { %2180 = vmatpush1.msra.mxu1 %v540_v56  ;;  %2110 = vmatprep.subr.mxu0 %v409_v57  ;;  %v404_v63 = vld [vmem:[#allocation5 + $0x8a0] sm:$0xff]  ;;  %v401_v1 = vld [vmem:[#allocation5 + $0x888] sm:$0xff] }
  0xab   :  { %2181 = vmatprep.subr.mxu1 %v537_v58  ;;  %v532_v0 = vld [vmem:[#allocation5 + $0xca0] sm:$0xff]  ;;  %2111 = vmatpush1.msra.mxu0 %v408_v59  ;;  %v529_v2 = vld [vmem:[#allocation5 + $0xc88] sm:$0xff] }
  0xac   :  { %2182 = vmatpush1.msra.mxu1 %v536_v60  ;;  %v400_v3 = vld [vmem:[#allocation5 + $0x880] sm:$0xff]  ;;  %2112 = vmatprep.subr.mxu0 %v405_v61  ;;  %v397_v5 = vld [vmem:[#allocation5 + $0x868] sm:$0xff] }
  0xad   :  { %v528_v4 = vld [vmem:[#allocation5 + $0xc80] sm:$0xff]  ;;  %2183 = vmatprep.subr.mxu1 %v533_v62  ;;  %v525_v6 = vld [vmem:[#allocation5 + $0xc68] sm:$0xff]  ;;  %2113 = vmatpush1.msra.mxu0 %v404_v63 }
  0xae   :  { %2184 = vmatpush1.msra.mxu1 %v532_v0  ;;  %2114 = vmatprep.subr.mxu0 %v401_v1  ;;  %v396_v7 = vld [vmem:[#allocation5 + $0x860] sm:$0xff]  ;;  %v393_v9 = vld [vmem:[#allocation5 + $0x848] sm:$0xff] }
  0xaf   :  { %2185 = vmatprep.subr.mxu1 %v529_v2  ;;  %v524_v8 = vld [vmem:[#allocation5 + $0xc60] sm:$0xff]  ;;  %2115 = vmatpush1.msra.mxu0 %v400_v3  ;;  %v521_v10 = vld [vmem:[#allocation5 + $0xc48] sm:$0xff] }
  0xb0   :  { %2186 = vmatpush1.msra.mxu1 %v528_v4  ;;  %2116 = vmatprep.subr.mxu0 %v397_v5  ;;  %v392_v11 = vld [vmem:[#allocation5 + $0x840] sm:$0xff]  ;;  %v389_v14 = vld [vmem:[#allocation5 + $0x828] sm:$0xff] }
  0xb1   :  { %2187 = vmatprep.subr.mxu1 %v525_v6  ;;  %v520_v12 = vld [vmem:[#allocation5 + $0xc40] sm:$0xff]  ;;  %2117 = vmatpush1.msra.mxu0 %v396_v7  ;;  %v517_v16 = vld [vmem:[#allocation5 + $0xc28] sm:$0xff] }
  0xb2   :  { %2188 = vmatpush1.msra.mxu1 %v524_v8  ;;  %2118 = vmatprep.subr.mxu0 %v393_v9  ;;  %v388_v18 = vld [vmem:[#allocation5 + $0x820] sm:$0xff]  ;;  %v385_v21 = vld [vmem:[#allocation5 + $0x808] sm:$0xff] }
  0xb3   :  { %2189 = vmatprep.subr.mxu1 %v521_v10  ;;  %v516_v20 = vld [vmem:[#allocation5 + $0xc20] sm:$0xff]  ;;  %2119 = vmatpush1.msra.mxu0 %v392_v11  ;;  %v513_v22 = vld [vmem:[#allocation5 + $0xc08] sm:$0xff] }
  0xb4   :  { %2190 = vmatpush1.msra.mxu1 %v520_v12  ;;  %2120 = vmatprep.subr.mxu0 %v389_v14  ;;  %v384_v23 = vld [vmem:[#allocation5 + $0x800] sm:$0xff]  ;;  %v509_v25 = vld [vmem:[#allocation5 + $0xbe8] sm:$0xff] }
  0xb5   :  { %2191 = vmatprep.subr.mxu1 %v517_v16  ;;  %v512_v24 = vld [vmem:[#allocation5 + $0xc00] sm:$0xff]  ;;  %2121 = vmatpush1.msra.mxu0 %v388_v18  ;;  %v637_v26 = vld [vmem:[#allocation5 + $0xfe8] sm:$0xff] }
  0xb6   :  { %2192 = vmatpush1.msra.mxu1 %v516_v20  ;;  %2122 = vmatprep.subr.mxu0 %v385_v21  ;;  %v508_v27 = vld [vmem:[#allocation5 + $0xbe0] sm:$0xff]  ;;  %v505_v29 = vld [vmem:[#allocation5 + $0xbc8] sm:$0xff] }
  0xb7   :  { %2193 = vmatprep.subr.mxu1 %v513_v22  ;;  %v636_v28 = vld [vmem:[#allocation5 + $0xfe0] sm:$0xff]  ;;  %2123 = vmatpush1.msra.mxu0 %v384_v23  ;;  %v633_v30 = vld [vmem:[#allocation5 + $0xfc8] sm:$0xff] }
  0xb8   :  { %2194 = vmatpush1.msra.mxu1 %v512_v24  ;;  %2124 = vmatprep.subr.mxu0 %v509_v25  ;;  %v504_v31 = vld [vmem:[#allocation5 + $0xbc0] sm:$0xff]  ;;  %v501_v33 = vld [vmem:[#allocation5 + $0xba8] sm:$0xff] }
  0xb9   :  { %2195 = vmatprep.subr.mxu1 %v637_v26  ;;  %v632_v32 = vld [vmem:[#allocation5 + $0xfc0] sm:$0xff]  ;;  %2125 = vmatpush2.msra.mxu0 %v508_v27  ;;  %v629_v34 = vld [vmem:[#allocation5 + $0xfa8] sm:$0xff] }
  0xba   :  { %2196 = vmatpush2.msra.mxu1 %v636_v28  ;;  %2126 = vmatprep.subr.mxu0 %v505_v29  ;;  %v500_v35 = vld [vmem:[#allocation5 + $0xba0] sm:$0xff]  ;;  %v497_v37 = vld [vmem:[#allocation5 + $0xb88] sm:$0xff] }
  0xbb   :  { %2197 = vmatprep.subr.mxu1 %v633_v30  ;;  %v628_v36 = vld [vmem:[#allocation5 + $0xfa0] sm:$0xff]  ;;  %2127 = vmatpush2.msra.mxu0 %v504_v31  ;;  %v625_v38 = vld [vmem:[#allocation5 + $0xf88] sm:$0xff] }
  0xbc   :  { %2198 = vmatpush2.msra.mxu1 %v632_v32  ;;  %2128 = vmatprep.subr.mxu0 %v501_v33  ;;  %v496_v39 = vld [vmem:[#allocation5 + $0xb80] sm:$0xff]  ;;  %v493_v41 = vld [vmem:[#allocation5 + $0xb68] sm:$0xff] }
  0xbd   :  { %2199 = vmatprep.subr.mxu1 %v629_v34  ;;  %v624_v40 = vld [vmem:[#allocation5 + $0xf80] sm:$0xff]  ;;  %2129 = vmatpush2.msra.mxu0 %v500_v35  ;;  %v621_v43 = vld [vmem:[#allocation5 + $0xf68] sm:$0xff] }
  0xbe   :  { %2200 = vmatpush2.msra.mxu1 %v628_v36  ;;  %2130 = vmatprep.subr.mxu0 %v497_v37  ;;  %v492_v44 = vld [vmem:[#allocation5 + $0xb60] sm:$0xff]  ;;  %v489_v46 = vld [vmem:[#allocation5 + $0xb48] sm:$0xff] }
  0xbf   :  { %2201 = vmatprep.subr.mxu1 %v625_v38  ;;  %v620_v45 = vld [vmem:[#allocation5 + $0xf60] sm:$0xff]  ;;  %2131 = vmatpush2.msra.mxu0 %v496_v39  ;;  %v617_v47 = vld [vmem:[#allocation5 + $0xf48] sm:$0xff] }
  0xc0   :  { %2202 = vmatpush2.msra.mxu1 %v624_v40  ;;  %2132 = vmatprep.subr.mxu0 %v493_v41  ;;  %v488_v48 = vld [vmem:[#allocation5 + $0xb40] sm:$0xff]  ;;  %v485_v50 = vld [vmem:[#allocation5 + $0xb28] sm:$0xff] }
  0xc1   :  { %2203 = vmatprep.subr.mxu1 %v621_v43  ;;  %v616_v49 = vld [vmem:[#allocation5 + $0xf40] sm:$0xff]  ;;  %2133 = vmatpush2.msra.mxu0 %v492_v44  ;;  %v613_v51 = vld [vmem:[#allocation5 + $0xf28] sm:$0xff] }
  0xc2   :  { %2204 = vmatpush2.msra.mxu1 %v620_v45  ;;  %2134 = vmatprep.subr.mxu0 %v489_v46  ;;  %v484_v52 = vld [vmem:[#allocation5 + $0xb20] sm:$0xff]  ;;  %v481_v55 = vld [vmem:[#allocation5 + $0xb08] sm:$0xff] }
  0xc3   :  { %2205 = vmatprep.subr.mxu1 %v617_v47  ;;  %v612_v53 = vld [vmem:[#allocation5 + $0xf20] sm:$0xff]  ;;  %2135 = vmatpush2.msra.mxu0 %v488_v48  ;;  %v609_v56 = vld [vmem:[#allocation5 + $0xf08] sm:$0xff] }
  0xc4   :  { %2206 = vmatpush2.msra.mxu1 %v616_v49  ;;  %2136 = vmatprep.subr.mxu0 %v485_v50  ;;  %v480_v57 = vld [vmem:[#allocation5 + $0xb00] sm:$0xff]  ;;  %v477_v59 = vld [vmem:[#allocation5 + $0xae8] sm:$0xff] }
  0xc5   :  { %2207 = vmatprep.subr.mxu1 %v613_v51  ;;  %v608_v58 = vld [vmem:[#allocation5 + $0xf00] sm:$0xff]  ;;  %2137 = vmatpush2.msra.mxu0 %v484_v52  ;;  %v605_v60 = vld [vmem:[#allocation5 + $0xee8] sm:$0xff] }
  0xc6   :  { %2208 = vmatpush2.msra.mxu1 %v612_v53  ;;  %2138 = vmatprep.subr.mxu0 %v481_v55  ;;  %v476_v61 = vld [vmem:[#allocation5 + $0xae0] sm:$0xff]  ;;  %v473_v63 = vld [vmem:[#allocation5 + $0xac8] sm:$0xff] }
  0xc7   :  { %2209 = vmatprep.subr.mxu1 %v609_v56  ;;  %v604_v62 = vld [vmem:[#allocation5 + $0xee0] sm:$0xff]  ;;  %2139 = vmatpush2.msra.mxu0 %v480_v57  ;;  %v601_v0 = vld [vmem:[#allocation5 + $0xec8] sm:$0xff] }
  0xc8   :  { %2210 = vmatpush2.msra.mxu1 %v608_v58  ;;  %2140 = vmatprep.subr.mxu0 %v477_v59  ;;  %v472_v1 = vld [vmem:[#allocation5 + $0xac0] sm:$0xff]  ;;  %v469_v3 = vld [vmem:[#allocation5 + $0xaa8] sm:$0xff] }
  0xc9   :  { %2211 = vmatprep.subr.mxu1 %v605_v60  ;;  %v600_v2 = vld [vmem:[#allocation5 + $0xec0] sm:$0xff]  ;;  %2141 = vmatpush2.msra.mxu0 %v476_v61  ;;  %v597_v4 = vld [vmem:[#allocation5 + $0xea8] sm:$0xff] }
  0xca   :  { %2212 = vmatpush2.msra.mxu1 %v604_v62  ;;  %2142 = vmatprep.subr.mxu0 %v473_v63  ;;  %v468_v5 = vld [vmem:[#allocation5 + $0xaa0] sm:$0xff]  ;;  %v465_v7 = vld [vmem:[#allocation5 + $0xa88] sm:$0xff] }
  0xcb   :  { %2213 = vmatprep.subr.mxu1 %v601_v0  ;;  %v596_v6 = vld [vmem:[#allocation5 + $0xea0] sm:$0xff]  ;;  %2143 = vmatpush2.msra.mxu0 %v472_v1  ;;  %v593_v8 = vld [vmem:[#allocation5 + $0xe88] sm:$0xff] }
  0xcc   :  { %2214 = vmatpush2.msra.mxu1 %v600_v2  ;;  %v4034_v9 = vld [vmem:[#allocation3 + $0x8] ss:$48 sps:$4 sm:$0xff]   ;;  %2144 = vmatprep.subr.mxu0 %v469_v3  ;;  %v464_v11 = vld [vmem:[#allocation5 + $0xa80] sm:$0xff]  ;;  %v4038_v18 = vld [vmem:[#allocation3 + $0xc] ss:$48 sps:$4 sm:$0xff]  }
  0xcd   :  { %v4036_v10 = vld [vmem:[#allocation3 + $0x68] ss:$48 sps:$4 sm:$0xff]   ;;  %2215 = vmatprep.subr.mxu1 %v597_v4  ;;  %v592_v12 = vld [vmem:[#allocation5 + $0xe80] sm:$0xff]  ;;  %2145 = vmatpush2.msra.mxu0 %v468_v5  ;;  %v4039_v20 = vld [vmem:[#allocation3 + $0x6c] ss:$48 sps:$4 sm:$0xff]   ;;  %v1756_v25 = vrot.slane %v4034_v9, %v4273_v54  ;;  %v1763_v31 = vrot.slane %v4038_v18, %v4273_v54 }
  0xce   :  { %v461_v14 = vld [vmem:[#allocation5 + $0xa68] sm:$0xff]  ;;  %2216 = vmatpush2.msra.mxu1 %v596_v6  ;;  %2146 = vmatprep.subr.mxu0 %v465_v7  ;;  %v460_v21 = vld [vmem:[#allocation5 + $0xa60] sm:$0xff]  ;;  %v1770_v26 = vrot.slane %v4036_v10, %v4273_v54  ;;  %v1777_v32 = vrot.slane %v4039_v20, %v4273_v54 }
  0xcf   :  { %v589_v16 = vld [vmem:[#allocation5 + $0xe68] sm:$0xff]  ;;  %2217 = vmatprep.subr.mxu1 %v593_v8  ;;  %v588_v22 = vld [vmem:[#allocation5 + $0xe60] sm:$0xff]  ;;  %2147 = vmatpush2.msra.mxu0 %v464_v11 }
  0xd0   :  { %2218 = vmatpush2.msra.mxu1 %v592_v12  ;;  %v457_v23 = vld [vmem:[#allocation5 + $0xa48] sm:$0xff]  ;;  %2148 = vmatprep.subr.mxu0 %v461_v14  ;;  %v456_v27 = vld [vmem:[#allocation5 + $0xa40] sm:$0xff]  ;;  %v4295_v37 = vcombine.high %v1756_v25, %v1770_v26  ;;  %v4297_v39 = vcombine.low %v1756_v25, %v1770_v26  ;;  %v4299_v41 = vcombine.high %v1763_v31, %v1777_v32 }
  0xd1   :  { %v585_v24 = vld [vmem:[#allocation5 + $0xe48] sm:$0xff]  ;;  %2219 = vmatprep.subr.mxu1 %v589_v16  ;;  %v584_v28 = vld [vmem:[#allocation5 + $0xe40] sm:$0xff]  ;;  %2149 = vmatpush2.msra.mxu0 %v460_v21  ;;  %v4301_v44 = vcombine.low %v1763_v31, %v1777_v32 }
  0xd2   :  { %2220 = vmatpush2.msra.mxu1 %v588_v22  ;;  %v453_v29 = vld [vmem:[#allocation5 + $0xa28] sm:$0xff]  ;;  %2150 = vmatprep.subr.mxu0 %v457_v23  ;;  %v452_v33 = vld [vmem:[#allocation5 + $0xa20] sm:$0xff] }
  0xd3   :  { %v581_v30 = vld [vmem:[#allocation5 + $0xe28] sm:$0xff]  ;;  %2221 = vmatprep.subr.mxu1 %v585_v24  ;;  %v580_v34 = vld [vmem:[#allocation5 + $0xe20] sm:$0xff]  ;;  %2151 = vmatpush2.msra.mxu0 %v456_v27 }
  0xd4   :  { %2222 = vmatpush2.msra.mxu1 %v584_v28  ;;  %v449_v35 = vld [vmem:[#allocation5 + $0xa08] sm:$0xff]  ;;  %2152 = vmatprep.subr.mxu0 %v453_v29  ;;  %v448_v38 = vld [vmem:[#allocation5 + $0xa00] sm:$0xff] }
  0xd5   :  { %v577_v36 = vld [vmem:[#allocation5 + $0xe08] sm:$0xff]  ;;  %2223 = vmatprep.subr.mxu1 %v581_v30  ;;  %2153 = vmatpush2.msra.mxu0 %v452_v33  ;;  %v576_v40 = vld [vmem:[#allocation5 + $0xe00] sm:$0xff] }
  0xd6   :  { %2224 = vmatpush2.msra.mxu1 %v580_v34  ;;  %2154 = vmatprep.subr.mxu0 %v449_v35  ;;  %v701_v43 = vld [vmem:[#allocation5 + $0x11e8] sm:$0xff]  ;;  %v700_v46 = vld [vmem:[#allocation5 + $0x11e0] sm:$0xff] }
  0xd7   :  { %2225 = vmatprep.subr.mxu1 %v577_v36  ;;  %2155 = vmatpush2.msra.mxu0 %v448_v38  ;;  %v829_v45 = vld [vmem:[#allocation5 + $0x15e8] sm:$0xff]  ;;  %v828_v47 = vld [vmem:[#allocation5 + $0x15e0] sm:$0xff] }
  0xd8   :  { %2156 = vmatprep.mubr.f32.mxu0 %v4295_v37  ;;  %2226 = vmatpush2.msra.mxu1 %v576_v40  ;;  %v697_v48 = vld [vmem:[#allocation5 + $0x11c8] sm:$0xff]  ;;  %v696_v50 = vld [vmem:[#allocation5 + $0x11c0] sm:$0xff] }
  0xd9   :  { %2157 = vmatmul.mubr.f32.vlgmr.msra.gmra.mxu0 %v4297_v39  ;;  %2227 = vmatprep.mubr.f32.mxu1 %v4299_v41  ;;  %v825_v49 = vld [vmem:[#allocation5 + $0x15c8] sm:$0xff]  ;;  %v824_v51 = vld [vmem:[#allocation5 + $0x15c0] sm:$0xff] }
  0xda   :  { %2234 = vmatprep.subr.mxu0 %v701_v43  ;;  %2305 = vmatprep.subr.mxu1 %v829_v45  ;;  %v693_v52 = vld [vmem:[#allocation5 + $0x11a8] sm:$0xff]  ;;  %v692_v55 = vld [vmem:[#allocation5 + $0x11a0] sm:$0xff] }
  0xdb   :  { %2228 = vmatmul.mubr.f32.vlgmr.msra.gmra.mxu1 %v4301_v44  ;;  %2235 = vmatpush1.msra.mxu0 %v700_v46  ;;  %v821_v53 = vld [vmem:[#allocation5 + $0x15a8] sm:$0xff]  ;;  %v820_v56 = vld [vmem:[#allocation5 + $0x15a0] sm:$0xff] }
  0xdc   :  { %2306 = vmatpush1.msra.mxu1 %v828_v47  ;;  %2236 = vmatprep.subr.mxu0 %v697_v48  ;;  %v689_v57 = vld [vmem:[#allocation5 + $0x1188] sm:$0xff]  ;;  %v688_v59 = vld [vmem:[#allocation5 + $0x1180] sm:$0xff] }
  0xdd   :  { %2307 = vmatprep.subr.mxu1 %v825_v49  ;;  %2237 = vmatpush1.msra.mxu0 %v696_v50  ;;  %v817_v58 = vld [vmem:[#allocation5 + $0x1588] sm:$0xff]  ;;  %v816_v60 = vld [vmem:[#allocation5 + $0x1580] sm:$0xff] }
  0xde   :  { %2308 = vmatpush1.msra.mxu1 %v824_v51  ;;  %2238 = vmatprep.subr.mxu0 %v693_v52  ;;  %v685_v61 = vld [vmem:[#allocation5 + $0x1168] sm:$0xff]  ;;  %v684_v63 = vld [vmem:[#allocation5 + $0x1160] sm:$0xff] }
  0xdf   :  { %2309 = vmatprep.subr.mxu1 %v821_v53  ;;  %2239 = vmatpush1.msra.mxu0 %v692_v55  ;;  %v813_v62 = vld [vmem:[#allocation5 + $0x1568] sm:$0xff]  ;;  %v812_v0 = vld [vmem:[#allocation5 + $0x1560] sm:$0xff] }
  0xe0   :  { %2310 = vmatpush1.msra.mxu1 %v820_v56  ;;  %2240 = vmatprep.subr.mxu0 %v689_v57  ;;  %v681_v1 = vld [vmem:[#allocation5 + $0x1148] sm:$0xff]  ;;  %v680_v3 = vld [vmem:[#allocation5 + $0x1140] sm:$0xff] }
  0xe1   :  { %2311 = vmatprep.subr.mxu1 %v817_v58  ;;  %2241 = vmatpush1.msra.mxu0 %v688_v59  ;;  %v809_v2 = vld [vmem:[#allocation5 + $0x1548] sm:$0xff]  ;;  %v808_v4 = vld [vmem:[#allocation5 + $0x1540] sm:$0xff] }
  0xe2   :  { %2312 = vmatpush1.msra.mxu1 %v816_v60  ;;  %2242 = vmatprep.subr.mxu0 %v685_v61  ;;  %v677_v5 = vld [vmem:[#allocation5 + $0x1128] sm:$0xff]  ;;  %v676_v7 = vld [vmem:[#allocation5 + $0x1120] sm:$0xff] }
  0xe3   :  { %2313 = vmatprep.subr.mxu1 %v813_v62  ;;  %2243 = vmatpush1.msra.mxu0 %v684_v63  ;;  %v805_v6 = vld [vmem:[#allocation5 + $0x1528] sm:$0xff]  ;;  %v804_v8 = vld [vmem:[#allocation5 + $0x1520] sm:$0xff] }
  0xe4   :  { %2314 = vmatpush1.msra.mxu1 %v812_v0  ;;  %2244 = vmatprep.subr.mxu0 %v681_v1  ;;  %v673_v9 = vld [vmem:[#allocation5 + $0x1108] sm:$0xff]  ;;  %v672_v11 = vld [vmem:[#allocation5 + $0x1100] sm:$0xff] }
  0xe5   :  { %2315 = vmatprep.subr.mxu1 %v809_v2  ;;  %2245 = vmatpush1.msra.mxu0 %v680_v3  ;;  %v801_v10 = vld [vmem:[#allocation5 + $0x1508] sm:$0xff]  ;;  %v800_v12 = vld [vmem:[#allocation5 + $0x1500] sm:$0xff] }
  0xe6   :  { %2316 = vmatpush1.msra.mxu1 %v808_v4  ;;  %2246 = vmatprep.subr.mxu0 %v677_v5  ;;  %v669_v14 = vld [vmem:[#allocation5 + $0x10e8] sm:$0xff]  ;;  %v668_v18 = vld [vmem:[#allocation5 + $0x10e0] sm:$0xff] }
  0xe7   :  { %2317 = vmatprep.subr.mxu1 %v805_v6  ;;  %2247 = vmatpush1.msra.mxu0 %v676_v7  ;;  %v797_v16 = vld [vmem:[#allocation5 + $0x14e8] sm:$0xff]  ;;  %v796_v20 = vld [vmem:[#allocation5 + $0x14e0] sm:$0xff] }
  0xe8   :  { %2318 = vmatpush1.msra.mxu1 %v804_v8  ;;  %2248 = vmatprep.subr.mxu0 %v673_v9  ;;  %v665_v21 = vld [vmem:[#allocation5 + $0x10c8] sm:$0xff]  ;;  %v664_v23 = vld [vmem:[#allocation5 + $0x10c0] sm:$0xff] }
  0xe9   :  { %2319 = vmatprep.subr.mxu1 %v801_v10  ;;  %2249 = vmatpush1.msra.mxu0 %v672_v11  ;;  %v793_v22 = vld [vmem:[#allocation5 + $0x14c8] sm:$0xff]  ;;  %v792_v24 = vld [vmem:[#allocation5 + $0x14c0] sm:$0xff] }
  0xea   :  { %2320 = vmatpush1.msra.mxu1 %v800_v12  ;;  %2250 = vmatprep.subr.mxu0 %v669_v14  ;;  %v661_v25 = vld [vmem:[#allocation5 + $0x10a8] sm:$0xff]  ;;  %v660_v27 = vld [vmem:[#allocation5 + $0x10a0] sm:$0xff] }
  0xeb   :  { %2321 = vmatprep.subr.mxu1 %v797_v16  ;;  %2251 = vmatpush1.msra.mxu0 %v668_v18  ;;  %v789_v26 = vld [vmem:[#allocation5 + $0x14a8] sm:$0xff]  ;;  %v788_v28 = vld [vmem:[#allocation5 + $0x14a0] sm:$0xff] }
  0xec   :  { %2322 = vmatpush1.msra.mxu1 %v796_v20  ;;  %2252 = vmatprep.subr.mxu0 %v665_v21  ;;  %v657_v29 = vld [vmem:[#allocation5 + $0x1088] sm:$0xff]  ;;  %v656_v31 = vld [vmem:[#allocation5 + $0x1080] sm:$0xff] }
  0xed   :  { %2323 = vmatprep.subr.mxu1 %v793_v22  ;;  %2253 = vmatpush1.msra.mxu0 %v664_v23  ;;  %v785_v30 = vld [vmem:[#allocation5 + $0x1488] sm:$0xff]  ;;  %v784_v32 = vld [vmem:[#allocation5 + $0x1480] sm:$0xff] }
  0xee   :  { %2324 = vmatpush1.msra.mxu1 %v792_v24  ;;  %2254 = vmatprep.subr.mxu0 %v661_v25  ;;  %v653_v33 = vld [vmem:[#allocation5 + $0x1068] sm:$0xff]  ;;  %v652_v35 = vld [vmem:[#allocation5 + $0x1060] sm:$0xff] }
  0xef   :  { %2325 = vmatprep.subr.mxu1 %v789_v26  ;;  %2255 = vmatpush1.msra.mxu0 %v660_v27  ;;  %v781_v34 = vld [vmem:[#allocation5 + $0x1468] sm:$0xff]  ;;  %v780_v36 = vld [vmem:[#allocation5 + $0x1460] sm:$0xff] }
  0xf0   :  { %2326 = vmatpush1.msra.mxu1 %v788_v28  ;;  %2256 = vmatprep.subr.mxu0 %v657_v29  ;;  %v649_v38 = vld [vmem:[#allocation5 + $0x1048] sm:$0xff]  ;;  %v648_v43 = vld [vmem:[#allocation5 + $0x1040] sm:$0xff] }
  0xf1   :  { %2327 = vmatprep.subr.mxu1 %v785_v30  ;;  %2257 = vmatpush1.msra.mxu0 %v656_v31  ;;  %v777_v40 = vld [vmem:[#allocation5 + $0x1448] sm:$0xff]  ;;  %v776_v45 = vld [vmem:[#allocation5 + $0x1440] sm:$0xff] }
  0xf2   :  { %2328 = vmatpush1.msra.mxu1 %v784_v32  ;;  %2258 = vmatprep.subr.mxu0 %v653_v33  ;;  %v645_v46 = vld [vmem:[#allocation5 + $0x1028] sm:$0xff]  ;;  %v644_v48 = vld [vmem:[#allocation5 + $0x1020] sm:$0xff] }
  0xf3   :  { %2329 = vmatprep.subr.mxu1 %v781_v34  ;;  %2259 = vmatpush1.msra.mxu0 %v652_v35  ;;  %v773_v47 = vld [vmem:[#allocation5 + $0x1428] sm:$0xff]  ;;  %v772_v49 = vld [vmem:[#allocation5 + $0x1420] sm:$0xff] }
  0xf4   :  { %2330 = vmatpush1.msra.mxu1 %v780_v36  ;;  %2260 = vmatprep.subr.mxu0 %v649_v38  ;;  %v641_v50 = vld [vmem:[#allocation5 + $0x1008] sm:$0xff]  ;;  %v640_v52 = vld [vmem:[#allocation5 + $0x1000] sm:$0xff] }
  0xf5   :  { %2331 = vmatprep.subr.mxu1 %v777_v40  ;;  %2261 = vmatpush1.msra.mxu0 %v648_v43  ;;  %v769_v51 = vld [vmem:[#allocation5 + $0x1408] sm:$0xff]  ;;  %v768_v53 = vld [vmem:[#allocation5 + $0x1400] sm:$0xff] }
  0xf6   :  { %2332 = vmatpush1.msra.mxu1 %v776_v45  ;;  %2262 = vmatprep.subr.mxu0 %v645_v46  ;;  %v765_v55 = vld [vmem:[#allocation5 + $0x13e8] sm:$0xff]  ;;  %v764_v57 = vld [vmem:[#allocation5 + $0x13e0] sm:$0xff] }
  0xf7   :  { %2333 = vmatprep.subr.mxu1 %v773_v47  ;;  %2263 = vmatpush1.msra.mxu0 %v644_v48  ;;  %v893_v56 = vld [vmem:[#allocation5 + $0x17e8] sm:$0xff]  ;;  %v892_v58 = vld [vmem:[#allocation5 + $0x17e0] sm:$0xff] }
  0xf8   :  { %2334 = vmatpush1.msra.mxu1 %v772_v49  ;;  %2264 = vmatprep.subr.mxu0 %v641_v50  ;;  %v761_v59 = vld [vmem:[#allocation5 + $0x13c8] sm:$0xff]  ;;  %v760_v61 = vld [vmem:[#allocation5 + $0x13c0] sm:$0xff] }
  0xf9   :  { %2335 = vmatprep.subr.mxu1 %v769_v51  ;;  %2265 = vmatpush1.msra.mxu0 %v640_v52  ;;  %v889_v60 = vld [vmem:[#allocation5 + $0x17c8] sm:$0xff]  ;;  %v888_v62 = vld [vmem:[#allocation5 + $0x17c0] sm:$0xff] }
  0xfa   :  { %2336 = vmatpush1.msra.mxu1 %v768_v53  ;;  %2266 = vmatprep.subr.mxu0 %v765_v55  ;;  %v757_v63 = vld [vmem:[#allocation5 + $0x13a8] sm:$0xff]  ;;  %v756_v1 = vld [vmem:[#allocation5 + $0x13a0] sm:$0xff] }
  0xfb   :  { %2337 = vmatprep.subr.mxu1 %v893_v56  ;;  %2267 = vmatpush2.msra.mxu0 %v764_v57  ;;  %v885_v0 = vld [vmem:[#allocation5 + $0x17a8] sm:$0xff]  ;;  %v884_v2 = vld [vmem:[#allocation5 + $0x17a0] sm:$0xff] }
  0xfc   :  { %2338 = vmatpush2.msra.mxu1 %v892_v58  ;;  %2268 = vmatprep.subr.mxu0 %v761_v59  ;;  %v753_v3 = vld [vmem:[#allocation5 + $0x1388] sm:$0xff]  ;;  %v752_v5 = vld [vmem:[#allocation5 + $0x1380] sm:$0xff] }
  0xfd   :  { %2339 = vmatprep.subr.mxu1 %v889_v60  ;;  %2269 = vmatpush2.msra.mxu0 %v760_v61  ;;  %v881_v4 = vld [vmem:[#allocation5 + $0x1788] sm:$0xff]  ;;  %v880_v6 = vld [vmem:[#allocation5 + $0x1780] sm:$0xff] }
  0xfe   :  { %2340 = vmatpush2.msra.mxu1 %v888_v62  ;;  %2270 = vmatprep.subr.mxu0 %v757_v63  ;;  %v749_v7 = vld [vmem:[#allocation5 + $0x1368] sm:$0xff]  ;;  %v748_v9 = vld [vmem:[#allocation5 + $0x1360] sm:$0xff] }
  0xff   :  { %2341 = vmatprep.subr.mxu1 %v885_v0  ;;  %2271 = vmatpush2.msra.mxu0 %v756_v1  ;;  %v877_v8 = vld [vmem:[#allocation5 + $0x1768] sm:$0xff]  ;;  %v876_v10 = vld [vmem:[#allocation5 + $0x1760] sm:$0xff] }
 0x100   :  { %2342 = vmatpush2.msra.mxu1 %v884_v2  ;;  %2272 = vmatprep.subr.mxu0 %v753_v3  ;;  %v745_v11 = vld [vmem:[#allocation5 + $0x1348] sm:$0xff]  ;;  %v744_v14 = vld [vmem:[#allocation5 + $0x1340] sm:$0xff] }
 0x101   :  { %2343 = vmatprep.subr.mxu1 %v881_v4  ;;  %2273 = vmatpush2.msra.mxu0 %v752_v5  ;;  %v873_v12 = vld [vmem:[#allocation5 + $0x1748] sm:$0xff]  ;;  %v872_v16 = vld [vmem:[#allocation5 + $0x1740] sm:$0xff] }
 0x102   :  { %2344 = vmatpush2.msra.mxu1 %v880_v6  ;;  %2274 = vmatprep.subr.mxu0 %v749_v7  ;;  %v741_v18 = vld [vmem:[#allocation5 + $0x1328] sm:$0xff]  ;;  %v740_v21 = vld [vmem:[#allocation5 + $0x1320] sm:$0xff] }
 0x103   :  { %2345 = vmatprep.subr.mxu1 %v877_v8  ;;  %2275 = vmatpush2.msra.mxu0 %v748_v9  ;;  %v869_v20 = vld [vmem:[#allocation5 + $0x1728] sm:$0xff]  ;;  %v868_v22 = vld [vmem:[#allocation5 + $0x1720] sm:$0xff] }
 0x104   :  { %2346 = vmatpush2.msra.mxu1 %v876_v10  ;;  %2276 = vmatprep.subr.mxu0 %v745_v11  ;;  %v737_v23 = vld [vmem:[#allocation5 + $0x1308] sm:$0xff]  ;;  %v736_v25 = vld [vmem:[#allocation5 + $0x1300] sm:$0xff] }
 0x105   :  { %2347 = vmatprep.subr.mxu1 %v873_v12  ;;  %2277 = vmatpush2.msra.mxu0 %v744_v14  ;;  %v865_v24 = vld [vmem:[#allocation5 + $0x1708] sm:$0xff]  ;;  %v864_v26 = vld [vmem:[#allocation5 + $0x1700] sm:$0xff] }
 0x106   :  { %2348 = vmatpush2.msra.mxu1 %v872_v16  ;;  %2278 = vmatprep.subr.mxu0 %v741_v18  ;;  %v733_v27 = vld [vmem:[#allocation5 + $0x12e8] sm:$0xff]  ;;  %v732_v29 = vld [vmem:[#allocation5 + $0x12e0] sm:$0xff] }
 0x107   :  { %2349 = vmatprep.subr.mxu1 %v869_v20  ;;  %v861_v28 = vld [vmem:[#allocation5 + $0x16e8] sm:$0xff]  ;;  %2279 = vmatpush2.msra.mxu0 %v740_v21  ;;  %v860_v30 = vld [vmem:[#allocation5 + $0x16e0] sm:$0xff] }
 0x108   :  { %2350 = vmatpush2.msra.mxu1 %v868_v22  ;;  %2280 = vmatprep.subr.mxu0 %v737_v23  ;;  %v729_v31 = vld [vmem:[#allocation5 + $0x12c8] sm:$0xff]  ;;  %v728_v33 = vld [vmem:[#allocation5 + $0x12c0] sm:$0xff] }
 0x109   :  { %2351 = vmatprep.subr.mxu1 %v865_v24  ;;  %2281 = vmatpush2.msra.mxu0 %v736_v25  ;;  %v857_v32 = vld [vmem:[#allocation5 + $0x16c8] sm:$0xff]  ;;  %v856_v34 = vld [vmem:[#allocation5 + $0x16c0] sm:$0xff] }
 0x10a   :  { %2352 = vmatpush2.msra.mxu1 %v864_v26  ;;  %2282 = vmatprep.subr.mxu0 %v733_v27  ;;  %v725_v35 = vld [vmem:[#allocation5 + $0x12a8] sm:$0xff]  ;;  %v724_v38 = vld [vmem:[#allocation5 + $0x12a0] sm:$0xff] }
 0x10b   :  { %2353 = vmatprep.subr.mxu1 %v861_v28  ;;  %2283 = vmatpush2.msra.mxu0 %v732_v29  ;;  %v853_v36 = vld [vmem:[#allocation5 + $0x16a8] sm:$0xff]  ;;  %v852_v40 = vld [vmem:[#allocation5 + $0x16a0] sm:$0xff] }
 0x10c   :  { %2354 = vmatpush2.msra.mxu1 %v860_v30  ;;  %2284 = vmatprep.subr.mxu0 %v729_v31  ;;  %v721_v43 = vld [vmem:[#allocation5 + $0x1288] sm:$0xff]  ;;  %v4040_v46 = vld [vmem:[#allocation3 + $0x10] ss:$48 sps:$4 sm:$0xff]   ;;  %v4044_v52 = vld [vmem:[#allocation3 + $0x14] ss:$48 sps:$4 sm:$0xff]  }
 0x10d   :  { %2355 = vmatprep.subr.mxu1 %v857_v32  ;;  %2285 = vmatpush2.msra.mxu0 %v728_v33  ;;  %v849_v45 = vld [vmem:[#allocation5 + $0x1688] sm:$0xff]  ;;  %v4042_v47 = vld [vmem:[#allocation3 + $0x70] ss:$48 sps:$4 sm:$0xff]   ;;  %v4045_v53 = vld [vmem:[#allocation3 + $0x74] ss:$48 sps:$4 sm:$0xff]   ;;  %v1792_v59 = vrot.slane %v4040_v46, %v4273_v54  ;;  %v1799_v1 = vrot.slane %v4044_v52, %v4273_v54 }
 0x10e   :  { %2356 = vmatpush2.msra.mxu1 %v856_v34  ;;  %2286 = vmatprep.subr.mxu0 %v725_v35  ;;  %v720_v48 = vld [vmem:[#allocation5 + $0x1280] sm:$0xff]  ;;  %v717_v50 = vld [vmem:[#allocation5 + $0x1268] sm:$0xff]  ;;  %v1806_v60 = vrot.slane %v4042_v47, %v4273_v54  ;;  %v1813_v2 = vrot.slane %v4045_v53, %v4273_v54 }
 0x10f   :  { %2357 = vmatprep.subr.mxu1 %v853_v36  ;;  %v848_v49 = vld [vmem:[#allocation5 + $0x1680] sm:$0xff]  ;;  %2287 = vmatpush2.msra.mxu0 %v724_v38  ;;  %v845_v51 = vld [vmem:[#allocation5 + $0x1668] sm:$0xff] }
 0x110   :  { %2358 = vmatpush2.msra.mxu1 %v852_v40  ;;  %2288 = vmatprep.subr.mxu0 %v721_v43  ;;  %v716_v55 = vld [vmem:[#allocation5 + $0x1260] sm:$0xff]  ;;  %v713_v57 = vld [vmem:[#allocation5 + $0x1248] sm:$0xff]  ;;  %v4311_v7 = vcombine.high %v1792_v59, %v1806_v60  ;;  %v4313_v9 = vcombine.low %v1792_v59, %v1806_v60  ;;  %v4315_v11 = vcombine.high %v1799_v1, %v1813_v2 }
 0x111   :  { %2359 = vmatprep.subr.mxu1 %v849_v45  ;;  %v844_v56 = vld [vmem:[#allocation5 + $0x1660] sm:$0xff]  ;;  %2289 = vmatpush2.msra.mxu0 %v720_v48  ;;  %v841_v58 = vld [vmem:[#allocation5 + $0x1648] sm:$0xff]  ;;  %v4317_v14 = vcombine.low %v1799_v1, %v1813_v2 }
 0x112   :  { %2360 = vmatpush2.msra.mxu1 %v848_v49  ;;  %2290 = vmatprep.subr.mxu0 %v717_v50  ;;  %v712_v61 = vld [vmem:[#allocation5 + $0x1240] sm:$0xff]  ;;  %v709_v63 = vld [vmem:[#allocation5 + $0x1228] sm:$0xff] }
 0x113   :  { %2361 = vmatprep.subr.mxu1 %v845_v51  ;;  %v840_v62 = vld [vmem:[#allocation5 + $0x1640] sm:$0xff]  ;;  %2291 = vmatpush2.msra.mxu0 %v716_v55  ;;  %v837_v0 = vld [vmem:[#allocation5 + $0x1628] sm:$0xff] }
 0x114   :  { %2362 = vmatpush2.msra.mxu1 %v844_v56  ;;  %2292 = vmatprep.subr.mxu0 %v713_v57  ;;  %v708_v3 = vld [vmem:[#allocation5 + $0x1220] sm:$0xff]  ;;  %v705_v5 = vld [vmem:[#allocation5 + $0x1208] sm:$0xff] }
 0x115   :  { %2363 = vmatprep.subr.mxu1 %v841_v58  ;;  %v836_v4 = vld [vmem:[#allocation5 + $0x1620] sm:$0xff]  ;;  %2293 = vmatpush2.msra.mxu0 %v712_v61  ;;  %v833_v6 = vld [vmem:[#allocation5 + $0x1608] sm:$0xff] }
 0x116   :  { %2364 = vmatpush2.msra.mxu1 %v840_v62  ;;  %2294 = vmatprep.subr.mxu0 %v709_v63  ;;  %v704_v8 = vld [vmem:[#allocation5 + $0x1200] sm:$0xff]  ;;  %v957_v12 = vld [vmem:[#allocation5 + $0x19e8] sm:$0xff] }
 0x117   :  { %2365 = vmatprep.subr.mxu1 %v837_v0  ;;  %2295 = vmatpush2.msra.mxu0 %v708_v3  ;;  %v832_v10 = vld [vmem:[#allocation5 + $0x1600] sm:$0xff]  ;;  %v1085_v16 = vld [vmem:[#allocation5 + $0x1de8] sm:$0xff] }
 0x118   :  { %2366 = vmatpush2.msra.mxu1 %v836_v4  ;;  %2296 = vmatprep.subr.mxu0 %v705_v5  ;;  %v956_v18 = vld [vmem:[#allocation5 + $0x19e0] sm:$0xff]  ;;  %v953_v21 = vld [vmem:[#allocation5 + $0x19c8] sm:$0xff] }
 0x119   :  { %2367 = vmatprep.subr.mxu1 %v833_v6  ;;  %2297 = vmatpush2.msra.mxu0 %v704_v8  ;;  %v1084_v20 = vld [vmem:[#allocation5 + $0x1de0] sm:$0xff]  ;;  %v1081_v22 = vld [vmem:[#allocation5 + $0x1dc8] sm:$0xff] }
 0x11a   :  { %2298 = vmatprep.mubr.f32.mxu0 %v4311_v7  ;;  %2368 = vmatpush2.msra.mxu1 %v832_v10  ;;  %v952_v23 = vld [vmem:[#allocation5 + $0x19c0] sm:$0xff]  ;;  %v949_v25 = vld [vmem:[#allocation5 + $0x19a8] sm:$0xff] }
 0x11b   :  { %2299 = vmatmul.mubr.f32.vlgmr.msra.gmra.mxu0 %v4313_v9  ;;  %2369 = vmatprep.mubr.f32.mxu1 %v4315_v11  ;;  %v1080_v24 = vld [vmem:[#allocation5 + $0x1dc0] sm:$0xff]  ;;  %v1077_v26 = vld [vmem:[#allocation5 + $0x1da8] sm:$0xff] }
 0x11c   :  { %2376 = vmatprep.subr.mxu0 %v957_v12  ;;  %2447 = vmatprep.subr.mxu1 %v1085_v16  ;;  %v948_v27 = vld [vmem:[#allocation5 + $0x19a0] sm:$0xff]  ;;  %v945_v29 = vld [vmem:[#allocation5 + $0x1988] sm:$0xff] }
 0x11d   :  { %2370 = vmatmul.mubr.f32.vlgmr.msra.gmra.mxu1 %v4317_v14  ;;  %2377 = vmatpush1.msra.mxu0 %v956_v18  ;;  %v1076_v28 = vld [vmem:[#allocation5 + $0x1da0] sm:$0xff]  ;;  %v1073_v30 = vld [vmem:[#allocation5 + $0x1d88] sm:$0xff] }
 0x11e   :  { %2448 = vmatpush1.msra.mxu1 %v1084_v20  ;;  %2378 = vmatprep.subr.mxu0 %v953_v21  ;;  %v944_v31 = vld [vmem:[#allocation5 + $0x1980] sm:$0xff]  ;;  %v941_v33 = vld [vmem:[#allocation5 + $0x1968] sm:$0xff] }
 0x11f   :  { %2449 = vmatprep.subr.mxu1 %v1081_v22  ;;  %2379 = vmatpush1.msra.mxu0 %v952_v23  ;;  %v1072_v32 = vld [vmem:[#allocation5 + $0x1d80] sm:$0xff]  ;;  %v1069_v34 = vld [vmem:[#allocation5 + $0x1d68] sm:$0xff] }
 0x120   :  { %2450 = vmatpush1.msra.mxu1 %v1080_v24  ;;  %2380 = vmatprep.subr.mxu0 %v949_v25  ;;  %v940_v35 = vld [vmem:[#allocation5 + $0x1960] sm:$0xff]  ;;  %v937_v38 = vld [vmem:[#allocation5 + $0x1948] sm:$0xff] }
 0x121   :  { %2451 = vmatprep.subr.mxu1 %v1077_v26  ;;  %2381 = vmatpush1.msra.mxu0 %v948_v27  ;;  %v1068_v36 = vld [vmem:[#allocation5 + $0x1d60] sm:$0xff]  ;;  %v1065_v40 = vld [vmem:[#allocation5 + $0x1d48] sm:$0xff] }
 0x122   :  { %2452 = vmatpush1.msra.mxu1 %v1076_v28  ;;  %2382 = vmatprep.subr.mxu0 %v945_v29  ;;  %v936_v43 = vld [vmem:[#allocation5 + $0x1940] sm:$0xff]  ;;  %v933_v46 = vld [vmem:[#allocation5 + $0x1928] sm:$0xff] }
 0x123   :  { %2453 = vmatprep.subr.mxu1 %v1073_v30  ;;  %2383 = vmatpush1.msra.mxu0 %v944_v31  ;;  %v1064_v45 = vld [vmem:[#allocation5 + $0x1d40] sm:$0xff]  ;;  %v1061_v47 = vld [vmem:[#allocation5 + $0x1d28] sm:$0xff] }
 0x124   :  { %2454 = vmatpush1.msra.mxu1 %v1072_v32  ;;  %2384 = vmatprep.subr.mxu0 %v941_v33  ;;  %v932_v48 = vld [vmem:[#allocation5 + $0x1920] sm:$0xff]  ;;  %v929_v50 = vld [vmem:[#allocation5 + $0x1908] sm:$0xff] }
 0x125   :  { %2455 = vmatprep.subr.mxu1 %v1069_v34  ;;  %2385 = vmatpush1.msra.mxu0 %v940_v35  ;;  %v1060_v49 = vld [vmem:[#allocation5 + $0x1d20] sm:$0xff]  ;;  %v1057_v51 = vld [vmem:[#allocation5 + $0x1d08] sm:$0xff] }
 0x126   :  { %2456 = vmatpush1.msra.mxu1 %v1068_v36  ;;  %2386 = vmatprep.subr.mxu0 %v937_v38  ;;  %v928_v52 = vld [vmem:[#allocation5 + $0x1900] sm:$0xff]  ;;  %v925_v55 = vld [vmem:[#allocation5 + $0x18e8] sm:$0xff] }
 0x127   :  { %2457 = vmatprep.subr.mxu1 %v1065_v40  ;;  %2387 = vmatpush1.msra.mxu0 %v936_v43  ;;  %v1056_v53 = vld [vmem:[#allocation5 + $0x1d00] sm:$0xff]  ;;  %v1053_v56 = vld [vmem:[#allocation5 + $0x1ce8] sm:$0xff] }
 0x128   :  { %2458 = vmatpush1.msra.mxu1 %v1064_v45  ;;  %2388 = vmatprep.subr.mxu0 %v933_v46  ;;  %v924_v57 = vld [vmem:[#allocation5 + $0x18e0] sm:$0xff]  ;;  %v921_v59 = vld [vmem:[#allocation5 + $0x18c8] sm:$0xff] }
 0x129   :  { %2459 = vmatprep.subr.mxu1 %v1061_v47  ;;  %2389 = vmatpush1.msra.mxu0 %v932_v48  ;;  %v1052_v58 = vld [vmem:[#allocation5 + $0x1ce0] sm:$0xff]  ;;  %v1049_v60 = vld [vmem:[#allocation5 + $0x1cc8] sm:$0xff] }
 0x12a   :  { %2460 = vmatpush1.msra.mxu1 %v1060_v49  ;;  %2390 = vmatprep.subr.mxu0 %v929_v50  ;;  %v920_v61 = vld [vmem:[#allocation5 + $0x18c0] sm:$0xff]  ;;  %v917_v63 = vld [vmem:[#allocation5 + $0x18a8] sm:$0xff] }
 0x12b   :  { %2461 = vmatprep.subr.mxu1 %v1057_v51  ;;  %2391 = vmatpush1.msra.mxu0 %v928_v52  ;;  %v1048_v62 = vld [vmem:[#allocation5 + $0x1cc0] sm:$0xff]  ;;  %v1045_v0 = vld [vmem:[#allocation5 + $0x1ca8] sm:$0xff] }
 0x12c   :  { %2462 = vmatpush1.msra.mxu1 %v1056_v53  ;;  %2392 = vmatprep.subr.mxu0 %v925_v55  ;;  %v916_v1 = vld [vmem:[#allocation5 + $0x18a0] sm:$0xff]  ;;  %v913_v3 = vld [vmem:[#allocation5 + $0x1888] sm:$0xff] }
 0x12d   :  { %2463 = vmatprep.subr.mxu1 %v1053_v56  ;;  %2393 = vmatpush1.msra.mxu0 %v924_v57  ;;  %v1044_v2 = vld [vmem:[#allocation5 + $0x1ca0] sm:$0xff]  ;;  %v1041_v4 = vld [vmem:[#allocation5 + $0x1c88] sm:$0xff] }
 0x12e   :  { %2464 = vmatpush1.msra.mxu1 %v1052_v58  ;;  %2394 = vmatprep.subr.mxu0 %v921_v59  ;;  %v912_v5 = vld [vmem:[#allocation5 + $0x1880] sm:$0xff]  ;;  %v909_v8 = vld [vmem:[#allocation5 + $0x1868] sm:$0xff] }
 0x12f   :  { %2465 = vmatprep.subr.mxu1 %v1049_v60  ;;  %2395 = vmatpush1.msra.mxu0 %v920_v61  ;;  %v1040_v6 = vld [vmem:[#allocation5 + $0x1c80] sm:$0xff]  ;;  %v1037_v10 = vld [vmem:[#allocation5 + $0x1c68] sm:$0xff] }
 0x130   :  { %2466 = vmatpush1.msra.mxu1 %v1048_v62  ;;  %2396 = vmatprep.subr.mxu0 %v917_v63  ;;  %v908_v12 = vld [vmem:[#allocation5 + $0x1860] sm:$0xff]  ;;  %v905_v18 = vld [vmem:[#allocation5 + $0x1848] sm:$0xff] }
 0x131   :  { %2467 = vmatprep.subr.mxu1 %v1045_v0  ;;  %2397 = vmatpush1.msra.mxu0 %v916_v1  ;;  %v1036_v16 = vld [vmem:[#allocation5 + $0x1c60] sm:$0xff]  ;;  %v1033_v20 = vld [vmem:[#allocation5 + $0x1c48] sm:$0xff] }
 0x132   :  { %2468 = vmatpush1.msra.mxu1 %v1044_v2  ;;  %2398 = vmatprep.subr.mxu0 %v913_v3  ;;  %v904_v21 = vld [vmem:[#allocation5 + $0x1840] sm:$0xff]  ;;  %v901_v23 = vld [vmem:[#allocation5 + $0x1828] sm:$0xff] }
 0x133   :  { %2469 = vmatprep.subr.mxu1 %v1041_v4  ;;  %2399 = vmatpush1.msra.mxu0 %v912_v5  ;;  %v1032_v22 = vld [vmem:[#allocation5 + $0x1c40] sm:$0xff]  ;;  %v1029_v24 = vld [vmem:[#allocation5 + $0x1c28] sm:$0xff] }
 0x134   :  { %2470 = vmatpush1.msra.mxu1 %v1040_v6  ;;  %2400 = vmatprep.subr.mxu0 %v909_v8  ;;  %v900_v25 = vld [vmem:[#allocation5 + $0x1820] sm:$0xff]  ;;  %v897_v27 = vld [vmem:[#allocation5 + $0x1808] sm:$0xff] }
 0x135   :  { %2471 = vmatprep.subr.mxu1 %v1037_v10  ;;  %2401 = vmatpush1.msra.mxu0 %v908_v12  ;;  %v1028_v26 = vld [vmem:[#allocation5 + $0x1c20] sm:$0xff]  ;;  %v1025_v28 = vld [vmem:[#allocation5 + $0x1c08] sm:$0xff] }
 0x136   :  { %2472 = vmatpush1.msra.mxu1 %v1036_v16  ;;  %2402 = vmatprep.subr.mxu0 %v905_v18  ;;  %v896_v29 = vld [vmem:[#allocation5 + $0x1800] sm:$0xff]  ;;  %v1021_v31 = vld [vmem:[#allocation5 + $0x1be8] sm:$0xff] }
 0x137   :  { %2473 = vmatprep.subr.mxu1 %v1033_v20  ;;  %2403 = vmatpush1.msra.mxu0 %v904_v21  ;;  %v1024_v30 = vld [vmem:[#allocation5 + $0x1c00] sm:$0xff]  ;;  %v1149_v32 = vld [vmem:[#allocation5 + $0x1fe8] sm:$0xff] }
 0x138   :  { %2474 = vmatpush1.msra.mxu1 %v1032_v22  ;;  %2404 = vmatprep.subr.mxu0 %v901_v23  ;;  %v1020_v33 = vld [vmem:[#allocation5 + $0x1be0] sm:$0xff]  ;;  %v1017_v35 = vld [vmem:[#allocation5 + $0x1bc8] sm:$0xff] }
 0x139   :  { %2475 = vmatprep.subr.mxu1 %v1029_v24  ;;  %2405 = vmatpush1.msra.mxu0 %v900_v25  ;;  %v1148_v34 = vld [vmem:[#allocation5 + $0x1fe0] sm:$0xff]  ;;  %v1145_v36 = vld [vmem:[#allocation5 + $0x1fc8] sm:$0xff] }
 0x13a   :  { %2476 = vmatpush1.msra.mxu1 %v1028_v26  ;;  %2406 = vmatprep.subr.mxu0 %v897_v27  ;;  %v1016_v38 = vld [vmem:[#allocation5 + $0x1bc0] sm:$0xff]  ;;  %v1013_v43 = vld [vmem:[#allocation5 + $0x1ba8] sm:$0xff] }
 0x13b   :  { %2477 = vmatprep.subr.mxu1 %v1025_v28  ;;  %2407 = vmatpush1.msra.mxu0 %v896_v29  ;;  %v1144_v40 = vld [vmem:[#allocation5 + $0x1fc0] sm:$0xff]  ;;  %v1141_v45 = vld [vmem:[#allocation5 + $0x1fa8] sm:$0xff] }
 0x13c   :  { %2478 = vmatpush1.msra.mxu1 %v1024_v30  ;;  %2408 = vmatprep.subr.mxu0 %v1021_v31  ;;  %v1012_v46 = vld [vmem:[#allocation5 + $0x1ba0] sm:$0xff]  ;;  %v1009_v48 = vld [vmem:[#allocation5 + $0x1b88] sm:$0xff] }
 0x13d   :  { %2479 = vmatprep.subr.mxu1 %v1149_v32  ;;  %2409 = vmatpush2.msra.mxu0 %v1020_v33  ;;  %v1140_v47 = vld [vmem:[#allocation5 + $0x1fa0] sm:$0xff]  ;;  %v1137_v49 = vld [vmem:[#allocation5 + $0x1f88] sm:$0xff] }
 0x13e   :  { %2480 = vmatpush2.msra.mxu1 %v1148_v34  ;;  %2410 = vmatprep.subr.mxu0 %v1017_v35  ;;  %v1008_v50 = vld [vmem:[#allocation5 + $0x1b80] sm:$0xff]  ;;  %v1005_v52 = vld [vmem:[#allocation5 + $0x1b68] sm:$0xff] }
 0x13f   :  { %2481 = vmatprep.subr.mxu1 %v1145_v36  ;;  %2411 = vmatpush2.msra.mxu0 %v1016_v38  ;;  %v1136_v51 = vld [vmem:[#allocation5 + $0x1f80] sm:$0xff]  ;;  %v1133_v53 = vld [vmem:[#allocation5 + $0x1f68] sm:$0xff] }
 0x140   :  { %2482 = vmatpush2.msra.mxu1 %v1144_v40  ;;  %2412 = vmatprep.subr.mxu0 %v1013_v43  ;;  %v1004_v55 = vld [vmem:[#allocation5 + $0x1b60] sm:$0xff]  ;;  %v1001_v57 = vld [vmem:[#allocation5 + $0x1b48] sm:$0xff] }
 0x141   :  { %2483 = vmatprep.subr.mxu1 %v1141_v45  ;;  %2413 = vmatpush2.msra.mxu0 %v1012_v46  ;;  %v1132_v56 = vld [vmem:[#allocation5 + $0x1f60] sm:$0xff]  ;;  %v1129_v58 = vld [vmem:[#allocation5 + $0x1f48] sm:$0xff] }
 0x142   :  { %2484 = vmatpush2.msra.mxu1 %v1140_v47  ;;  %2414 = vmatprep.subr.mxu0 %v1009_v48  ;;  %v1000_v59 = vld [vmem:[#allocation5 + $0x1b40] sm:$0xff]  ;;  %v997_v61 = vld [vmem:[#allocation5 + $0x1b28] sm:$0xff] }
 0x143   :  { %2485 = vmatprep.subr.mxu1 %v1137_v49  ;;  %2415 = vmatpush2.msra.mxu0 %v1008_v50  ;;  %v1128_v60 = vld [vmem:[#allocation5 + $0x1f40] sm:$0xff]  ;;  %v1125_v62 = vld [vmem:[#allocation5 + $0x1f28] sm:$0xff] }
 0x144   :  { %2486 = vmatpush2.msra.mxu1 %v1136_v51  ;;  %2416 = vmatprep.subr.mxu0 %v1005_v52  ;;  %v996_v63 = vld [vmem:[#allocation5 + $0x1b20] sm:$0xff]  ;;  %v993_v1 = vld [vmem:[#allocation5 + $0x1b08] sm:$0xff] }
 0x145   :  { %2487 = vmatprep.subr.mxu1 %v1133_v53  ;;  %2417 = vmatpush2.msra.mxu0 %v1004_v55  ;;  %v1124_v0 = vld [vmem:[#allocation5 + $0x1f20] sm:$0xff]  ;;  %v1121_v2 = vld [vmem:[#allocation5 + $0x1f08] sm:$0xff] }
 0x146   :  { %2488 = vmatpush2.msra.mxu1 %v1132_v56  ;;  %2418 = vmatprep.subr.mxu0 %v1001_v57  ;;  %v992_v3 = vld [vmem:[#allocation5 + $0x1b00] sm:$0xff]  ;;  %v989_v5 = vld [vmem:[#allocation5 + $0x1ae8] sm:$0xff] }
 0x147   :  { %2489 = vmatprep.subr.mxu1 %v1129_v58  ;;  %2419 = vmatpush2.msra.mxu0 %v1000_v59  ;;  %v1120_v4 = vld [vmem:[#allocation5 + $0x1f00] sm:$0xff]  ;;  %v1117_v6 = vld [vmem:[#allocation5 + $0x1ee8] sm:$0xff] }
 0x148   :  { %2490 = vmatpush2.msra.mxu1 %v1128_v60  ;;  %2420 = vmatprep.subr.mxu0 %v997_v61  ;;  %v988_v8 = vld [vmem:[#allocation5 + $0x1ae0] sm:$0xff]  ;;  %v985_v12 = vld [vmem:[#allocation5 + $0x1ac8] sm:$0xff] }
 0x149   :  { %2491 = vmatprep.subr.mxu1 %v1125_v62  ;;  %2421 = vmatpush2.msra.mxu0 %v996_v63  ;;  %v1116_v10 = vld [vmem:[#allocation5 + $0x1ee0] sm:$0xff]  ;;  %v1113_v16 = vld [vmem:[#allocation5 + $0x1ec8] sm:$0xff] }
 0x14a   :  { %2492 = vmatpush2.msra.mxu1 %v1124_v0  ;;  %2422 = vmatprep.subr.mxu0 %v993_v1  ;;  %v984_v18 = vld [vmem:[#allocation5 + $0x1ac0] sm:$0xff]  ;;  %v981_v21 = vld [vmem:[#allocation5 + $0x1aa8] sm:$0xff] }
 0x14b   :  { %2493 = vmatprep.subr.mxu1 %v1121_v2  ;;  %2423 = vmatpush2.msra.mxu0 %v992_v3  ;;  %v1112_v20 = vld [vmem:[#allocation5 + $0x1ec0] sm:$0xff]  ;;  %v1109_v22 = vld [vmem:[#allocation5 + $0x1ea8] sm:$0xff] }
 0x14c   :  { %2494 = vmatpush2.msra.mxu1 %v1120_v4  ;;  %2424 = vmatprep.subr.mxu0 %v989_v5  ;;  %v980_v23 = vld [vmem:[#allocation5 + $0x1aa0] sm:$0xff]  ;;  %v977_v25 = vld [vmem:[#allocation5 + $0x1a88] sm:$0xff] }
 0x14d   :  { %2495 = vmatprep.subr.mxu1 %v1117_v6  ;;  %2425 = vmatpush2.msra.mxu0 %v988_v8  ;;  %v1108_v24 = vld [vmem:[#allocation5 + $0x1ea0] sm:$0xff]  ;;  %v1105_v26 = vld [vmem:[#allocation5 + $0x1e88] sm:$0xff] }
 0x14e   :  { %2496 = vmatpush2.msra.mxu1 %v1116_v10  ;;  %2426 = vmatprep.subr.mxu0 %v985_v12  ;;  %v4046_v27 = vld [vmem:[#allocation3 + $0x18] ss:$48 sps:$4 sm:$0xff]   ;;  %v976_v29 = vld [vmem:[#allocation5 + $0x1a80] sm:$0xff]  ;;  %v4050_v33 = vld [vmem:[#allocation3 + $0x1c] ss:$48 sps:$4 sm:$0xff]  }
 0x14f   :  { %2497 = vmatprep.subr.mxu1 %v1113_v16  ;;  %2427 = vmatpush2.msra.mxu0 %v984_v18  ;;  %v4048_v28 = vld [vmem:[#allocation3 + $0x78] ss:$48 sps:$4 sm:$0xff]   ;;  %v1104_v30 = vld [vmem:[#allocation5 + $0x1e80] sm:$0xff]  ;;  %v4051_v34 = vld [vmem:[#allocation3 + $0x7c] ss:$48 sps:$4 sm:$0xff]   ;;  %v1828_v43 = vrot.slane %v4046_v27, %v4273_v54  ;;  %v1835_v50 = vrot.slane %v4050_v33, %v4273_v54 }
 0x150   :  { %2498 = vmatpush2.msra.mxu1 %v1112_v20  ;;  %2428 = vmatprep.subr.mxu0 %v981_v21  ;;  %v973_v31 = vld [vmem:[#allocation5 + $0x1a68] sm:$0xff]  ;;  %v972_v35 = vld [vmem:[#allocation5 + $0x1a60] sm:$0xff]  ;;  %v1842_v45 = vrot.slane %v4048_v28, %v4273_v54  ;;  %v1849_v51 = vrot.slane %v4051_v34, %v4273_v54 }
 0x151   :  { %2499 = vmatprep.subr.mxu1 %v1109_v22  ;;  %2429 = vmatpush2.msra.mxu0 %v980_v23  ;;  %v1101_v32 = vld [vmem:[#allocation5 + $0x1e68] sm:$0xff]  ;;  %v1100_v36 = vld [vmem:[#allocation5 + $0x1e60] sm:$0xff] }
 0x152   :  { %2500 = vmatpush2.msra.mxu1 %v1108_v24  ;;  %2430 = vmatprep.subr.mxu0 %v977_v25  ;;  %v969_v38 = vld [vmem:[#allocation5 + $0x1a48] sm:$0xff]  ;;  %v968_v46 = vld [vmem:[#allocation5 + $0x1a40] sm:$0xff]  ;;  %v4327_v57 = vcombine.high %v1828_v43, %v1842_v45  ;;  %v4329_v59 = vcombine.low %v1828_v43, %v1842_v45  ;;  %v4331_v61 = vcombine.high %v1835_v50, %v1849_v51 }
 0x153   :  { %2501 = vmatprep.subr.mxu1 %v1105_v26  ;;  %2431 = vmatpush2.msra.mxu0 %v976_v29  ;;  %v1097_v40 = vld [vmem:[#allocation5 + $0x1e48] sm:$0xff]  ;;  %v1096_v47 = vld [vmem:[#allocation5 + $0x1e40] sm:$0xff]  ;;  %v4333_v63 = vcombine.low %v1835_v50, %v1849_v51 }
 0x154   :  { %2502 = vmatpush2.msra.mxu1 %v1104_v30  ;;  %2432 = vmatprep.subr.mxu0 %v973_v31  ;;  %v965_v48 = vld [vmem:[#allocation5 + $0x1a28] sm:$0xff]  ;;  %v964_v52 = vld [vmem:[#allocation5 + $0x1a20] sm:$0xff] }
 0x155   :  { %2503 = vmatprep.subr.mxu1 %v1101_v32  ;;  %2433 = vmatpush2.msra.mxu0 %v972_v35  ;;  %v1093_v49 = vld [vmem:[#allocation5 + $0x1e28] sm:$0xff]  ;;  %v1092_v53 = vld [vmem:[#allocation5 + $0x1e20] sm:$0xff] }
 0x156   :  { %2504 = vmatpush2.msra.mxu1 %v1100_v36  ;;  %2434 = vmatprep.subr.mxu0 %v969_v38  ;;  %v961_v55 = vld [vmem:[#allocation5 + $0x1a08] sm:$0xff]  ;;  %v960_v58 = vld [vmem:[#allocation5 + $0x1a00] sm:$0xff] }
 0x157   :  { %2505 = vmatprep.subr.mxu1 %v1097_v40  ;;  %2435 = vmatpush2.msra.mxu0 %v968_v46  ;;  %v1089_v56 = vld [vmem:[#allocation5 + $0x1e08] sm:$0xff]  ;;  %v1088_v60 = vld [vmem:[#allocation5 + $0x1e00] sm:$0xff] }
 0x158   :  { %2506 = vmatpush2.msra.mxu1 %v1096_v47  ;;  %2436 = vmatprep.subr.mxu0 %v965_v48  ;;  %v1213_v62 = vld [vmem:[#allocation5 + $0x21e8] sm:$0xff]  ;;  %v1212_v1 = vld [vmem:[#allocation5 + $0x21e0] sm:$0xff] }
 0x159   :  { %2507 = vmatprep.subr.mxu1 %v1093_v49  ;;  %2437 = vmatpush2.msra.mxu0 %v964_v52  ;;  %v1341_v0 = vld [vmem:[#allocation5 + $0x25e8] sm:$0xff]  ;;  %v1340_v2 = vld [vmem:[#allocation5 + $0x25e0] sm:$0xff] }
 0x15a   :  { %2508 = vmatpush2.msra.mxu1 %v1092_v53  ;;  %2438 = vmatprep.subr.mxu0 %v961_v55  ;;  %v1209_v3 = vld [vmem:[#allocation5 + $0x21c8] sm:$0xff]  ;;  %v1208_v5 = vld [vmem:[#allocation5 + $0x21c0] sm:$0xff] }
 0x15b   :  { %2509 = vmatprep.subr.mxu1 %v1089_v56  ;;  %2439 = vmatpush2.msra.mxu0 %v960_v58  ;;  %v1337_v4 = vld [vmem:[#allocation5 + $0x25c8] sm:$0xff]  ;;  %v1336_v6 = vld [vmem:[#allocation5 + $0x25c0] sm:$0xff] }
 0x15c   :  { %2440 = vmatprep.mubr.f32.mxu0 %v4327_v57  ;;  %2510 = vmatpush2.msra.mxu1 %v1088_v60  ;;  %v1205_v8 = vld [vmem:[#allocation5 + $0x21a8] sm:$0xff]  ;;  %v1204_v12 = vld [vmem:[#allocation5 + $0x21a0] sm:$0xff] }
 0x15d   :  { %2441 = vmatmul.mubr.f32.vlgmr.msra.gmra.mxu0 %v4329_v59  ;;  %2511 = vmatprep.mubr.f32.mxu1 %v4331_v61  ;;  %v1333_v10 = vld [vmem:[#allocation5 + $0x25a8] sm:$0xff]  ;;  %v1332_v16 = vld [vmem:[#allocation5 + $0x25a0] sm:$0xff] }
 0x15e   :  { %2518 = vmatprep.subr.mxu0 %v1213_v62  ;;  %2589 = vmatprep.subr.mxu1 %v1341_v0  ;;  %v1201_v18 = vld [vmem:[#allocation5 + $0x2188] sm:$0xff]  ;;  %v1200_v21 = vld [vmem:[#allocation5 + $0x2180] sm:$0xff] }
 0x15f   :  { %2512 = vmatmul.mubr.f32.vlgmr.msra.gmra.mxu1 %v4333_v63  ;;  %2519 = vmatpush1.msra.mxu0 %v1212_v1  ;;  %v1329_v20 = vld [vmem:[#allocation5 + $0x2588] sm:$0xff]  ;;  %v1328_v22 = vld [vmem:[#allocation5 + $0x2580] sm:$0xff] }
 0x160   :  { %2590 = vmatpush1.msra.mxu1 %v1340_v2  ;;  %2520 = vmatprep.subr.mxu0 %v1209_v3  ;;  %v1197_v23 = vld [vmem:[#allocation5 + $0x2168] sm:$0xff]  ;;  %v1196_v25 = vld [vmem:[#allocation5 + $0x2160] sm:$0xff] }
 0x161   :  { %2591 = vmatprep.subr.mxu1 %v1337_v4  ;;  %2521 = vmatpush1.msra.mxu0 %v1208_v5  ;;  %v1325_v24 = vld [vmem:[#allocation5 + $0x2568] sm:$0xff]  ;;  %v1324_v26 = vld [vmem:[#allocation5 + $0x2560] sm:$0xff] }
 0x162   :  { %2592 = vmatpush1.msra.mxu1 %v1336_v6  ;;  %2522 = vmatprep.subr.mxu0 %v1205_v8  ;;  %v1193_v27 = vld [vmem:[#allocation5 + $0x2148] sm:$0xff]  ;;  %v1192_v29 = vld [vmem:[#allocation5 + $0x2140] sm:$0xff] }
 0x163   :  { %2593 = vmatprep.subr.mxu1 %v1333_v10  ;;  %2523 = vmatpush1.msra.mxu0 %v1204_v12  ;;  %v1321_v28 = vld [vmem:[#allocation5 + $0x2548] sm:$0xff]  ;;  %v1320_v30 = vld [vmem:[#allocation5 + $0x2540] sm:$0xff] }
 0x164   :  { %2594 = vmatpush1.msra.mxu1 %v1332_v16  ;;  %2524 = vmatprep.subr.mxu0 %v1201_v18  ;;  %v1189_v31 = vld [vmem:[#allocation5 + $0x2128] sm:$0xff]  ;;  %v1188_v33 = vld [vmem:[#allocation5 + $0x2120] sm:$0xff] }
 0x165   :  { %2595 = vmatprep.subr.mxu1 %v1329_v20  ;;  %2525 = vmatpush1.msra.mxu0 %v1200_v21  ;;  %v1317_v32 = vld [vmem:[#allocation5 + $0x2528] sm:$0xff]  ;;  %v1316_v34 = vld [vmem:[#allocation5 + $0x2520] sm:$0xff] }
 0x166   :  { %2596 = vmatpush1.msra.mxu1 %v1328_v22  ;;  %2526 = vmatprep.subr.mxu0 %v1197_v23  ;;  %v1185_v35 = vld [vmem:[#allocation5 + $0x2108] sm:$0xff]  ;;  %v1184_v38 = vld [vmem:[#allocation5 + $0x2100] sm:$0xff] }
 0x167   :  { %2597 = vmatprep.subr.mxu1 %v1325_v24  ;;  %2527 = vmatpush1.msra.mxu0 %v1196_v25  ;;  %v1313_v36 = vld [vmem:[#allocation5 + $0x2508] sm:$0xff]  ;;  %v1312_v40 = vld [vmem:[#allocation5 + $0x2500] sm:$0xff] }
 0x168   :  { %2598 = vmatpush1.msra.mxu1 %v1324_v26  ;;  %2528 = vmatprep.subr.mxu0 %v1193_v27  ;;  %v1181_v43 = vld [vmem:[#allocation5 + $0x20e8] sm:$0xff]  ;;  %v1180_v46 = vld [vmem:[#allocation5 + $0x20e0] sm:$0xff] }
 0x169   :  { %2599 = vmatprep.subr.mxu1 %v1321_v28  ;;  %2529 = vmatpush1.msra.mxu0 %v1192_v29  ;;  %v1309_v45 = vld [vmem:[#allocation5 + $0x24e8] sm:$0xff]  ;;  %v1308_v47 = vld [vmem:[#allocation5 + $0x24e0] sm:$0xff] }
 0x16a   :  { %2600 = vmatpush1.msra.mxu1 %v1320_v30  ;;  %2530 = vmatprep.subr.mxu0 %v1189_v31  ;;  %v1177_v48 = vld [vmem:[#allocation5 + $0x20c8] sm:$0xff]  ;;  %v1176_v50 = vld [vmem:[#allocation5 + $0x20c0] sm:$0xff] }
 0x16b   :  { %2601 = vmatprep.subr.mxu1 %v1317_v32  ;;  %2531 = vmatpush1.msra.mxu0 %v1188_v33  ;;  %v1305_v49 = vld [vmem:[#allocation5 + $0x24c8] sm:$0xff]  ;;  %v1304_v51 = vld [vmem:[#allocation5 + $0x24c0] sm:$0xff] }
 0x16c   :  { %2602 = vmatpush1.msra.mxu1 %v1316_v34  ;;  %2532 = vmatprep.subr.mxu0 %v1185_v35  ;;  %v1173_v52 = vld [vmem:[#allocation5 + $0x20a8] sm:$0xff]  ;;  %v1172_v55 = vld [vmem:[#allocation5 + $0x20a0] sm:$0xff] }
 0x16d   :  { %2603 = vmatprep.subr.mxu1 %v1313_v36  ;;  %2533 = vmatpush1.msra.mxu0 %v1184_v38  ;;  %v1301_v53 = vld [vmem:[#allocation5 + $0x24a8] sm:$0xff]  ;;  %v1300_v56 = vld [vmem:[#allocation5 + $0x24a0] sm:$0xff] }
 0x16e   :  { %2604 = vmatpush1.msra.mxu1 %v1312_v40  ;;  %2534 = vmatprep.subr.mxu0 %v1181_v43  ;;  %v1169_v58 = vld [vmem:[#allocation5 + $0x2088] sm:$0xff]  ;;  %v1168_v62 = vld [vmem:[#allocation5 + $0x2080] sm:$0xff] }
 0x16f   :  { %2605 = vmatprep.subr.mxu1 %v1309_v45  ;;  %2535 = vmatpush1.msra.mxu0 %v1180_v46  ;;  %v1297_v60 = vld [vmem:[#allocation5 + $0x2488] sm:$0xff]  ;;  %v1296_v0 = vld [vmem:[#allocation5 + $0x2480] sm:$0xff] }
 0x170   :  { %2606 = vmatpush1.msra.mxu1 %v1308_v47  ;;  %2536 = vmatprep.subr.mxu0 %v1177_v48  ;;  %v1165_v1 = vld [vmem:[#allocation5 + $0x2068] sm:$0xff]  ;;  %v1164_v3 = vld [vmem:[#allocation5 + $0x2060] sm:$0xff] }
 0x171   :  { %2607 = vmatprep.subr.mxu1 %v1305_v49  ;;  %2537 = vmatpush1.msra.mxu0 %v1176_v50  ;;  %v1293_v2 = vld [vmem:[#allocation5 + $0x2468] sm:$0xff]  ;;  %v1292_v4 = vld [vmem:[#allocation5 + $0x2460] sm:$0xff] }
 0x172   :  { %2608 = vmatpush1.msra.mxu1 %v1304_v51  ;;  %2538 = vmatprep.subr.mxu0 %v1173_v52  ;;  %v1161_v5 = vld [vmem:[#allocation5 + $0x2048] sm:$0xff]  ;;  %v1160_v8 = vld [vmem:[#allocation5 + $0x2040] sm:$0xff] }
 0x173   :  { %2609 = vmatprep.subr.mxu1 %v1301_v53  ;;  %2539 = vmatpush1.msra.mxu0 %v1172_v55  ;;  %v1289_v6 = vld [vmem:[#allocation5 + $0x2448] sm:$0xff]  ;;  %v1288_v10 = vld [vmem:[#allocation5 + $0x2440] sm:$0xff] }
 0x174   :  { %2610 = vmatpush1.msra.mxu1 %v1300_v56  ;;  %2540 = vmatprep.subr.mxu0 %v1169_v58  ;;  %v1157_v12 = vld [vmem:[#allocation5 + $0x2028] sm:$0xff]  ;;  %v1156_v18 = vld [vmem:[#allocation5 + $0x2020] sm:$0xff] }
 0x175   :  { %2611 = vmatprep.subr.mxu1 %v1297_v60  ;;  %2541 = vmatpush1.msra.mxu0 %v1168_v62  ;;  %v1285_v16 = vld [vmem:[#allocation5 + $0x2428] sm:$0xff]  ;;  %v1284_v20 = vld [vmem:[#allocation5 + $0x2420] sm:$0xff] }
 0x176   :  { %2612 = vmatpush1.msra.mxu1 %v1296_v0  ;;  %2542 = vmatprep.subr.mxu0 %v1165_v1  ;;  %v1153_v21 = vld [vmem:[#allocation5 + $0x2008] sm:$0xff]  ;;  %v1152_v23 = vld [vmem:[#allocation5 + $0x2000] sm:$0xff] }
 0x177   :  { %2613 = vmatprep.subr.mxu1 %v1293_v2  ;;  %2543 = vmatpush1.msra.mxu0 %v1164_v3  ;;  %v1281_v22 = vld [vmem:[#allocation5 + $0x2408] sm:$0xff]  ;;  %v1280_v24 = vld [vmem:[#allocation5 + $0x2400] sm:$0xff] }
 0x178   :  { %2614 = vmatpush1.msra.mxu1 %v1292_v4  ;;  %2544 = vmatprep.subr.mxu0 %v1161_v5  ;;  %v1277_v25 = vld [vmem:[#allocation5 + $0x23e8] sm:$0xff]  ;;  %v1276_v27 = vld [vmem:[#allocation5 + $0x23e0] sm:$0xff] }
 0x179   :  { %2615 = vmatprep.subr.mxu1 %v1289_v6  ;;  %2545 = vmatpush1.msra.mxu0 %v1160_v8  ;;  %v1405_v26 = vld [vmem:[#allocation5 + $0x27e8] sm:$0xff]  ;;  %v1404_v28 = vld [vmem:[#allocation5 + $0x27e0] sm:$0xff] }
 0x17a   :  { %2616 = vmatpush1.msra.mxu1 %v1288_v10  ;;  %2546 = vmatprep.subr.mxu0 %v1157_v12  ;;  %v1273_v29 = vld [vmem:[#allocation5 + $0x23c8] sm:$0xff]  ;;  %v1272_v31 = vld [vmem:[#allocation5 + $0x23c0] sm:$0xff] }
 0x17b   :  { %2617 = vmatprep.subr.mxu1 %v1285_v16  ;;  %2547 = vmatpush1.msra.mxu0 %v1156_v18  ;;  %v1401_v30 = vld [vmem:[#allocation5 + $0x27c8] sm:$0xff]  ;;  %v1400_v32 = vld [vmem:[#allocation5 + $0x27c0] sm:$0xff] }
 0x17c   :  { %2618 = vmatpush1.msra.mxu1 %v1284_v20  ;;  %2548 = vmatprep.subr.mxu0 %v1153_v21  ;;  %v1269_v33 = vld [vmem:[#allocation5 + $0x23a8] sm:$0xff]  ;;  %v1268_v35 = vld [vmem:[#allocation5 + $0x23a0] sm:$0xff] }
 0x17d   :  { %2619 = vmatprep.subr.mxu1 %v1281_v22  ;;  %2549 = vmatpush1.msra.mxu0 %v1152_v23  ;;  %v1397_v34 = vld [vmem:[#allocation5 + $0x27a8] sm:$0xff]  ;;  %v1396_v36 = vld [vmem:[#allocation5 + $0x27a0] sm:$0xff] }
 0x17e   :  { %2620 = vmatpush1.msra.mxu1 %v1280_v24  ;;  %2550 = vmatprep.subr.mxu0 %v1277_v25  ;;  %v1265_v38 = vld [vmem:[#allocation5 + $0x2388] sm:$0xff]  ;;  %v1264_v43 = vld [vmem:[#allocation5 + $0x2380] sm:$0xff] }
 0x17f   :  { %2621 = vmatprep.subr.mxu1 %v1405_v26  ;;  %2551 = vmatpush2.msra.mxu0 %v1276_v27  ;;  %v1393_v40 = vld [vmem:[#allocation5 + $0x2788] sm:$0xff]  ;;  %v1392_v45 = vld [vmem:[#allocation5 + $0x2780] sm:$0xff] }
 0x180   :  { %2622 = vmatpush2.msra.mxu1 %v1404_v28  ;;  %2552 = vmatprep.subr.mxu0 %v1273_v29  ;;  %v1261_v46 = vld [vmem:[#allocation5 + $0x2368] sm:$0xff]  ;;  %v1260_v48 = vld [vmem:[#allocation5 + $0x2360] sm:$0xff] }
 0x181   :  { %2623 = vmatprep.subr.mxu1 %v1401_v30  ;;  %2553 = vmatpush2.msra.mxu0 %v1272_v31  ;;  %v1389_v47 = vld [vmem:[#allocation5 + $0x2768] sm:$0xff]  ;;  %v1388_v49 = vld [vmem:[#allocation5 + $0x2760] sm:$0xff] }
 0x182   :  { %2624 = vmatpush2.msra.mxu1 %v1400_v32  ;;  %2554 = vmatprep.subr.mxu0 %v1269_v33  ;;  %v1257_v50 = vld [vmem:[#allocation5 + $0x2348] sm:$0xff]  ;;  %v1256_v52 = vld [vmem:[#allocation5 + $0x2340] sm:$0xff] }
 0x183   :  { %2625 = vmatprep.subr.mxu1 %v1397_v34  ;;  %2555 = vmatpush2.msra.mxu0 %v1268_v35  ;;  %v1385_v51 = vld [vmem:[#allocation5 + $0x2748] sm:$0xff]  ;;  %v1384_v53 = vld [vmem:[#allocation5 + $0x2740] sm:$0xff] }
 0x184   :  { %2626 = vmatpush2.msra.mxu1 %v1396_v36  ;;  %2556 = vmatprep.subr.mxu0 %v1265_v38  ;;  %v1253_v55 = vld [vmem:[#allocation5 + $0x2328] sm:$0xff]  ;;  %v1252_v58 = vld [vmem:[#allocation5 + $0x2320] sm:$0xff] }
 0x185   :  { %2627 = vmatprep.subr.mxu1 %v1393_v40  ;;  %2557 = vmatpush2.msra.mxu0 %v1264_v43  ;;  %v1381_v56 = vld [vmem:[#allocation5 + $0x2728] sm:$0xff]  ;;  %v1380_v60 = vld [vmem:[#allocation5 + $0x2720] sm:$0xff] }
 0x186   :  { %2628 = vmatpush2.msra.mxu1 %v1392_v45  ;;  %2558 = vmatprep.subr.mxu0 %v1261_v46  ;;  %v1249_v62 = vld [vmem:[#allocation5 + $0x2308] sm:$0xff]  ;;  %v1248_v1 = vld [vmem:[#allocation5 + $0x2300] sm:$0xff] }
 0x187   :  { %2629 = vmatprep.subr.mxu1 %v1389_v47  ;;  %2559 = vmatpush2.msra.mxu0 %v1260_v48  ;;  %v1377_v0 = vld [vmem:[#allocation5 + $0x2708] sm:$0xff]  ;;  %v1376_v2 = vld [vmem:[#allocation5 + $0x2700] sm:$0xff] }
 0x188   :  { %2630 = vmatpush2.msra.mxu1 %v1388_v49  ;;  %2560 = vmatprep.subr.mxu0 %v1257_v50  ;;  %v1245_v3 = vld [vmem:[#allocation5 + $0x22e8] sm:$0xff]  ;;  %v1244_v5 = vld [vmem:[#allocation5 + $0x22e0] sm:$0xff] }
 0x189   :  { %2631 = vmatprep.subr.mxu1 %v1385_v51  ;;  %2561 = vmatpush2.msra.mxu0 %v1256_v52  ;;  %v1373_v4 = vld [vmem:[#allocation5 + $0x26e8] sm:$0xff]  ;;  %v1372_v6 = vld [vmem:[#allocation5 + $0x26e0] sm:$0xff] }
 0x18a   :  { %2632 = vmatpush2.msra.mxu1 %v1384_v53  ;;  %2562 = vmatprep.subr.mxu0 %v1253_v55  ;;  %v1241_v8 = vld [vmem:[#allocation5 + $0x22c8] sm:$0xff]  ;;  %v1240_v12 = vld [vmem:[#allocation5 + $0x22c0] sm:$0xff] }
 0x18b   :  { %2633 = vmatprep.subr.mxu1 %v1381_v56  ;;  %2563 = vmatpush2.msra.mxu0 %v1252_v58  ;;  %v1369_v10 = vld [vmem:[#allocation5 + $0x26c8] sm:$0xff]  ;;  %v1368_v16 = vld [vmem:[#allocation5 + $0x26c0] sm:$0xff] }
 0x18c   :  { %2634 = vmatpush2.msra.mxu1 %v1380_v60  ;;  %2564 = vmatprep.subr.mxu0 %v1249_v62  ;;  %v1237_v18 = vld [vmem:[#allocation5 + $0x22a8] sm:$0xff]  ;;  %v1236_v21 = vld [vmem:[#allocation5 + $0x22a0] sm:$0xff] }
 0x18d   :  { %2635 = vmatprep.subr.mxu1 %v1377_v0  ;;  %2565 = vmatpush2.msra.mxu0 %v1248_v1  ;;  %v1365_v20 = vld [vmem:[#allocation5 + $0x26a8] sm:$0xff]  ;;  %v1364_v22 = vld [vmem:[#allocation5 + $0x26a0] sm:$0xff] }
 0x18e   :  { %2636 = vmatpush2.msra.mxu1 %v1376_v2  ;;  %2566 = vmatprep.subr.mxu0 %v1245_v3  ;;  %v1233_v23 = vld [vmem:[#allocation5 + $0x2288] sm:$0xff]  ;;  %v4052_v25 = vld [vmem:[#allocation3 + $0x20] ss:$48 sps:$4 sm:$0xff]   ;;  %v4056_v31 = vld [vmem:[#allocation3 + $0x24] ss:$48 sps:$4 sm:$0xff]  }
 0x18f   :  { %2637 = vmatprep.subr.mxu1 %v1373_v4  ;;  %2567 = vmatpush2.msra.mxu0 %v1244_v5  ;;  %v1361_v24 = vld [vmem:[#allocation5 + $0x2688] sm:$0xff]  ;;  %v4054_v26 = vld [vmem:[#allocation3 + $0x80] ss:$48 sps:$4 sm:$0xff]   ;;  %v4057_v32 = vld [vmem:[#allocation3 + $0x84] ss:$48 sps:$4 sm:$0xff]   ;;  %v1864_v38 = vrot.slane %v4052_v25, %v4273_v54  ;;  %v1871_v48 = vrot.slane %v4056_v31, %v4273_v54 }
 0x190   :  { %2638 = vmatpush2.msra.mxu1 %v1372_v6  ;;  %2568 = vmatprep.subr.mxu0 %v1241_v8  ;;  %v1232_v27 = vld [vmem:[#allocation5 + $0x2280] sm:$0xff]  ;;  %v1229_v29 = vld [vmem:[#allocation5 + $0x2268] sm:$0xff]  ;;  %v1878_v40 = vrot.slane %v4054_v26, %v4273_v54  ;;  %v1885_v49 = vrot.slane %v4057_v32, %v4273_v54 }
 0x191   :  { %2639 = vmatprep.subr.mxu1 %v1369_v10  ;;  %2569 = vmatpush2.msra.mxu0 %v1240_v12  ;;  %v1360_v28 = vld [vmem:[#allocation5 + $0x2680] sm:$0xff]  ;;  %v1357_v30 = vld [vmem:[#allocation5 + $0x2668] sm:$0xff] }
 0x192   :  { %2640 = vmatpush2.msra.mxu1 %v1368_v16  ;;  %2570 = vmatprep.subr.mxu0 %v1237_v18  ;;  %v1228_v33 = vld [vmem:[#allocation5 + $0x2260] sm:$0xff]  ;;  %v1225_v35 = vld [vmem:[#allocation5 + $0x2248] sm:$0xff]  ;;  %v4343_v55 = vcombine.high %v1864_v38, %v1878_v40  ;;  %v4345_v58 = vcombine.low %v1864_v38, %v1878_v40  ;;  %v4347_v62 = vcombine.high %v1871_v48, %v1885_v49 }
 0x193   :  { %2641 = vmatprep.subr.mxu1 %v1365_v20  ;;  %2571 = vmatpush2.msra.mxu0 %v1236_v21  ;;  %v1356_v34 = vld [vmem:[#allocation5 + $0x2660] sm:$0xff]  ;;  %v1353_v36 = vld [vmem:[#allocation5 + $0x2648] sm:$0xff]  ;;  %v4349_v1 = vcombine.low %v1871_v48, %v1885_v49 }
 0x194   :  { %2642 = vmatpush2.msra.mxu1 %v1364_v22  ;;  %2572 = vmatprep.subr.mxu0 %v1233_v23  ;;  %v1224_v43 = vld [vmem:[#allocation5 + $0x2240] sm:$0xff]  ;;  %v1221_v46 = vld [vmem:[#allocation5 + $0x2228] sm:$0xff] }
 0x195   :  { %2643 = vmatprep.subr.mxu1 %v1361_v24  ;;  %2573 = vmatpush2.msra.mxu0 %v1232_v27  ;;  %v1352_v45 = vld [vmem:[#allocation5 + $0x2640] sm:$0xff]  ;;  %v1349_v47 = vld [vmem:[#allocation5 + $0x2628] sm:$0xff] }
 0x196   :  { %2644 = vmatpush2.msra.mxu1 %v1360_v28  ;;  %2574 = vmatprep.subr.mxu0 %v1229_v29  ;;  %v1220_v50 = vld [vmem:[#allocation5 + $0x2220] sm:$0xff]  ;;  %v1217_v52 = vld [vmem:[#allocation5 + $0x2208] sm:$0xff] }
 0x197   :  { %2645 = vmatprep.subr.mxu1 %v1357_v30  ;;  %2575 = vmatpush2.msra.mxu0 %v1228_v33  ;;  %v1348_v51 = vld [vmem:[#allocation5 + $0x2620] sm:$0xff]  ;;  %v1345_v53 = vld [vmem:[#allocation5 + $0x2608] sm:$0xff] }
 0x198   :  { %2646 = vmatpush2.msra.mxu1 %v1356_v34  ;;  %2576 = vmatprep.subr.mxu0 %v1225_v35  ;;  %v1216_v56 = vld [vmem:[#allocation5 + $0x2200] sm:$0xff]  ;;  %v1469_v0 = vld [vmem:[#allocation5 + $0x29e8] sm:$0xff] }
 0x199   :  { %2647 = vmatprep.subr.mxu1 %v1353_v36  ;;  %2577 = vmatpush2.msra.mxu0 %v1224_v43  ;;  %v1344_v60 = vld [vmem:[#allocation5 + $0x2600] sm:$0xff]  ;;  %v1597_v2 = vld [vmem:[#allocation5 + $0x2de8] sm:$0xff] }
 0x19a   :  { %2648 = vmatpush2.msra.mxu1 %v1352_v45  ;;  %2578 = vmatprep.subr.mxu0 %v1221_v46  ;;  %v1468_v3 = vld [vmem:[#allocation5 + $0x29e0] sm:$0xff]  ;;  %v1465_v5 = vld [vmem:[#allocation5 + $0x29c8] sm:$0xff] }
 0x19b   :  { %2649 = vmatprep.subr.mxu1 %v1349_v47  ;;  %2579 = vmatpush2.msra.mxu0 %v1220_v50  ;;  %v1596_v4 = vld [vmem:[#allocation5 + $0x2de0] sm:$0xff]  ;;  %v1593_v6 = vld [vmem:[#allocation5 + $0x2dc8] sm:$0xff] }
 0x19c   :  { %2650 = vmatpush2.msra.mxu1 %v1348_v51  ;;  %2580 = vmatprep.subr.mxu0 %v1217_v52  ;;  %v1464_v8 = vld [vmem:[#allocation5 + $0x29c0] sm:$0xff]  ;;  %v1461_v12 = vld [vmem:[#allocation5 + $0x29a8] sm:$0xff] }
 0x19d   :  { %2651 = vmatprep.subr.mxu1 %v1345_v53  ;;  %2581 = vmatpush2.msra.mxu0 %v1216_v56  ;;  %v1592_v10 = vld [vmem:[#allocation5 + $0x2dc0] sm:$0xff]  ;;  %v1589_v16 = vld [vmem:[#allocation5 + $0x2da8] sm:$0xff] }
 0x19e   :  { %2582 = vmatprep.mubr.f32.mxu0 %v4343_v55  ;;  %2652 = vmatpush2.msra.mxu1 %v1344_v60  ;;  %v1460_v18 = vld [vmem:[#allocation5 + $0x29a0] sm:$0xff]  ;;  %v1457_v21 = vld [vmem:[#allocation5 + $0x2988] sm:$0xff] }
 0x19f   :  { %2583 = vmatmul.mubr.f32.vlgmr.msra.gmra.mxu0 %v4345_v58  ;;  %2653 = vmatprep.mubr.f32.mxu1 %v4347_v62  ;;  %v1588_v20 = vld [vmem:[#allocation5 + $0x2da0] sm:$0xff]  ;;  %v1585_v22 = vld [vmem:[#allocation5 + $0x2d88] sm:$0xff] }
 0x1a0   :  { %2660 = vmatprep.subr.mxu0 %v1469_v0  ;;  %2731 = vmatprep.subr.mxu1 %v1597_v2  ;;  %v1456_v23 = vld [vmem:[#allocation5 + $0x2980] sm:$0xff]  ;;  %v1453_v25 = vld [vmem:[#allocation5 + $0x2968] sm:$0xff] }
 0x1a1   :  { %2654 = vmatmul.mubr.f32.vlgmr.msra.gmra.mxu1 %v4349_v1  ;;  %2661 = vmatpush1.msra.mxu0 %v1468_v3  ;;  %v1584_v24 = vld [vmem:[#allocation5 + $0x2d80] sm:$0xff]  ;;  %v1581_v26 = vld [vmem:[#allocation5 + $0x2d68] sm:$0xff] }
 0x1a2   :  { %2732 = vmatpush1.msra.mxu1 %v1596_v4  ;;  %2662 = vmatprep.subr.mxu0 %v1465_v5  ;;  %v1452_v27 = vld [vmem:[#allocation5 + $0x2960] sm:$0xff]  ;;  %v1449_v29 = vld [vmem:[#allocation5 + $0x2948] sm:$0xff] }
 0x1a3   :  { %2733 = vmatprep.subr.mxu1 %v1593_v6  ;;  %2663 = vmatpush1.msra.mxu0 %v1464_v8  ;;  %v1580_v28 = vld [vmem:[#allocation5 + $0x2d60] sm:$0xff]  ;;  %v1577_v30 = vld [vmem:[#allocation5 + $0x2d48] sm:$0xff] }
 0x1a4   :  { %2734 = vmatpush1.msra.mxu1 %v1592_v10  ;;  %2664 = vmatprep.subr.mxu0 %v1461_v12  ;;  %v1448_v31 = vld [vmem:[#allocation5 + $0x2940] sm:$0xff]  ;;  %v1445_v33 = vld [vmem:[#allocation5 + $0x2928] sm:$0xff] }
 0x1a5   :  { %2735 = vmatprep.subr.mxu1 %v1589_v16  ;;  %2665 = vmatpush1.msra.mxu0 %v1460_v18  ;;  %v1576_v32 = vld [vmem:[#allocation5 + $0x2d40] sm:$0xff]  ;;  %v1573_v34 = vld [vmem:[#allocation5 + $0x2d28] sm:$0xff] }
 0x1a6   :  { %2736 = vmatpush1.msra.mxu1 %v1588_v20  ;;  %2666 = vmatprep.subr.mxu0 %v1457_v21  ;;  %v1444_v35 = vld [vmem:[#allocation5 + $0x2920] sm:$0xff]  ;;  %v1441_v38 = vld [vmem:[#allocation5 + $0x2908] sm:$0xff] }
 0x1a7   :  { %2737 = vmatprep.subr.mxu1 %v1585_v22  ;;  %2667 = vmatpush1.msra.mxu0 %v1456_v23  ;;  %v1572_v36 = vld [vmem:[#allocation5 + $0x2d20] sm:$0xff]  ;;  %v1569_v40 = vld [vmem:[#allocation5 + $0x2d08] sm:$0xff] }
 0x1a8   :  { %2738 = vmatpush1.msra.mxu1 %v1584_v24  ;;  %2668 = vmatprep.subr.mxu0 %v1453_v25  ;;  %v1440_v43 = vld [vmem:[#allocation5 + $0x2900] sm:$0xff]  ;;  %v1437_v46 = vld [vmem:[#allocation5 + $0x28e8] sm:$0xff] }
 0x1a9   :  { %2739 = vmatprep.subr.mxu1 %v1581_v26  ;;  %2669 = vmatpush1.msra.mxu0 %v1452_v27  ;;  %v1568_v45 = vld [vmem:[#allocation5 + $0x2d00] sm:$0xff]  ;;  %v1565_v47 = vld [vmem:[#allocation5 + $0x2ce8] sm:$0xff] }
 0x1aa   :  { %2740 = vmatpush1.msra.mxu1 %v1580_v28  ;;  %2670 = vmatprep.subr.mxu0 %v1449_v29  ;;  %v1436_v48 = vld [vmem:[#allocation5 + $0x28e0] sm:$0xff]  ;;  %v1433_v50 = vld [vmem:[#allocation5 + $0x28c8] sm:$0xff] }
 0x1ab   :  { %2741 = vmatprep.subr.mxu1 %v1577_v30  ;;  %2671 = vmatpush1.msra.mxu0 %v1448_v31  ;;  %v1564_v49 = vld [vmem:[#allocation5 + $0x2ce0] sm:$0xff]  ;;  %v1561_v51 = vld [vmem:[#allocation5 + $0x2cc8] sm:$0xff] }
 0x1ac   :  { %2742 = vmatpush1.msra.mxu1 %v1576_v32  ;;  %2672 = vmatprep.subr.mxu0 %v1445_v33  ;;  %v1432_v52 = vld [vmem:[#allocation5 + $0x28c0] sm:$0xff]  ;;  %v1429_v56 = vld [vmem:[#allocation5 + $0x28a8] sm:$0xff] }
 0x1ad   :  { %2743 = vmatprep.subr.mxu1 %v1573_v34  ;;  %2673 = vmatpush1.msra.mxu0 %v1444_v35  ;;  %v1560_v53 = vld [vmem:[#allocation5 + $0x2cc0] sm:$0xff]  ;;  %v1557_v60 = vld [vmem:[#allocation5 + $0x2ca8] sm:$0xff] }
 0x1ae   :  { %2744 = vmatpush1.msra.mxu1 %v1572_v36  ;;  %2674 = vmatprep.subr.mxu0 %v1441_v38  ;;  %v1428_v0 = vld [vmem:[#allocation5 + $0x28a0] sm:$0xff]  ;;  %v1425_v3 = vld [vmem:[#allocation5 + $0x2888] sm:$0xff] }
 0x1af   :  { %2745 = vmatprep.subr.mxu1 %v1569_v40  ;;  %2675 = vmatpush1.msra.mxu0 %v1440_v43  ;;  %v1556_v2 = vld [vmem:[#allocation5 + $0x2ca0] sm:$0xff]  ;;  %v1553_v4 = vld [vmem:[#allocation5 + $0x2c88] sm:$0xff] }
 0x1b0   :  { %2746 = vmatpush1.msra.mxu1 %v1568_v45  ;;  %2676 = vmatprep.subr.mxu0 %v1437_v46  ;;  %v1424_v5 = vld [vmem:[#allocation5 + $0x2880] sm:$0xff]  ;;  %v1421_v8 = vld [vmem:[#allocation5 + $0x2868] sm:$0xff] }
 0x1b1   :  { %2747 = vmatprep.subr.mxu1 %v1565_v47  ;;  %2677 = vmatpush1.msra.mxu0 %v1436_v48  ;;  %v1552_v6 = vld [vmem:[#allocation5 + $0x2c80] sm:$0xff]  ;;  %v1549_v10 = vld [vmem:[#allocation5 + $0x2c68] sm:$0xff] }
 0x1b2   :  { %2748 = vmatpush1.msra.mxu1 %v1564_v49  ;;  %2678 = vmatprep.subr.mxu0 %v1433_v50  ;;  %v1420_v12 = vld [vmem:[#allocation5 + $0x2860] sm:$0xff]  ;;  %v1417_v18 = vld [vmem:[#allocation5 + $0x2848] sm:$0xff] }
 0x1b3   :  { %2749 = vmatprep.subr.mxu1 %v1561_v51  ;;  %2679 = vmatpush1.msra.mxu0 %v1432_v52  ;;  %v1548_v16 = vld [vmem:[#allocation5 + $0x2c60] sm:$0xff]  ;;  %v1545_v20 = vld [vmem:[#allocation5 + $0x2c48] sm:$0xff] }
 0x1b4   :  { %2750 = vmatpush1.msra.mxu1 %v1560_v53  ;;  %2680 = vmatprep.subr.mxu0 %v1429_v56  ;;  %v1416_v21 = vld [vmem:[#allocation5 + $0x2840] sm:$0xff]  ;;  %v1413_v23 = vld [vmem:[#allocation5 + $0x2828] sm:$0xff] }
 0x1b5   :  { %2751 = vmatprep.subr.mxu1 %v1557_v60  ;;  %2681 = vmatpush1.msra.mxu0 %v1428_v0  ;;  %v1544_v22 = vld [vmem:[#allocation5 + $0x2c40] sm:$0xff]  ;;  %v1541_v24 = vld [vmem:[#allocation5 + $0x2c28] sm:$0xff] }
 0x1b6   :  { %2752 = vmatpush1.msra.mxu1 %v1556_v2  ;;  %2682 = vmatprep.subr.mxu0 %v1425_v3  ;;  %v1412_v25 = vld [vmem:[#allocation5 + $0x2820] sm:$0xff]  ;;  %v1409_v27 = vld [vmem:[#allocation5 + $0x2808] sm:$0xff] }
 0x1b7   :  { %2753 = vmatprep.subr.mxu1 %v1553_v4  ;;  %2683 = vmatpush1.msra.mxu0 %v1424_v5  ;;  %v1540_v26 = vld [vmem:[#allocation5 + $0x2c20] sm:$0xff]  ;;  %v1537_v28 = vld [vmem:[#allocation5 + $0x2c08] sm:$0xff] }
 0x1b8   :  { %2754 = vmatpush1.msra.mxu1 %v1552_v6  ;;  %2684 = vmatprep.subr.mxu0 %v1421_v8  ;;  %v1408_v29 = vld [vmem:[#allocation5 + $0x2800] sm:$0xff]  ;;  %v1533_v31 = vld [vmem:[#allocation5 + $0x2be8] sm:$0xff] }
 0x1b9   :  { %2755 = vmatprep.subr.mxu1 %v1549_v10  ;;  %2685 = vmatpush1.msra.mxu0 %v1420_v12  ;;  %v1536_v30 = vld [vmem:[#allocation5 + $0x2c00] sm:$0xff]  ;;  %v1661_v32 = vld [vmem:[#allocation5 + $0x2fe8] sm:$0xff] }
 0x1ba   :  { %2756 = vmatpush1.msra.mxu1 %v1548_v16  ;;  %2686 = vmatprep.subr.mxu0 %v1417_v18  ;;  %v1532_v33 = vld [vmem:[#allocation5 + $0x2be0] sm:$0xff]  ;;  %v1529_v35 = vld [vmem:[#allocation5 + $0x2bc8] sm:$0xff] }
 0x1bb   :  { %2757 = vmatprep.subr.mxu1 %v1545_v20  ;;  %2687 = vmatpush1.msra.mxu0 %v1416_v21  ;;  %v1660_v34 = vld [vmem:[#allocation5 + $0x2fe0] sm:$0xff]  ;;  %v1657_v36 = vld [vmem:[#allocation5 + $0x2fc8] sm:$0xff] }
 0x1bc   :  { %2758 = vmatpush1.msra.mxu1 %v1544_v22  ;;  %2688 = vmatprep.subr.mxu0 %v1413_v23  ;;  %v1528_v38 = vld [vmem:[#allocation5 + $0x2bc0] sm:$0xff]  ;;  %v1525_v43 = vld [vmem:[#allocation5 + $0x2ba8] sm:$0xff] }
 0x1bd   :  { %2759 = vmatprep.subr.mxu1 %v1541_v24  ;;  %2689 = vmatpush1.msra.mxu0 %v1412_v25  ;;  %v1656_v40 = vld [vmem:[#allocation5 + $0x2fc0] sm:$0xff]  ;;  %v1653_v45 = vld [vmem:[#allocation5 + $0x2fa8] sm:$0xff] }
 0x1be   :  { %2760 = vmatpush1.msra.mxu1 %v1540_v26  ;;  %2690 = vmatprep.subr.mxu0 %v1409_v27  ;;  %v1524_v46 = vld [vmem:[#allocation5 + $0x2ba0] sm:$0xff]  ;;  %v1521_v48 = vld [vmem:[#allocation5 + $0x2b88] sm:$0xff] }
 0x1bf   :  { %2761 = vmatprep.subr.mxu1 %v1537_v28  ;;  %2691 = vmatpush1.msra.mxu0 %v1408_v29  ;;  %v1652_v47 = vld [vmem:[#allocation5 + $0x2fa0] sm:$0xff]  ;;  %v1649_v49 = vld [vmem:[#allocation5 + $0x2f88] sm:$0xff] }
 0x1c0   :  { %2762 = vmatpush1.msra.mxu1 %v1536_v30  ;;  %2692 = vmatprep.subr.mxu0 %v1533_v31  ;;  %v1520_v50 = vld [vmem:[#allocation5 + $0x2b80] sm:$0xff]  ;;  %v1517_v52 = vld [vmem:[#allocation5 + $0x2b68] sm:$0xff] }
 0x1c1   :  { %2763 = vmatprep.subr.mxu1 %v1661_v32  ;;  %2693 = vmatpush2.msra.mxu0 %v1532_v33  ;;  %v1648_v51 = vld [vmem:[#allocation5 + $0x2f80] sm:$0xff]  ;;  %v1645_v53 = vld [vmem:[#allocation5 + $0x2f68] sm:$0xff] }
 0x1c2   :  { %2764 = vmatpush2.msra.mxu1 %v1660_v34  ;;  %2694 = vmatprep.subr.mxu0 %v1529_v35  ;;  %v1516_v56 = vld [vmem:[#allocation5 + $0x2b60] sm:$0xff]  ;;  %v1513_v0 = vld [vmem:[#allocation5 + $0x2b48] sm:$0xff] }
 0x1c3   :  { %2765 = vmatprep.subr.mxu1 %v1657_v36  ;;  %2695 = vmatpush2.msra.mxu0 %v1528_v38  ;;  %v1644_v60 = vld [vmem:[#allocation5 + $0x2f60] sm:$0xff]  ;;  %v1641_v2 = vld [vmem:[#allocation5 + $0x2f48] sm:$0xff] }
 0x1c4   :  { %2766 = vmatpush2.msra.mxu1 %v1656_v40  ;;  %2696 = vmatprep.subr.mxu0 %v1525_v43  ;;  %v1512_v3 = vld [vmem:[#allocation5 + $0x2b40] sm:$0xff]  ;;  %v1509_v5 = vld [vmem:[#allocation5 + $0x2b28] sm:$0xff] }
 0x1c5   :  { %2767 = vmatprep.subr.mxu1 %v1653_v45  ;;  %2697 = vmatpush2.msra.mxu0 %v1524_v46  ;;  %v1640_v4 = vld [vmem:[#allocation5 + $0x2f40] sm:$0xff]  ;;  %v1637_v6 = vld [vmem:[#allocation5 + $0x2f28] sm:$0xff] }
 0x1c6   :  { %2768 = vmatpush2.msra.mxu1 %v1652_v47  ;;  %2698 = vmatprep.subr.mxu0 %v1521_v48  ;;  %v1508_v8 = vld [vmem:[#allocation5 + $0x2b20] sm:$0xff]  ;;  %v1505_v12 = vld [vmem:[#allocation5 + $0x2b08] sm:$0xff] }
 0x1c7   :  { %2769 = vmatprep.subr.mxu1 %v1649_v49  ;;  %2699 = vmatpush2.msra.mxu0 %v1520_v50  ;;  %v1636_v10 = vld [vmem:[#allocation5 + $0x2f20] sm:$0xff]  ;;  %v1633_v16 = vld [vmem:[#allocation5 + $0x2f08] sm:$0xff] }
 0x1c8   :  { %2770 = vmatpush2.msra.mxu1 %v1648_v51  ;;  %2700 = vmatprep.subr.mxu0 %v1517_v52  ;;  %v1504_v18 = vld [vmem:[#allocation5 + $0x2b00] sm:$0xff]  ;;  %v1501_v21 = vld [vmem:[#allocation5 + $0x2ae8] sm:$0xff] }
 0x1c9   :  { %2771 = vmatprep.subr.mxu1 %v1645_v53  ;;  %2701 = vmatpush2.msra.mxu0 %v1516_v56  ;;  %v1632_v20 = vld [vmem:[#allocation5 + $0x2f00] sm:$0xff]  ;;  %v1629_v22 = vld [vmem:[#allocation5 + $0x2ee8] sm:$0xff] }
 0x1ca   :  { %2772 = vmatpush2.msra.mxu1 %v1644_v60  ;;  %2702 = vmatprep.subr.mxu0 %v1513_v0  ;;  %v1500_v23 = vld [vmem:[#allocation5 + $0x2ae0] sm:$0xff]  ;;  %v1497_v25 = vld [vmem:[#allocation5 + $0x2ac8] sm:$0xff] }
 0x1cb   :  { %2773 = vmatprep.subr.mxu1 %v1641_v2  ;;  %2703 = vmatpush2.msra.mxu0 %v1512_v3  ;;  %v1628_v24 = vld [vmem:[#allocation5 + $0x2ee0] sm:$0xff]  ;;  %v1625_v26 = vld [vmem:[#allocation5 + $0x2ec8] sm:$0xff] }
 0x1cc   :  { %2774 = vmatpush2.msra.mxu1 %v1640_v4  ;;  %2704 = vmatprep.subr.mxu0 %v1509_v5  ;;  %v1496_v27 = vld [vmem:[#allocation5 + $0x2ac0] sm:$0xff]  ;;  %v1493_v29 = vld [vmem:[#allocation5 + $0x2aa8] sm:$0xff] }
 0x1cd   :  { %2775 = vmatprep.subr.mxu1 %v1637_v6  ;;  %2705 = vmatpush2.msra.mxu0 %v1508_v8  ;;  %v1624_v28 = vld [vmem:[#allocation5 + $0x2ec0] sm:$0xff]  ;;  %v1621_v30 = vld [vmem:[#allocation5 + $0x2ea8] sm:$0xff] }
 0x1ce   :  { %2776 = vmatpush2.msra.mxu1 %v1636_v10  ;;  %2706 = vmatprep.subr.mxu0 %v1505_v12  ;;  %v1492_v31 = vld [vmem:[#allocation5 + $0x2aa0] sm:$0xff]  ;;  %v1489_v33 = vld [vmem:[#allocation5 + $0x2a88] sm:$0xff] }
 0x1cf   :  { %2777 = vmatprep.subr.mxu1 %v1633_v16  ;;  %2707 = vmatpush2.msra.mxu0 %v1504_v18  ;;  %v1620_v32 = vld [vmem:[#allocation5 + $0x2ea0] sm:$0xff]  ;;  %v1617_v34 = vld [vmem:[#allocation5 + $0x2e88] sm:$0xff] }
 0x1d0   :  { %2778 = vmatpush2.msra.mxu1 %v1632_v20  ;;  %2708 = vmatprep.subr.mxu0 %v1501_v21  ;;  %v4058_v35 = vld [vmem:[#allocation3 + $0x28] ss:$48 sps:$4 sm:$0xff]   ;;  %v1488_v38 = vld [vmem:[#allocation5 + $0x2a80] sm:$0xff]  ;;  %v4062_v46 = vld [vmem:[#allocation3 + $0x2c] ss:$48 sps:$4 sm:$0xff]  }
 0x1d1   :  { %2779 = vmatprep.subr.mxu1 %v1629_v22  ;;  %2709 = vmatpush2.msra.mxu0 %v1500_v23  ;;  %v4060_v36 = vld [vmem:[#allocation3 + $0x88] ss:$48 sps:$4 sm:$0xff]   ;;  %v1616_v40 = vld [vmem:[#allocation5 + $0x2e80] sm:$0xff]  ;;  %v4063_v47 = vld [vmem:[#allocation3 + $0x8c] ss:$48 sps:$4 sm:$0xff]   ;;  %v1900_v52 = vrot.slane %v4058_v35, %v4273_v54  ;;  %v1907_v3 = vrot.slane %v4062_v46, %v4273_v54 }
 0x1d2   :  { %2780 = vmatpush2.msra.mxu1 %v1628_v24  ;;  %2710 = vmatprep.subr.mxu0 %v1497_v25  ;;  %v1485_v43 = vld [vmem:[#allocation5 + $0x2a68] sm:$0xff]  ;;  %v1484_v48 = vld [vmem:[#allocation5 + $0x2a60] sm:$0xff]  ;;  %v1914_v53 = vrot.slane %v4060_v36, %v4273_v54  ;;  %v1921_v4 = vrot.slane %v4063_v47, %v4273_v54  ;;  %v191_v54 = vld [vmem:[#allocation5 + $0x1f8] sm:$0xff] }
 0x1d3   :  { %2781 = vmatprep.subr.mxu1 %v1625_v26  ;;  %2711 = vmatpush2.msra.mxu0 %v1496_v27  ;;  %v1613_v45 = vld [vmem:[#allocation5 + $0x2e68] sm:$0xff]  ;;  %v1612_v49 = vld [vmem:[#allocation5 + $0x2e60] sm:$0xff]  ;;  %v319_v23 = vld [vmem:[#allocation5 + $0x5f8] sm:$0xff] }
 0x1d4   :  { %2782 = vmatpush2.msra.mxu1 %v1624_v28  ;;  %2712 = vmatprep.subr.mxu0 %v1493_v29  ;;  %v1481_v50 = vld [vmem:[#allocation5 + $0x2a48] sm:$0xff]  ;;  %v1480_v56 = vld [vmem:[#allocation5 + $0x2a40] sm:$0xff]  ;;  %v4359_v12 = vcombine.high %v1900_v52, %v1914_v53  ;;  %v4361_v18 = vcombine.low %v1900_v52, %v1914_v53  ;;  %v4363_v21 = vcombine.high %v1907_v3, %v1921_v4  ;;  %v190_v24 = vld [vmem:[#allocation5 + $0x1f0] sm:$0xff] }
 0x1d5   :  { %2783 = vmatprep.subr.mxu1 %v1621_v30  ;;  %2713 = vmatpush2.msra.mxu0 %v1492_v31  ;;  %v1609_v51 = vld [vmem:[#allocation5 + $0x2e48] sm:$0xff]  ;;  %v1608_v60 = vld [vmem:[#allocation5 + $0x2e40] sm:$0xff]  ;;  %v4365_v22 = vcombine.low %v1907_v3, %v1921_v4  ;;  %v318_v25 = vld [vmem:[#allocation5 + $0x5f0] sm:$0xff] }
 0x1d6   :  { %2784 = vmatpush2.msra.mxu1 %v1620_v32  ;;  %2714 = vmatprep.subr.mxu0 %v1489_v33  ;;  %v1477_v0 = vld [vmem:[#allocation5 + $0x2a28] sm:$0xff]  ;;  %v1476_v5 = vld [vmem:[#allocation5 + $0x2a20] sm:$0xff]  ;;  %v187_v26 = vld [vmem:[#allocation5 + $0x1d8] sm:$0xff] }
 0x1d7   :  { %2785 = vmatprep.subr.mxu1 %v1617_v34  ;;  %2715 = vmatpush2.msra.mxu0 %v1488_v38  ;;  %v1605_v2 = vld [vmem:[#allocation5 + $0x2e28] sm:$0xff]  ;;  %v1604_v6 = vld [vmem:[#allocation5 + $0x2e20] sm:$0xff]  ;;  %v315_v27 = vld [vmem:[#allocation5 + $0x5d8] sm:$0xff] }
 0x1d8   :  { %2786 = vmatpush2.msra.mxu1 %v1616_v40  ;;  %2716 = vmatprep.subr.mxu0 %v1485_v43  ;;  %v1473_v8 = vld [vmem:[#allocation5 + $0x2a08] sm:$0xff]  ;;  %v1472_v16 = vld [vmem:[#allocation5 + $0x2a00] sm:$0xff]  ;;  %v186_v28 = vld [vmem:[#allocation5 + $0x1d0] sm:$0xff] }
 0x1d9   :  { %2787 = vmatprep.subr.mxu1 %v1613_v45  ;;  %2717 = vmatpush2.msra.mxu0 %v1484_v48  ;;  %v1601_v10 = vld [vmem:[#allocation5 + $0x2e08] sm:$0xff]  ;;  %v1600_v20 = vld [vmem:[#allocation5 + $0x2e00] sm:$0xff]  ;;  %v314_v29 = vld [vmem:[#allocation5 + $0x5d0] sm:$0xff] }
 0x1da   :  { %2788 = vmatpush2.msra.mxu1 %v1612_v49  ;;  %2718 = vmatprep.subr.mxu0 %v1481_v50  ;;  %v183_v30 = vld [vmem:[#allocation5 + $0x1b8] sm:$0xff]  ;;  %v182_v32 = vld [vmem:[#allocation5 + $0x1b0] sm:$0xff] }
 0x1db   :  { %2789 = vmatprep.subr.mxu1 %v1609_v51  ;;  %2719 = vmatpush2.msra.mxu0 %v1480_v56  ;;  %v311_v31 = vld [vmem:[#allocation5 + $0x5b8] sm:$0xff]  ;;  %v310_v33 = vld [vmem:[#allocation5 + $0x5b0] sm:$0xff] }
 0x1dc   :  { %2790 = vmatpush2.msra.mxu1 %v1608_v60  ;;  %2720 = vmatprep.subr.mxu0 %v1477_v0  ;;  %v179_v34 = vld [vmem:[#allocation5 + $0x198] sm:$0xff]  ;;  %v178_v36 = vld [vmem:[#allocation5 + $0x190] sm:$0xff] }
 0x1dd   :  { %2791 = vmatprep.subr.mxu1 %v1605_v2  ;;  %2721 = vmatpush2.msra.mxu0 %v1476_v5  ;;  %v307_v35 = vld [vmem:[#allocation5 + $0x598] sm:$0xff]  ;;  %v306_v38 = vld [vmem:[#allocation5 + $0x590] sm:$0xff] }
 0x1de   :  { %2792 = vmatpush2.msra.mxu1 %v1604_v6  ;;  %2722 = vmatprep.subr.mxu0 %v1473_v8  ;;  %v175_v40 = vld [vmem:[#allocation5 + $0x178] sm:$0xff]  ;;  %v174_v45 = vld [vmem:[#allocation5 + $0x170] sm:$0xff] }
 0x1df   :  { %2793 = vmatprep.subr.mxu1 %v1601_v10  ;;  %2723 = vmatpush2.msra.mxu0 %v1472_v16  ;;  %v303_v43 = vld [vmem:[#allocation5 + $0x578] sm:$0xff]  ;;  %v302_v46 = vld [vmem:[#allocation5 + $0x570] sm:$0xff] }
 0x1e0   :  { %2724 = vmatprep.mubr.f32.mxu0 %v4359_v12  ;;  %2794 = vmatpush2.msra.mxu1 %v1600_v20  ;;  %v171_v47 = vld [vmem:[#allocation5 + $0x158] sm:$0xff]  ;;  %v170_v49 = vld [vmem:[#allocation5 + $0x150] sm:$0xff] }
 0x1e1   :  { %2725 = vmatmul.mubr.f32.vlgmr.msra.gmra.mxu0 %v4361_v18  ;;  %2795 = vmatprep.mubr.f32.mxu1 %v4363_v21  ;;  %v299_v48 = vld [vmem:[#allocation5 + $0x558] sm:$0xff]  ;;  %v298_v50 = vld [vmem:[#allocation5 + $0x550] sm:$0xff] }
 0x1e2   :  { %2802 = vmatprep.subr.mxu0 %v191_v54  ;;  %2873 = vmatprep.subr.mxu1 %v319_v23  ;;  %v167_v51 = vld [vmem:[#allocation5 + $0x138] sm:$0xff]  ;;  %v166_v53 = vld [vmem:[#allocation5 + $0x130] sm:$0xff] }
 0x1e3   :  { %2796 = vmatmul.mubr.f32.vlgmr.msra.gmra.mxu1 %v4365_v22  ;;  %2803 = vmatpush1.msra.mxu0 %v190_v24  ;;  %v295_v52 = vld [vmem:[#allocation5 + $0x538] sm:$0xff]  ;;  %v294_v56 = vld [vmem:[#allocation5 + $0x530] sm:$0xff] }
 0x1e4   :  { %2874 = vmatpush1.msra.mxu1 %v318_v25  ;;  %2804 = vmatprep.subr.mxu0 %v187_v26  ;;  %v163_v60 = vld [vmem:[#allocation5 + $0x118] sm:$0xff]  ;;  %v162_v2 = vld [vmem:[#allocation5 + $0x110] sm:$0xff] }
 0x1e5   :  { %2875 = vmatprep.subr.mxu1 %v315_v27  ;;  %2805 = vmatpush1.msra.mxu0 %v186_v28  ;;  %v291_v0 = vld [vmem:[#allocation5 + $0x518] sm:$0xff]  ;;  %v290_v3 = vld [vmem:[#allocation5 + $0x510] sm:$0xff] }
 0x1e6   :  { %2876 = vmatpush1.msra.mxu1 %v314_v29  ;;  %2806 = vmatprep.subr.mxu0 %v183_v30  ;;  %v159_v4 = vld [vmem:[#allocation5 + $0xf8] sm:$0xff]  ;;  %v158_v6 = vld [vmem:[#allocation5 + $0xf0] sm:$0xff] }
 0x1e7   :  { %2877 = vmatprep.subr.mxu1 %v311_v31  ;;  %2807 = vmatpush1.msra.mxu0 %v182_v32  ;;  %v287_v5 = vld [vmem:[#allocation5 + $0x4f8] sm:$0xff]  ;;  %v286_v8 = vld [vmem:[#allocation5 + $0x4f0] sm:$0xff] }
 0x1e8   :  { %2878 = vmatpush1.msra.mxu1 %v310_v33  ;;  %2808 = vmatprep.subr.mxu0 %v179_v34  ;;  %v155_v10 = vld [vmem:[#allocation5 + $0xd8] sm:$0xff]  ;;  %v154_v20 = vld [vmem:[#allocation5 + $0xd0] sm:$0xff] }
 0x1e9   :  { %2879 = vmatprep.subr.mxu1 %v307_v35  ;;  %2809 = vmatpush1.msra.mxu0 %v178_v36  ;;  %v283_v16 = vld [vmem:[#allocation5 + $0x4d8] sm:$0xff]  ;;  %v282_v54 = vld [vmem:[#allocation5 + $0x4d0] sm:$0xff] }
 0x1ea   :  { %2880 = vmatpush1.msra.mxu1 %v306_v38  ;;  %2810 = vmatprep.subr.mxu0 %v175_v40  ;;  %v151_v23 = vld [vmem:[#allocation5 + $0xb8] sm:$0xff]  ;;  %v150_v25 = vld [vmem:[#allocation5 + $0xb0] sm:$0xff] }
 0x1eb   :  { %2881 = vmatprep.subr.mxu1 %v303_v43  ;;  %2811 = vmatpush1.msra.mxu0 %v174_v45  ;;  %v279_v24 = vld [vmem:[#allocation5 + $0x4b8] sm:$0xff]  ;;  %v278_v26 = vld [vmem:[#allocation5 + $0x4b0] sm:$0xff] }
 0x1ec   :  { %2882 = vmatpush1.msra.mxu1 %v302_v46  ;;  %2812 = vmatprep.subr.mxu0 %v171_v47  ;;  %v147_v27 = vld [vmem:[#allocation5 + $0x98] sm:$0xff]  ;;  %v146_v29 = vld [vmem:[#allocation5 + $0x90] sm:$0xff] }
 0x1ed   :  { %2883 = vmatprep.subr.mxu1 %v299_v48  ;;  %2813 = vmatpush1.msra.mxu0 %v170_v49  ;;  %v275_v28 = vld [vmem:[#allocation5 + $0x498] sm:$0xff]  ;;  %v274_v30 = vld [vmem:[#allocation5 + $0x490] sm:$0xff] }
 0x1ee   :  { %2884 = vmatpush1.msra.mxu1 %v298_v50  ;;  %2814 = vmatprep.subr.mxu0 %v167_v51  ;;  %v143_v31 = vld [vmem:[#allocation5 + $0x78] sm:$0xff]  ;;  %v142_v33 = vld [vmem:[#allocation5 + $0x70] sm:$0xff] }
 0x1ef   :  { %2885 = vmatprep.subr.mxu1 %v295_v52  ;;  %2815 = vmatpush1.msra.mxu0 %v166_v53  ;;  %v271_v32 = vld [vmem:[#allocation5 + $0x478] sm:$0xff]  ;;  %v270_v34 = vld [vmem:[#allocation5 + $0x470] sm:$0xff] }
 0x1f0   :  { %2886 = vmatpush1.msra.mxu1 %v294_v56  ;;  %2816 = vmatprep.subr.mxu0 %v163_v60  ;;  %v139_v35 = vld [vmem:[#allocation5 + $0x58] sm:$0xff]  ;;  %v138_v38 = vld [vmem:[#allocation5 + $0x50] sm:$0xff] }
 0x1f1   :  { %2887 = vmatprep.subr.mxu1 %v291_v0  ;;  %2817 = vmatpush1.msra.mxu0 %v162_v2  ;;  %v267_v36 = vld [vmem:[#allocation5 + $0x458] sm:$0xff]  ;;  %v266_v40 = vld [vmem:[#allocation5 + $0x450] sm:$0xff] }
 0x1f2   :  { %2888 = vmatpush1.msra.mxu1 %v290_v3  ;;  %2818 = vmatprep.subr.mxu0 %v159_v4  ;;  %v135_v43 = vld [vmem:[#allocation5 + $0x38] sm:$0xff]  ;;  %v134_v46 = vld [vmem:[#allocation5 + $0x30] sm:$0xff] }
 0x1f3   :  { %2889 = vmatprep.subr.mxu1 %v287_v5  ;;  %2819 = vmatpush1.msra.mxu0 %v158_v6  ;;  %v263_v45 = vld [vmem:[#allocation5 + $0x438] sm:$0xff]  ;;  %v262_v47 = vld [vmem:[#allocation5 + $0x430] sm:$0xff] }
 0x1f4   :  { %2890 = vmatpush1.msra.mxu1 %v286_v8  ;;  %2820 = vmatprep.subr.mxu0 %v155_v10  ;;  %v131_v48 = vld [vmem:[#allocation5 + $0x18] sm:$0xff]  ;;  %v130_v50 = vld [vmem:[#allocation5 + $0x10] sm:$0xff] }
 0x1f5   :  { %2891 = vmatprep.subr.mxu1 %v283_v16  ;;  %2821 = vmatpush1.msra.mxu0 %v154_v20  ;;  %v259_v49 = vld [vmem:[#allocation5 + $0x418] sm:$0xff]  ;;  %v258_v51 = vld [vmem:[#allocation5 + $0x410] sm:$0xff] }
 0x1f6   :  { %2892 = vmatpush1.msra.mxu1 %v282_v54  ;;  %2822 = vmatprep.subr.mxu0 %v151_v23  ;;  %v255_v52 = vld [vmem:[#allocation5 + $0x3f8] sm:$0xff]  ;;  %v254_v56 = vld [vmem:[#allocation5 + $0x3f0] sm:$0xff] }
 0x1f7   :  { %2893 = vmatprep.subr.mxu1 %v279_v24  ;;  %2823 = vmatpush1.msra.mxu0 %v150_v25  ;;  %v383_v53 = vld [vmem:[#allocation5 + $0x7f8] sm:$0xff]  ;;  %v382_v60 = vld [vmem:[#allocation5 + $0x7f0] sm:$0xff] }
 0x1f8   :  { %2894 = vmatpush1.msra.mxu1 %v278_v26  ;;  %2824 = vmatprep.subr.mxu0 %v147_v27  ;;  %v251_v0 = vld [vmem:[#allocation5 + $0x3d8] sm:$0xff]  ;;  %v250_v3 = vld [vmem:[#allocation5 + $0x3d0] sm:$0xff] }
 0x1f9   :  { %2895 = vmatprep.subr.mxu1 %v275_v28  ;;  %2825 = vmatpush1.msra.mxu0 %v146_v29  ;;  %v379_v2 = vld [vmem:[#allocation5 + $0x7d8] sm:$0xff]  ;;  %v378_v4 = vld [vmem:[#allocation5 + $0x7d0] sm:$0xff] }
 0x1fa   :  { %2896 = vmatpush1.msra.mxu1 %v274_v30  ;;  %2826 = vmatprep.subr.mxu0 %v143_v31  ;;  %v247_v5 = vld [vmem:[#allocation5 + $0x3b8] sm:$0xff]  ;;  %v246_v8 = vld [vmem:[#allocation5 + $0x3b0] sm:$0xff] }
 0x1fb   :  { %2897 = vmatprep.subr.mxu1 %v271_v32  ;;  %2827 = vmatpush1.msra.mxu0 %v142_v33  ;;  %v375_v6 = vld [vmem:[#allocation5 + $0x7b8] sm:$0xff]  ;;  %v374_v10 = vld [vmem:[#allocation5 + $0x7b0] sm:$0xff] }
 0x1fc   :  { %2898 = vmatpush1.msra.mxu1 %v270_v34  ;;  %2828 = vmatprep.subr.mxu0 %v139_v35  ;;  %v243_v16 = vld [vmem:[#allocation5 + $0x398] sm:$0xff]  ;;  %v242_v54 = vld [vmem:[#allocation5 + $0x390] sm:$0xff] }
 0x1fd   :  { %2899 = vmatprep.subr.mxu1 %v267_v36  ;;  %2829 = vmatpush1.msra.mxu0 %v138_v38  ;;  %v371_v20 = vld [vmem:[#allocation5 + $0x798] sm:$0xff]  ;;  %v370_v23 = vld [vmem:[#allocation5 + $0x790] sm:$0xff] }
 0x1fe   :  { %2900 = vmatpush1.msra.mxu1 %v266_v40  ;;  %2830 = vmatprep.subr.mxu0 %v135_v43  ;;  %v239_v24 = vld [vmem:[#allocation5 + $0x378] sm:$0xff]  ;;  %v238_v26 = vld [vmem:[#allocation5 + $0x370] sm:$0xff] }
 0x1ff   :  { %2901 = vmatprep.subr.mxu1 %v263_v45  ;;  %2831 = vmatpush1.msra.mxu0 %v134_v46  ;;  %v367_v25 = vld [vmem:[#allocation5 + $0x778] sm:$0xff]  ;;  %v366_v27 = vld [vmem:[#allocation5 + $0x770] sm:$0xff] }
 0x200   :  { %2902 = vmatpush1.msra.mxu1 %v262_v47  ;;  %2832 = vmatprep.subr.mxu0 %v131_v48  ;;  %v235_v28 = vld [vmem:[#allocation5 + $0x358] sm:$0xff]  ;;  %v234_v30 = vld [vmem:[#allocation5 + $0x350] sm:$0xff] }
 0x201   :  { %2903 = vmatprep.subr.mxu1 %v259_v49  ;;  %2833 = vmatpush1.msra.mxu0 %v130_v50  ;;  %v363_v29 = vld [vmem:[#allocation5 + $0x758] sm:$0xff]  ;;  %v362_v31 = vld [vmem:[#allocation5 + $0x750] sm:$0xff] }
 0x202   :  { %2904 = vmatpush1.msra.mxu1 %v258_v51  ;;  %2834 = vmatprep.subr.mxu0 %v255_v52  ;;  %v231_v32 = vld [vmem:[#allocation5 + $0x338] sm:$0xff]  ;;  %v230_v34 = vld [vmem:[#allocation5 + $0x330] sm:$0xff] }
 0x203   :  { %2905 = vmatprep.subr.mxu1 %v383_v53  ;;  %2835 = vmatpush2.msra.mxu0 %v254_v56  ;;  %v359_v33 = vld [vmem:[#allocation5 + $0x738] sm:$0xff]  ;;  %v358_v35 = vld [vmem:[#allocation5 + $0x730] sm:$0xff] }
 0x204   :  { %2906 = vmatpush2.msra.mxu1 %v382_v60  ;;  %2836 = vmatprep.subr.mxu0 %v251_v0  ;;  %v227_v36 = vld [vmem:[#allocation5 + $0x318] sm:$0xff]  ;;  %v226_v40 = vld [vmem:[#allocation5 + $0x310] sm:$0xff] }
 0x205   :  { %2907 = vmatprep.subr.mxu1 %v379_v2  ;;  %2837 = vmatpush2.msra.mxu0 %v250_v3  ;;  %v355_v38 = vld [vmem:[#allocation5 + $0x718] sm:$0xff]  ;;  %v354_v43 = vld [vmem:[#allocation5 + $0x710] sm:$0xff] }
 0x206   :  { %2908 = vmatpush2.msra.mxu1 %v378_v4  ;;  %2838 = vmatprep.subr.mxu0 %v247_v5  ;;  %v223_v45 = vld [vmem:[#allocation5 + $0x2f8] sm:$0xff]  ;;  %v222_v47 = vld [vmem:[#allocation5 + $0x2f0] sm:$0xff] }
 0x207   :  { %2909 = vmatprep.subr.mxu1 %v375_v6  ;;  %2839 = vmatpush2.msra.mxu0 %v246_v8  ;;  %v351_v46 = vld [vmem:[#allocation5 + $0x6f8] sm:$0xff]  ;;  %v350_v48 = vld [vmem:[#allocation5 + $0x6f0] sm:$0xff] }
 0x208   :  { %2910 = vmatpush2.msra.mxu1 %v374_v10  ;;  %2840 = vmatprep.subr.mxu0 %v243_v16  ;;  %v219_v49 = vld [vmem:[#allocation5 + $0x2d8] sm:$0xff]  ;;  %v218_v51 = vld [vmem:[#allocation5 + $0x2d0] sm:$0xff] }
 0x209   :  { %2911 = vmatprep.subr.mxu1 %v371_v20  ;;  %2841 = vmatpush2.msra.mxu0 %v242_v54  ;;  %v347_v50 = vld [vmem:[#allocation5 + $0x6d8] sm:$0xff]  ;;  %v346_v52 = vld [vmem:[#allocation5 + $0x6d0] sm:$0xff] }
 0x20a   :  { %2912 = vmatpush2.msra.mxu1 %v370_v23  ;;  %2842 = vmatprep.subr.mxu0 %v239_v24  ;;  %v215_v53 = vld [vmem:[#allocation5 + $0x2b8] sm:$0xff]  ;;  %v214_v60 = vld [vmem:[#allocation5 + $0x2b0] sm:$0xff] }
 0x20b   :  { %2913 = vmatprep.subr.mxu1 %v367_v25  ;;  %2843 = vmatpush2.msra.mxu0 %v238_v26  ;;  %v343_v56 = vld [vmem:[#allocation5 + $0x6b8] sm:$0xff]  ;;  %v342_v0 = vld [vmem:[#allocation5 + $0x6b0] sm:$0xff] }
 0x20c   :  { %2914 = vmatpush2.msra.mxu1 %v366_v27  ;;  %2844 = vmatprep.subr.mxu0 %v235_v28  ;;  %v211_v2 = vld [vmem:[#allocation5 + $0x298] sm:$0xff]  ;;  %v210_v4 = vld [vmem:[#allocation5 + $0x290] sm:$0xff] }
 0x20d   :  { %2915 = vmatprep.subr.mxu1 %v363_v29  ;;  %2845 = vmatpush2.msra.mxu0 %v234_v30  ;;  %v339_v3 = vld [vmem:[#allocation5 + $0x698] sm:$0xff]  ;;  %v338_v5 = vld [vmem:[#allocation5 + $0x690] sm:$0xff] }
 0x20e   :  { %2916 = vmatpush2.msra.mxu1 %v362_v31  ;;  %2846 = vmatprep.subr.mxu0 %v231_v32  ;;  %v207_v6 = vld [vmem:[#allocation5 + $0x278] sm:$0xff]  ;;  %v206_v10 = vld [vmem:[#allocation5 + $0x270] sm:$0xff] }
 0x20f   :  { %2917 = vmatprep.subr.mxu1 %v359_v33  ;;  %2847 = vmatpush2.msra.mxu0 %v230_v34  ;;  %v335_v8 = vld [vmem:[#allocation5 + $0x678] sm:$0xff]  ;;  %v334_v16 = vld [vmem:[#allocation5 + $0x670] sm:$0xff] }
 0x210   :  { %2918 = vmatpush2.msra.mxu1 %v358_v35  ;;  %2848 = vmatprep.subr.mxu0 %v227_v36  ;;  %v203_v20 = vld [vmem:[#allocation5 + $0x258] sm:$0xff]  ;;  %v202_v23 = vld [vmem:[#allocation5 + $0x250] sm:$0xff] }
 0x211   :  { %2919 = vmatprep.subr.mxu1 %v355_v38  ;;  %2849 = vmatpush2.msra.mxu0 %v226_v40  ;;  %v331_v54 = vld [vmem:[#allocation5 + $0x658] sm:$0xff]  ;;  %v330_v24 = vld [vmem:[#allocation5 + $0x650] sm:$0xff] }
 0x212   :  { %2920 = vmatpush2.msra.mxu1 %v354_v43  ;;  %2850 = vmatprep.subr.mxu0 %v223_v45  ;;  %v199_v25 = vld [vmem:[#allocation5 + $0x238] sm:$0xff]  ;;  %v198_v27 = vld [vmem:[#allocation5 + $0x230] sm:$0xff] }
 0x213   :  { %2921 = vmatprep.subr.mxu1 %v351_v46  ;;  %2851 = vmatpush2.msra.mxu0 %v222_v47  ;;  %v327_v26 = vld [vmem:[#allocation5 + $0x638] sm:$0xff]  ;;  %v326_v28 = vld [vmem:[#allocation5 + $0x630] sm:$0xff] }
 0x214   :  { %2922 = vmatpush2.msra.mxu1 %v350_v48  ;;  %2852 = vmatprep.subr.mxu0 %v219_v49  ;;  %v195_v29 = vld [vmem:[#allocation5 + $0x218] sm:$0xff]  ;;  %v194_v31 = vld [vmem:[#allocation5 + $0x210] sm:$0xff] }
 0x215   :  { %2923 = vmatprep.subr.mxu1 %v347_v50  ;;  %2853 = vmatpush2.msra.mxu0 %v218_v51  ;;  %v323_v30 = vld [vmem:[#allocation5 + $0x618] sm:$0xff]  ;;  %v322_v32 = vld [vmem:[#allocation5 + $0x610] sm:$0xff] }
 0x216   :  { %2924 = vmatpush2.msra.mxu1 %v346_v52  ;;  %2854 = vmatprep.subr.mxu0 %v215_v53  ;;  %v447_v33 = vld [vmem:[#allocation5 + $0x9f8] sm:$0xff]  ;;  %v446_v35 = vld [vmem:[#allocation5 + $0x9f0] sm:$0xff] }
 0x217   :  { %2925 = vmatprep.subr.mxu1 %v343_v56  ;;  %2855 = vmatpush2.msra.mxu0 %v214_v60  ;;  %v575_v34 = vld [vmem:[#allocation5 + $0xdf8] sm:$0xff]  ;;  %v574_v36 = vld [vmem:[#allocation5 + $0xdf0] sm:$0xff] }
 0x218   :  { %2926 = vmatpush2.msra.mxu1 %v342_v0  ;;  %2856 = vmatprep.subr.mxu0 %v211_v2  ;;  %v443_v38 = vld [vmem:[#allocation5 + $0x9d8] sm:$0xff]  ;;  %v442_v43 = vld [vmem:[#allocation5 + $0x9d0] sm:$0xff] }
 0x219   :  { %2927 = vmatprep.subr.mxu1 %v339_v3  ;;  %2857 = vmatpush2.msra.mxu0 %v210_v4  ;;  %v571_v40 = vld [vmem:[#allocation5 + $0xdd8] sm:$0xff]  ;;  %v570_v45 = vld [vmem:[#allocation5 + $0xdd0] sm:$0xff] }
 0x21a   :  { %2928 = vmatpush2.msra.mxu1 %v338_v5  ;;  %2858 = vmatprep.subr.mxu0 %v207_v6  ;;  %v439_v46 = vld [vmem:[#allocation5 + $0x9b8] sm:$0xff]  ;;  %v438_v47 = vld [vmem:[#allocation5 + $0x9b0] sm:$0xff] }
 0x21b   :  { %2929 = vmatprep.subr.mxu1 %v335_v8  ;;  %2859 = vmatpush2.msra.mxu0 %v206_v10  ;;  %v435_v48 = vld [vmem:[#allocation5 + $0x998] sm:$0xff]  ;;  %v434_v49 = vld [vmem:[#allocation5 + $0x990] sm:$0xff] }
 0x21c   :  { %2930 = vmatpush2.msra.mxu1 %v334_v16  ;;  %2860 = vmatprep.subr.mxu0 %v203_v20  ;;  %v562_v50 = vld [vmem:[#allocation5 + $0xd90] sm:$0xff]  ;;  %v559_v51 = vld [vmem:[#allocation5 + $0xd78] sm:$0xff] }
 0x21d   :  { %2931 = vmatprep.subr.mxu1 %v331_v54  ;;  %2861 = vmatpush2.msra.mxu0 %v202_v23  ;;  %v430_v52 = vld [vmem:[#allocation5 + $0x970] sm:$0xff]  ;;  %v427_v56 = vld [vmem:[#allocation5 + $0x958] sm:$0xff] }
 0x21e   :  { %2932 = vmatpush2.msra.mxu1 %v330_v24  ;;  %2862 = vmatprep.subr.mxu0 %v199_v25  ;;  %v558_v53 = vld [vmem:[#allocation5 + $0xd70] sm:$0xff]  ;;  %v555_v60 = vld [vmem:[#allocation5 + $0xd58] sm:$0xff] }
 0x21f   :  { %2933 = vmatprep.subr.mxu1 %v327_v26  ;;  %2863 = vmatpush2.msra.mxu0 %v198_v27  ;;  %v426_v0 = vld [vmem:[#allocation5 + $0x950] sm:$0xff]  ;;  %v423_v3 = vld [vmem:[#allocation5 + $0x938] sm:$0xff] }
 0x220   :  { %2934 = vmatpush2.msra.mxu1 %v326_v28  ;;  %2864 = vmatprep.subr.mxu0 %v195_v29  ;;  %v554_v2 = vld [vmem:[#allocation5 + $0xd50] sm:$0xff]  ;;  %v551_v4 = vld [vmem:[#allocation5 + $0xd38] sm:$0xff] }
 0x221   :  { %2935 = vmatprep.subr.mxu1 %v323_v30  ;;  %2865 = vmatpush2.msra.mxu0 %v194_v31  ;;  %v422_v5 = vld [vmem:[#allocation5 + $0x930] sm:$0xff]  ;;  %v419_v8 = vld [vmem:[#allocation5 + $0x918] sm:$0xff] }
 0x222   :  { %2866 = vmatprep.mubr.f32.mxu0 %v4279_v13  ;;  %2936 = vmatpush2.msra.mxu1 %v322_v32  ;;  %v567_v13 = vld [vmem:[#allocation5 + $0xdb8] sm:$0xff]  ;;  %v550_v6 = vld [vmem:[#allocation5 + $0xd30] sm:$0xff] }
 0x223   :  { %2867 = vmatmul.mubr.f32.vlgmr.msra.gmra.mxu0 %v4281_v15  ;;  %2937 = vmatprep.mubr.f32.mxu1 %v4283_v17  ;;  %v566_v15 = vld [vmem:[#allocation5 + $0xdb0] sm:$0xff]  ;;  %v563_v17 = vld [vmem:[#allocation5 + $0xd98] sm:$0xff] }
 0x224   :  { %2944 = vmatprep.subr.mxu0 %v447_v33  ;;  %3015 = vmatprep.subr.mxu1 %v575_v34  ;;  %v547_v10 = vld [vmem:[#allocation5 + $0xd18] sm:$0xff]  ;;  %v418_v16 = vld [vmem:[#allocation5 + $0x910] sm:$0xff] }
 0x225   :  { %2938 = vmatmul.mubr.f32.vlgmr.msra.gmra.mxu1 %v4285_v19  ;;  %2945 = vmatpush1.msra.mxu0 %v446_v35  ;;  %v431_v19 = vld [vmem:[#allocation5 + $0x978] sm:$0xff]  ;;  %v546_v20 = vld [vmem:[#allocation5 + $0xd10] sm:$0xff] }
 0x226   :  { %3016 = vmatpush1.msra.mxu1 %v574_v36  ;;  %2946 = vmatprep.subr.mxu0 %v443_v38  ;;  %v415_v54 = vld [vmem:[#allocation5 + $0x8f8] sm:$0xff]  ;;  %v414_v24 = vld [vmem:[#allocation5 + $0x8f0] sm:$0xff] }
 0x227   :  { %3017 = vmatprep.subr.mxu1 %v571_v40  ;;  %2947 = vmatpush1.msra.mxu0 %v442_v43  ;;  %v543_v23 = vld [vmem:[#allocation5 + $0xcf8] sm:$0xff]  ;;  %v542_v25 = vld [vmem:[#allocation5 + $0xcf0] sm:$0xff] }
 0x228   :  { %3018 = vmatpush1.msra.mxu1 %v570_v45  ;;  %2948 = vmatprep.subr.mxu0 %v439_v46  ;;  %v411_v26 = vld [vmem:[#allocation5 + $0x8d8] sm:$0xff]  ;;  %v410_v28 = vld [vmem:[#allocation5 + $0x8d0] sm:$0xff] }
 0x229   :  { %3019 = vmatprep.subr.mxu1 %v567_v13  ;;  %2949 = vmatpush1.msra.mxu0 %v438_v47  ;;  %v539_v27 = vld [vmem:[#allocation5 + $0xcd8] sm:$0xff]  ;;  %v538_v29 = vld [vmem:[#allocation5 + $0xcd0] sm:$0xff] }
 0x22a   :  { %3020 = vmatpush1.msra.mxu1 %v566_v15  ;;  %2950 = vmatprep.subr.mxu0 %v435_v48  ;;  %v407_v30 = vld [vmem:[#allocation5 + $0x8b8] sm:$0xff]  ;;  %v406_v32 = vld [vmem:[#allocation5 + $0x8b0] sm:$0xff] }
 0x22b   :  { %3021 = vmatprep.subr.mxu1 %v563_v17  ;;  %2951 = vmatpush1.msra.mxu0 %v434_v49  ;;  %v535_v31 = vld [vmem:[#allocation5 + $0xcb8] sm:$0xff]  ;;  %v534_v33 = vld [vmem:[#allocation5 + $0xcb0] sm:$0xff] }
 0x22c   :  { %3022 = vmatpush1.msra.mxu1 %v562_v50  ;;  %2952 = vmatprep.subr.mxu0 %v431_v19  ;;  %v403_v34 = vld [vmem:[#allocation5 + $0x898] sm:$0xff]  ;;  %v402_v36 = vld [vmem:[#allocation5 + $0x890] sm:$0xff] }
 0x22d   :  { %3023 = vmatprep.subr.mxu1 %v559_v51  ;;  %2953 = vmatpush1.msra.mxu0 %v430_v52  ;;  %v531_v35 = vld [vmem:[#allocation5 + $0xc98] sm:$0xff]  ;;  %v530_v38 = vld [vmem:[#allocation5 + $0xc90] sm:$0xff] }
 0x22e   :  { %3024 = vmatpush1.msra.mxu1 %v558_v53  ;;  %2954 = vmatprep.subr.mxu0 %v427_v56  ;;  %v399_v40 = vld [vmem:[#allocation5 + $0x878] sm:$0xff]  ;;  %v398_v45 = vld [vmem:[#allocation5 + $0x870] sm:$0xff] }
 0x22f   :  { %3025 = vmatprep.subr.mxu1 %v555_v60  ;;  %2955 = vmatpush1.msra.mxu0 %v426_v0  ;;  %v527_v43 = vld [vmem:[#allocation5 + $0xc78] sm:$0xff]  ;;  %v526_v46 = vld [vmem:[#allocation5 + $0xc70] sm:$0xff] }
 0x230   :  { %3026 = vmatpush1.msra.mxu1 %v554_v2  ;;  %2956 = vmatprep.subr.mxu0 %v423_v3  ;;  %v395_v13 = vld [vmem:[#allocation5 + $0x858] sm:$0xff]  ;;  %v394_v15 = vld [vmem:[#allocation5 + $0x850] sm:$0xff] }
 0x231   :  { %3027 = vmatprep.subr.mxu1 %v551_v4  ;;  %2957 = vmatpush1.msra.mxu0 %v422_v5  ;;  %v523_v47 = vld [vmem:[#allocation5 + $0xc58] sm:$0xff]  ;;  %v522_v48 = vld [vmem:[#allocation5 + $0xc50] sm:$0xff] }
 0x232   :  { %3028 = vmatpush1.msra.mxu1 %v550_v6  ;;  %2958 = vmatprep.subr.mxu0 %v419_v8  ;;  %v391_v17 = vld [vmem:[#allocation5 + $0x838] sm:$0xff]  ;;  %v390_v50 = vld [vmem:[#allocation5 + $0x830] sm:$0xff] }
 0x233   :  { %3029 = vmatprep.subr.mxu1 %v547_v10  ;;  %2959 = vmatpush1.msra.mxu0 %v418_v16  ;;  %v519_v49 = vld [vmem:[#allocation5 + $0xc38] sm:$0xff]  ;;  %v518_v19 = vld [vmem:[#allocation5 + $0xc30] sm:$0xff] }
 0x234   :  { %3030 = vmatpush1.msra.mxu1 %v546_v20  ;;  %2960 = vmatprep.subr.mxu0 %v415_v54  ;;  %v387_v51 = vld [vmem:[#allocation5 + $0x818] sm:$0xff]  ;;  %v386_v53 = vld [vmem:[#allocation5 + $0x810] sm:$0xff] }
 0x235   :  { %3031 = vmatprep.subr.mxu1 %v543_v23  ;;  %2961 = vmatpush1.msra.mxu0 %v414_v24  ;;  %v515_v52 = vld [vmem:[#allocation5 + $0xc18] sm:$0xff]  ;;  %v514_v56 = vld [vmem:[#allocation5 + $0xc10] sm:$0xff] }
 0x236   :  { %3032 = vmatpush1.msra.mxu1 %v542_v25  ;;  %2962 = vmatprep.subr.mxu0 %v411_v26  ;;  %v511_v60 = vld [vmem:[#allocation5 + $0xbf8] sm:$0xff]  ;;  %v510_v2 = vld [vmem:[#allocation5 + $0xbf0] sm:$0xff] }
 0x237   :  { %3033 = vmatprep.subr.mxu1 %v539_v27  ;;  %2963 = vmatpush1.msra.mxu0 %v410_v28  ;;  %v639_v0 = vld [vmem:[#allocation5 + $0xff8] sm:$0xff]  ;;  %v638_v3 = vld [vmem:[#allocation5 + $0xff0] sm:$0xff] }
 0x238   :  { %3034 = vmatpush1.msra.mxu1 %v538_v29  ;;  %2964 = vmatprep.subr.mxu0 %v407_v30  ;;  %v507_v4 = vld [vmem:[#allocation5 + $0xbd8] sm:$0xff]  ;;  %v506_v6 = vld [vmem:[#allocation5 + $0xbd0] sm:$0xff] }
 0x239   :  { %3035 = vmatprep.subr.mxu1 %v535_v31  ;;  %2965 = vmatpush1.msra.mxu0 %v406_v32  ;;  %v635_v5 = vld [vmem:[#allocation5 + $0xfd8] sm:$0xff]  ;;  %v634_v8 = vld [vmem:[#allocation5 + $0xfd0] sm:$0xff] }
 0x23a   :  { %3036 = vmatpush1.msra.mxu1 %v534_v33  ;;  %2966 = vmatprep.subr.mxu0 %v403_v34  ;;  %v503_v10 = vld [vmem:[#allocation5 + $0xbb8] sm:$0xff]  ;;  %v502_v20 = vld [vmem:[#allocation5 + $0xbb0] sm:$0xff] }
 0x23b   :  { %3037 = vmatprep.subr.mxu1 %v531_v35  ;;  %2967 = vmatpush1.msra.mxu0 %v402_v36  ;;  %v631_v16 = vld [vmem:[#allocation5 + $0xfb8] sm:$0xff]  ;;  %v630_v54 = vld [vmem:[#allocation5 + $0xfb0] sm:$0xff] }
 0x23c   :  { %3038 = vmatpush1.msra.mxu1 %v530_v38  ;;  %2968 = vmatprep.subr.mxu0 %v399_v40  ;;  %v499_v23 = vld [vmem:[#allocation5 + $0xb98] sm:$0xff]  ;;  %v498_v25 = vld [vmem:[#allocation5 + $0xb90] sm:$0xff] }
 0x23d   :  { %3039 = vmatprep.subr.mxu1 %v527_v43  ;;  %2969 = vmatpush1.msra.mxu0 %v398_v45  ;;  %v627_v24 = vld [vmem:[#allocation5 + $0xf98] sm:$0xff]  ;;  %v626_v26 = vld [vmem:[#allocation5 + $0xf90] sm:$0xff] }
 0x23e   :  { %3040 = vmatpush1.msra.mxu1 %v526_v46  ;;  %2970 = vmatprep.subr.mxu0 %v395_v13  ;;  %v495_v27 = vld [vmem:[#allocation5 + $0xb78] sm:$0xff]  ;;  %v494_v29 = vld [vmem:[#allocation5 + $0xb70] sm:$0xff] }
 0x23f   :  { %3041 = vmatprep.subr.mxu1 %v523_v47  ;;  %2971 = vmatpush1.msra.mxu0 %v394_v15  ;;  %v623_v28 = vld [vmem:[#allocation5 + $0xf78] sm:$0xff]  ;;  %v622_v30 = vld [vmem:[#allocation5 + $0xf70] sm:$0xff] }
 0x240   :  { %3042 = vmatpush1.msra.mxu1 %v522_v48  ;;  %2972 = vmatprep.subr.mxu0 %v391_v17  ;;  %v491_v31 = vld [vmem:[#allocation5 + $0xb58] sm:$0xff]  ;;  %v490_v33 = vld [vmem:[#allocation5 + $0xb50] sm:$0xff] }
 0x241   :  { %3043 = vmatprep.subr.mxu1 %v519_v49  ;;  %2973 = vmatpush1.msra.mxu0 %v390_v50  ;;  %v619_v32 = vld [vmem:[#allocation5 + $0xf58] sm:$0xff]  ;;  %v618_v34 = vld [vmem:[#allocation5 + $0xf50] sm:$0xff] }
 0x242   :  { %3044 = vmatpush1.msra.mxu1 %v518_v19  ;;  %2974 = vmatprep.subr.mxu0 %v387_v51  ;;  %v487_v35 = vld [vmem:[#allocation5 + $0xb38] sm:$0xff]  ;;  %v486_v38 = vld [vmem:[#allocation5 + $0xb30] sm:$0xff] }
 0x243   :  { %3045 = vmatprep.subr.mxu1 %v515_v52  ;;  %2975 = vmatpush1.msra.mxu0 %v386_v53  ;;  %v615_v36 = vld [vmem:[#allocation5 + $0xf38] sm:$0xff]  ;;  %v614_v40 = vld [vmem:[#allocation5 + $0xf30] sm:$0xff] }
 0x244   :  { %3046 = vmatpush1.msra.mxu1 %v514_v56  ;;  %2976 = vmatprep.subr.mxu0 %v511_v60  ;;  %v483_v43 = vld [vmem:[#allocation5 + $0xb18] sm:$0xff]  ;;  %v482_v46 = vld [vmem:[#allocation5 + $0xb10] sm:$0xff] }
 0x245   :  { %3047 = vmatprep.subr.mxu1 %v639_v0  ;;  %2977 = vmatpush2.msra.mxu0 %v510_v2  ;;  %v611_v45 = vld [vmem:[#allocation5 + $0xf18] sm:$0xff]  ;;  %v610_v13 = vld [vmem:[#allocation5 + $0xf10] sm:$0xff] }
 0x246   :  { %3048 = vmatpush2.msra.mxu1 %v638_v3  ;;  %2978 = vmatprep.subr.mxu0 %v507_v4  ;;  %v479_v47 = vld [vmem:[#allocation5 + $0xaf8] sm:$0xff]  ;;  %v478_v48 = vld [vmem:[#allocation5 + $0xaf0] sm:$0xff] }
 0x247   :  { %3049 = vmatprep.subr.mxu1 %v635_v5  ;;  %2979 = vmatpush2.msra.mxu0 %v506_v6  ;;  %v607_v15 = vld [vmem:[#allocation5 + $0xef8] sm:$0xff]  ;;  %v606_v17 = vld [vmem:[#allocation5 + $0xef0] sm:$0xff] }
 0x248   :  { %3050 = vmatpush2.msra.mxu1 %v634_v8  ;;  %2980 = vmatprep.subr.mxu0 %v503_v10  ;;  %v475_v49 = vld [vmem:[#allocation5 + $0xad8] sm:$0xff]  ;;  %v474_v19 = vld [vmem:[#allocation5 + $0xad0] sm:$0xff] }
 0x249   :  { %3051 = vmatprep.subr.mxu1 %v631_v16  ;;  %2981 = vmatpush2.msra.mxu0 %v502_v20  ;;  %v603_v50 = vld [vmem:[#allocation5 + $0xed8] sm:$0xff]  ;;  %v602_v51 = vld [vmem:[#allocation5 + $0xed0] sm:$0xff] }
 0x24a   :  { %3052 = vmatpush2.msra.mxu1 %v630_v54  ;;  %2982 = vmatprep.subr.mxu0 %v499_v23  ;;  %v471_v52 = vld [vmem:[#allocation5 + $0xab8] sm:$0xff]  ;;  %v470_v56 = vld [vmem:[#allocation5 + $0xab0] sm:$0xff] }
 0x24b   :  { %3053 = vmatprep.subr.mxu1 %v627_v24  ;;  %2983 = vmatpush2.msra.mxu0 %v498_v25  ;;  %v599_v53 = vld [vmem:[#allocation5 + $0xeb8] sm:$0xff]  ;;  %v598_v60 = vld [vmem:[#allocation5 + $0xeb0] sm:$0xff] }
 0x24c   :  { %3054 = vmatpush2.msra.mxu1 %v626_v26  ;;  %2984 = vmatprep.subr.mxu0 %v495_v27  ;;  %v467_v0 = vld [vmem:[#allocation5 + $0xa98] sm:$0xff]  ;;  %v466_v3 = vld [vmem:[#allocation5 + $0xa90] sm:$0xff] }
 0x24d   :  { %3055 = vmatprep.subr.mxu1 %v623_v28  ;;  %2985 = vmatpush2.msra.mxu0 %v494_v29  ;;  %v595_v2 = vld [vmem:[#allocation5 + $0xe98] sm:$0xff]  ;;  %v594_v4 = vld [vmem:[#allocation5 + $0xe90] sm:$0xff] }
 0x24e   :  { %3056 = vmatpush2.msra.mxu1 %v622_v30  ;;  %2986 = vmatprep.subr.mxu0 %v491_v31  ;;  %v463_v5 = vld [vmem:[#allocation5 + $0xa78] sm:$0xff]  ;;  %v462_v8 = vld [vmem:[#allocation5 + $0xa70] sm:$0xff] }
 0x24f   :  { %3057 = vmatprep.subr.mxu1 %v619_v32  ;;  %2987 = vmatpush2.msra.mxu0 %v490_v33  ;;  %v591_v6 = vld [vmem:[#allocation5 + $0xe78] sm:$0xff]  ;;  %v590_v10 = vld [vmem:[#allocation5 + $0xe70] sm:$0xff] }
 0x250   :  { %3058 = vmatpush2.msra.mxu1 %v618_v34  ;;  %2988 = vmatprep.subr.mxu0 %v487_v35  ;;  %v459_v16 = vld [vmem:[#allocation5 + $0xa58] sm:$0xff]  ;;  %v458_v54 = vld [vmem:[#allocation5 + $0xa50] sm:$0xff] }
 0x251   :  { %3059 = vmatprep.subr.mxu1 %v615_v36  ;;  %2989 = vmatpush2.msra.mxu0 %v486_v38  ;;  %v587_v20 = vld [vmem:[#allocation5 + $0xe58] sm:$0xff]  ;;  %v586_v23 = vld [vmem:[#allocation5 + $0xe50] sm:$0xff] }
 0x252   :  { %3060 = vmatpush2.msra.mxu1 %v614_v40  ;;  %2990 = vmatprep.subr.mxu0 %v483_v43  ;;  %v455_v24 = vld [vmem:[#allocation5 + $0xa38] sm:$0xff]  ;;  %v454_v26 = vld [vmem:[#allocation5 + $0xa30] sm:$0xff] }
 0x253   :  { %3061 = vmatprep.subr.mxu1 %v611_v45  ;;  %2991 = vmatpush2.msra.mxu0 %v482_v46  ;;  %v583_v25 = vld [vmem:[#allocation5 + $0xe38] sm:$0xff]  ;;  %v582_v27 = vld [vmem:[#allocation5 + $0xe30] sm:$0xff] }
 0x254   :  { %3062 = vmatpush2.msra.mxu1 %v610_v13  ;;  %2992 = vmatprep.subr.mxu0 %v479_v47  ;;  %v451_v28 = vld [vmem:[#allocation5 + $0xa18] sm:$0xff]  ;;  %v450_v30 = vld [vmem:[#allocation5 + $0xa10] sm:$0xff] }
 0x255   :  { %3063 = vmatprep.subr.mxu1 %v607_v15  ;;  %2993 = vmatpush2.msra.mxu0 %v478_v48  ;;  %v579_v29 = vld [vmem:[#allocation5 + $0xe18] sm:$0xff]  ;;  %v578_v31 = vld [vmem:[#allocation5 + $0xe10] sm:$0xff] }
 0x256   :  { %3064 = vmatpush2.msra.mxu1 %v606_v17  ;;  %2994 = vmatprep.subr.mxu0 %v475_v49  ;;  %v703_v32 = vld [vmem:[#allocation5 + $0x11f8] sm:$0xff]  ;;  %v702_v34 = vld [vmem:[#allocation5 + $0x11f0] sm:$0xff] }
 0x257   :  { %3065 = vmatprep.subr.mxu1 %v603_v50  ;;  %2995 = vmatpush2.msra.mxu0 %v474_v19  ;;  %v831_v33 = vld [vmem:[#allocation5 + $0x15f8] sm:$0xff]  ;;  %v830_v35 = vld [vmem:[#allocation5 + $0x15f0] sm:$0xff] }
 0x258   :  { %3066 = vmatpush2.msra.mxu1 %v602_v51  ;;  %2996 = vmatprep.subr.mxu0 %v471_v52  ;;  %v699_v36 = vld [vmem:[#allocation5 + $0x11d8] sm:$0xff]  ;;  %v698_v40 = vld [vmem:[#allocation5 + $0x11d0] sm:$0xff] }
 0x259   :  { %3067 = vmatprep.subr.mxu1 %v599_v53  ;;  %2997 = vmatpush2.msra.mxu0 %v470_v56  ;;  %v827_v38 = vld [vmem:[#allocation5 + $0x15d8] sm:$0xff]  ;;  %v826_v43 = vld [vmem:[#allocation5 + $0x15d0] sm:$0xff] }
 0x25a   :  { %3068 = vmatpush2.msra.mxu1 %v598_v60  ;;  %2998 = vmatprep.subr.mxu0 %v467_v0  ;;  %v695_v45 = vld [vmem:[#allocation5 + $0x11b8] sm:$0xff]  ;;  %v694_v46 = vld [vmem:[#allocation5 + $0x11b0] sm:$0xff] }
 0x25b   :  { %3069 = vmatprep.subr.mxu1 %v595_v2  ;;  %2999 = vmatpush2.msra.mxu0 %v466_v3  ;;  %v691_v13 = vld [vmem:[#allocation5 + $0x1198] sm:$0xff]  ;;  %v690_v47 = vld [vmem:[#allocation5 + $0x1190] sm:$0xff] }
 0x25c   :  { %3070 = vmatpush2.msra.mxu1 %v594_v4  ;;  %3000 = vmatprep.subr.mxu0 %v463_v5  ;;  %v818_v15 = vld [vmem:[#allocation5 + $0x1590] sm:$0xff]  ;;  %v815_v48 = vld [vmem:[#allocation5 + $0x1578] sm:$0xff] }
 0x25d   :  { %3071 = vmatprep.subr.mxu1 %v591_v6  ;;  %3001 = vmatpush2.msra.mxu0 %v462_v8  ;;  %v686_v17 = vld [vmem:[#allocation5 + $0x1170] sm:$0xff]  ;;  %v683_v50 = vld [vmem:[#allocation5 + $0x1158] sm:$0xff] }
 0x25e   :  { %3072 = vmatpush2.msra.mxu1 %v590_v10  ;;  %3002 = vmatprep.subr.mxu0 %v459_v16  ;;  %v814_v49 = vld [vmem:[#allocation5 + $0x1570] sm:$0xff]  ;;  %v811_v19 = vld [vmem:[#allocation5 + $0x1558] sm:$0xff] }
 0x25f   :  { %3073 = vmatprep.subr.mxu1 %v587_v20  ;;  %3003 = vmatpush2.msra.mxu0 %v458_v54  ;;  %v682_v51 = vld [vmem:[#allocation5 + $0x1150] sm:$0xff]  ;;  %v679_v53 = vld [vmem:[#allocation5 + $0x1138] sm:$0xff] }
 0x260   :  { %3074 = vmatpush2.msra.mxu1 %v586_v23  ;;  %3004 = vmatprep.subr.mxu0 %v455_v24  ;;  %v810_v52 = vld [vmem:[#allocation5 + $0x1550] sm:$0xff]  ;;  %v807_v56 = vld [vmem:[#allocation5 + $0x1538] sm:$0xff] }
 0x261   :  { %3075 = vmatprep.subr.mxu1 %v583_v25  ;;  %3005 = vmatpush2.msra.mxu0 %v454_v26  ;;  %v678_v60 = vld [vmem:[#allocation5 + $0x1130] sm:$0xff]  ;;  %v675_v2 = vld [vmem:[#allocation5 + $0x1118] sm:$0xff] }
 0x262   :  { %3076 = vmatpush2.msra.mxu1 %v582_v27  ;;  %3006 = vmatprep.subr.mxu0 %v451_v28  ;;  %v806_v0 = vld [vmem:[#allocation5 + $0x1530] sm:$0xff]  ;;  %v803_v3 = vld [vmem:[#allocation5 + $0x1518] sm:$0xff] }
 0x263   :  { %3077 = vmatprep.subr.mxu1 %v579_v29  ;;  %3007 = vmatpush2.msra.mxu0 %v450_v30  ;;  %v674_v4 = vld [vmem:[#allocation5 + $0x1110] sm:$0xff]  ;;  %v671_v6 = vld [vmem:[#allocation5 + $0x10f8] sm:$0xff] }
 0x264   :  { %3008 = vmatprep.mubr.f32.mxu0 %v4295_v37  ;;  %3078 = vmatpush2.msra.mxu1 %v578_v31  ;;  %v823_v37 = vld [vmem:[#allocation5 + $0x15b8] sm:$0xff]  ;;  %v802_v5 = vld [vmem:[#allocation5 + $0x1510] sm:$0xff] }
 0x265   :  { %3009 = vmatmul.mubr.f32.vlgmr.msra.gmra.mxu0 %v4297_v39  ;;  %3079 = vmatprep.mubr.f32.mxu1 %v4299_v41  ;;  %v822_v39 = vld [vmem:[#allocation5 + $0x15b0] sm:$0xff]  ;;  %v819_v41 = vld [vmem:[#allocation5 + $0x1598] sm:$0xff] }
 0x266   :  { %3086 = vmatprep.subr.mxu0 %v703_v32  ;;  %3157 = vmatprep.subr.mxu1 %v831_v33  ;;  %v799_v8 = vld [vmem:[#allocation5 + $0x14f8] sm:$0xff]  ;;  %v670_v10 = vld [vmem:[#allocation5 + $0x10f0] sm:$0xff] }
 0x267   :  { %3080 = vmatmul.mubr.f32.vlgmr.msra.gmra.mxu1 %v4301_v44  ;;  %3087 = vmatpush1.msra.mxu0 %v702_v34  ;;  %v687_v44 = vld [vmem:[#allocation5 + $0x1178] sm:$0xff]  ;;  %v798_v16 = vld [vmem:[#allocation5 + $0x14f0] sm:$0xff] }
 0x268   :  { %3158 = vmatpush1.msra.mxu1 %v830_v35  ;;  %3088 = vmatprep.subr.mxu0 %v699_v36  ;;  %v667_v20 = vld [vmem:[#allocation5 + $0x10d8] sm:$0xff]  ;;  %v666_v23 = vld [vmem:[#allocation5 + $0x10d0] sm:$0xff] }
 0x269   :  { %3159 = vmatprep.subr.mxu1 %v827_v38  ;;  %3089 = vmatpush1.msra.mxu0 %v698_v40  ;;  %v795_v54 = vld [vmem:[#allocation5 + $0x14d8] sm:$0xff]  ;;  %v794_v24 = vld [vmem:[#allocation5 + $0x14d0] sm:$0xff] }
 0x26a   :  { %3160 = vmatpush1.msra.mxu1 %v826_v43  ;;  %3090 = vmatprep.subr.mxu0 %v695_v45  ;;  %v663_v25 = vld [vmem:[#allocation5 + $0x10b8] sm:$0xff]  ;;  %v662_v27 = vld [vmem:[#allocation5 + $0x10b0] sm:$0xff] }
 0x26b   :  { %3161 = vmatprep.subr.mxu1 %v823_v37  ;;  %3091 = vmatpush1.msra.mxu0 %v694_v46  ;;  %v791_v26 = vld [vmem:[#allocation5 + $0x14b8] sm:$0xff]  ;;  %v790_v28 = vld [vmem:[#allocation5 + $0x14b0] sm:$0xff] }
 0x26c   :  { %3162 = vmatpush1.msra.mxu1 %v822_v39  ;;  %3092 = vmatprep.subr.mxu0 %v691_v13  ;;  %v659_v29 = vld [vmem:[#allocation5 + $0x1098] sm:$0xff]  ;;  %v658_v31 = vld [vmem:[#allocation5 + $0x1090] sm:$0xff] }
 0x26d   :  { %3163 = vmatprep.subr.mxu1 %v819_v41  ;;  %3093 = vmatpush1.msra.mxu0 %v690_v47  ;;  %v787_v30 = vld [vmem:[#allocation5 + $0x1498] sm:$0xff]  ;;  %v786_v32 = vld [vmem:[#allocation5 + $0x1490] sm:$0xff] }
 0x26e   :  { %3164 = vmatpush1.msra.mxu1 %v818_v15  ;;  %3094 = vmatprep.subr.mxu0 %v687_v44  ;;  %v655_v33 = vld [vmem:[#allocation5 + $0x1078] sm:$0xff]  ;;  %v654_v35 = vld [vmem:[#allocation5 + $0x1070] sm:$0xff] }
 0x26f   :  { %3165 = vmatprep.subr.mxu1 %v815_v48  ;;  %3095 = vmatpush1.msra.mxu0 %v686_v17  ;;  %v783_v34 = vld [vmem:[#allocation5 + $0x1478] sm:$0xff]  ;;  %v782_v36 = vld [vmem:[#allocation5 + $0x1470] sm:$0xff] }
 0x270   :  { %3166 = vmatpush1.msra.mxu1 %v814_v49  ;;  %3096 = vmatprep.subr.mxu0 %v683_v50  ;;  %v651_v38 = vld [vmem:[#allocation5 + $0x1058] sm:$0xff]  ;;  %v650_v43 = vld [vmem:[#allocation5 + $0x1050] sm:$0xff] }
 0x271   :  { %3167 = vmatprep.subr.mxu1 %v811_v19  ;;  %3097 = vmatpush1.msra.mxu0 %v682_v51  ;;  %v779_v40 = vld [vmem:[#allocation5 + $0x1458] sm:$0xff]  ;;  %v778_v45 = vld [vmem:[#allocation5 + $0x1450] sm:$0xff] }
 0x272   :  { %3168 = vmatpush1.msra.mxu1 %v810_v52  ;;  %3098 = vmatprep.subr.mxu0 %v679_v53  ;;  %v647_v37 = vld [vmem:[#allocation5 + $0x1038] sm:$0xff]  ;;  %v646_v39 = vld [vmem:[#allocation5 + $0x1030] sm:$0xff] }
 0x273   :  { %3169 = vmatprep.subr.mxu1 %v807_v56  ;;  %3099 = vmatpush1.msra.mxu0 %v678_v60  ;;  %v775_v46 = vld [vmem:[#allocation5 + $0x1438] sm:$0xff]  ;;  %v774_v13 = vld [vmem:[#allocation5 + $0x1430] sm:$0xff] }
 0x274   :  { %3170 = vmatpush1.msra.mxu1 %v806_v0  ;;  %3100 = vmatprep.subr.mxu0 %v675_v2  ;;  %v643_v41 = vld [vmem:[#allocation5 + $0x1018] sm:$0xff]  ;;  %v642_v15 = vld [vmem:[#allocation5 + $0x1010] sm:$0xff] }
 0x275   :  { %3171 = vmatprep.subr.mxu1 %v803_v3  ;;  %3101 = vmatpush1.msra.mxu0 %v674_v4  ;;  %v771_v47 = vld [vmem:[#allocation5 + $0x1418] sm:$0xff]  ;;  %v770_v44 = vld [vmem:[#allocation5 + $0x1410] sm:$0xff] }
 0x276   :  { %3172 = vmatpush1.msra.mxu1 %v802_v5  ;;  %3102 = vmatprep.subr.mxu0 %v671_v6  ;;  %v767_v48 = vld [vmem:[#allocation5 + $0x13f8] sm:$0xff]  ;;  %v766_v49 = vld [vmem:[#allocation5 + $0x13f0] sm:$0xff] }
 0x277   :  { %3173 = vmatprep.subr.mxu1 %v799_v8  ;;  %3103 = vmatpush1.msra.mxu0 %v670_v10  ;;  %v895_v17 = vld [vmem:[#allocation5 + $0x17f8] sm:$0xff]  ;;  %v894_v50 = vld [vmem:[#allocation5 + $0x17f0] sm:$0xff] }
 0x278   :  { %3174 = vmatpush1.msra.mxu1 %v798_v16  ;;  %3104 = vmatprep.subr.mxu0 %v667_v20  ;;  %v763_v19 = vld [vmem:[#allocation5 + $0x13d8] sm:$0xff]  ;;  %v762_v52 = vld [vmem:[#allocation5 + $0x13d0] sm:$0xff] }
 0x279   :  { %3175 = vmatprep.subr.mxu1 %v795_v54  ;;  %3105 = vmatpush1.msra.mxu0 %v666_v23  ;;  %v891_v51 = vld [vmem:[#allocation5 + $0x17d8] sm:$0xff]  ;;  %v890_v53 = vld [vmem:[#allocation5 + $0x17d0] sm:$0xff] }
 0x27a   :  { %3176 = vmatpush1.msra.mxu1 %v794_v24  ;;  %3106 = vmatprep.subr.mxu0 %v663_v25  ;;  %v759_v56 = vld [vmem:[#allocation5 + $0x13b8] sm:$0xff]  ;;  %v758_v0 = vld [vmem:[#allocation5 + $0x13b0] sm:$0xff] }
 0x27b   :  { %3177 = vmatprep.subr.mxu1 %v791_v26  ;;  %3107 = vmatpush1.msra.mxu0 %v662_v27  ;;  %v887_v60 = vld [vmem:[#allocation5 + $0x17b8] sm:$0xff]  ;;  %v886_v2 = vld [vmem:[#allocation5 + $0x17b0] sm:$0xff] }
 0x27c   :  { %3178 = vmatpush1.msra.mxu1 %v790_v28  ;;  %3108 = vmatprep.subr.mxu0 %v659_v29  ;;  %v755_v3 = vld [vmem:[#allocation5 + $0x1398] sm:$0xff]  ;;  %v754_v5 = vld [vmem:[#allocation5 + $0x1390] sm:$0xff] }
 0x27d   :  { %3179 = vmatprep.subr.mxu1 %v787_v30  ;;  %3109 = vmatpush1.msra.mxu0 %v658_v31  ;;  %v883_v4 = vld [vmem:[#allocation5 + $0x1798] sm:$0xff]  ;;  %v882_v6 = vld [vmem:[#allocation5 + $0x1790] sm:$0xff] }
 0x27e   :  { %3180 = vmatpush1.msra.mxu1 %v786_v32  ;;  %3110 = vmatprep.subr.mxu0 %v655_v33  ;;  %v751_v8 = vld [vmem:[#allocation5 + $0x1378] sm:$0xff]  ;;  %v750_v16 = vld [vmem:[#allocation5 + $0x1370] sm:$0xff] }
 0x27f   :  { %3181 = vmatprep.subr.mxu1 %v783_v34  ;;  %3111 = vmatpush1.msra.mxu0 %v654_v35  ;;  %v879_v10 = vld [vmem:[#allocation5 + $0x1778] sm:$0xff]  ;;  %v878_v20 = vld [vmem:[#allocation5 + $0x1770] sm:$0xff] }
 0x280   :  { %3182 = vmatpush1.msra.mxu1 %v782_v36  ;;  %3112 = vmatprep.subr.mxu0 %v651_v38  ;;  %v747_v54 = vld [vmem:[#allocation5 + $0x1358] sm:$0xff]  ;;  %v746_v24 = vld [vmem:[#allocation5 + $0x1350] sm:$0xff] }
 0x281   :  { %3183 = vmatprep.subr.mxu1 %v779_v40  ;;  %3113 = vmatpush1.msra.mxu0 %v650_v43  ;;  %v875_v23 = vld [vmem:[#allocation5 + $0x1758] sm:$0xff]  ;;  %v874_v25 = vld [vmem:[#allocation5 + $0x1750] sm:$0xff] }
 0x282   :  { %3184 = vmatpush1.msra.mxu1 %v778_v45  ;;  %3114 = vmatprep.subr.mxu0 %v647_v37  ;;  %v743_v26 = vld [vmem:[#allocation5 + $0x1338] sm:$0xff]  ;;  %v742_v28 = vld [vmem:[#allocation5 + $0x1330] sm:$0xff] }
 0x283   :  { %3185 = vmatprep.subr.mxu1 %v775_v46  ;;  %3115 = vmatpush1.msra.mxu0 %v646_v39  ;;  %v871_v27 = vld [vmem:[#allocation5 + $0x1738] sm:$0xff]  ;;  %v870_v29 = vld [vmem:[#allocation5 + $0x1730] sm:$0xff] }
 0x284   :  { %3186 = vmatpush1.msra.mxu1 %v774_v13  ;;  %3116 = vmatprep.subr.mxu0 %v643_v41  ;;  %v739_v30 = vld [vmem:[#allocation5 + $0x1318] sm:$0xff]  ;;  %v738_v32 = vld [vmem:[#allocation5 + $0x1310] sm:$0xff] }
 0x285   :  { %3187 = vmatprep.subr.mxu1 %v771_v47  ;;  %3117 = vmatpush1.msra.mxu0 %v642_v15  ;;  %v867_v31 = vld [vmem:[#allocation5 + $0x1718] sm:$0xff]  ;;  %v866_v33 = vld [vmem:[#allocation5 + $0x1710] sm:$0xff] }
 0x286   :  { %3188 = vmatpush1.msra.mxu1 %v770_v44  ;;  %3118 = vmatprep.subr.mxu0 %v767_v48  ;;  %v735_v34 = vld [vmem:[#allocation5 + $0x12f8] sm:$0xff]  ;;  %v734_v36 = vld [vmem:[#allocation5 + $0x12f0] sm:$0xff] }
 0x287   :  { %3189 = vmatprep.subr.mxu1 %v895_v17  ;;  %3119 = vmatpush2.msra.mxu0 %v766_v49  ;;  %v863_v35 = vld [vmem:[#allocation5 + $0x16f8] sm:$0xff]  ;;  %v862_v38 = vld [vmem:[#allocation5 + $0x16f0] sm:$0xff] }
 0x288   :  { %3190 = vmatpush2.msra.mxu1 %v894_v50  ;;  %3120 = vmatprep.subr.mxu0 %v763_v19  ;;  %v731_v40 = vld [vmem:[#allocation5 + $0x12d8] sm:$0xff]  ;;  %v730_v45 = vld [vmem:[#allocation5 + $0x12d0] sm:$0xff] }
 0x289   :  { %3191 = vmatprep.subr.mxu1 %v891_v51  ;;  %3121 = vmatpush2.msra.mxu0 %v762_v52  ;;  %v859_v43 = vld [vmem:[#allocation5 + $0x16d8] sm:$0xff]  ;;  %v858_v37 = vld [vmem:[#allocation5 + $0x16d0] sm:$0xff] }
 0x28a   :  { %3192 = vmatpush2.msra.mxu1 %v890_v53  ;;  %3122 = vmatprep.subr.mxu0 %v759_v56  ;;  %v727_v46 = vld [vmem:[#allocation5 + $0x12b8] sm:$0xff]  ;;  %v726_v13 = vld [vmem:[#allocation5 + $0x12b0] sm:$0xff] }
 0x28b   :  { %3193 = vmatprep.subr.mxu1 %v887_v60  ;;  %3123 = vmatpush2.msra.mxu0 %v758_v0  ;;  %v855_v39 = vld [vmem:[#allocation5 + $0x16b8] sm:$0xff]  ;;  %v854_v41 = vld [vmem:[#allocation5 + $0x16b0] sm:$0xff] }
 0x28c   :  { %3194 = vmatpush2.msra.mxu1 %v886_v2  ;;  %3124 = vmatprep.subr.mxu0 %v755_v3  ;;  %v723_v47 = vld [vmem:[#allocation5 + $0x1298] sm:$0xff]  ;;  %v722_v44 = vld [vmem:[#allocation5 + $0x1290] sm:$0xff] }
 0x28d   :  { %3195 = vmatprep.subr.mxu1 %v883_v4  ;;  %3125 = vmatpush2.msra.mxu0 %v754_v5  ;;  %v851_v15 = vld [vmem:[#allocation5 + $0x1698] sm:$0xff]  ;;  %v850_v48 = vld [vmem:[#allocation5 + $0x1690] sm:$0xff] }
 0x28e   :  { %3196 = vmatpush2.msra.mxu1 %v882_v6  ;;  %3126 = vmatprep.subr.mxu0 %v751_v8  ;;  %v719_v17 = vld [vmem:[#allocation5 + $0x1278] sm:$0xff]  ;;  %v718_v50 = vld [vmem:[#allocation5 + $0x1270] sm:$0xff] }
 0x28f   :  { %3197 = vmatprep.subr.mxu1 %v879_v10  ;;  %3127 = vmatpush2.msra.mxu0 %v750_v16  ;;  %v847_v49 = vld [vmem:[#allocation5 + $0x1678] sm:$0xff]  ;;  %v846_v19 = vld [vmem:[#allocation5 + $0x1670] sm:$0xff] }
 0x290   :  { %3198 = vmatpush2.msra.mxu1 %v878_v20  ;;  %3128 = vmatprep.subr.mxu0 %v747_v54  ;;  %v715_v51 = vld [vmem:[#allocation5 + $0x1258] sm:$0xff]  ;;  %v714_v53 = vld [vmem:[#allocation5 + $0x1250] sm:$0xff] }
 0x291   :  { %3199 = vmatprep.subr.mxu1 %v875_v23  ;;  %3129 = vmatpush2.msra.mxu0 %v746_v24  ;;  %v843_v52 = vld [vmem:[#allocation5 + $0x1658] sm:$0xff]  ;;  %v842_v56 = vld [vmem:[#allocation5 + $0x1650] sm:$0xff] }
 0x292   :  { %3200 = vmatpush2.msra.mxu1 %v874_v25  ;;  %3130 = vmatprep.subr.mxu0 %v743_v26  ;;  %v711_v60 = vld [vmem:[#allocation5 + $0x1238] sm:$0xff]  ;;  %v710_v2 = vld [vmem:[#allocation5 + $0x1230] sm:$0xff] }
 0x293   :  { %3201 = vmatprep.subr.mxu1 %v871_v27  ;;  %3131 = vmatpush2.msra.mxu0 %v742_v28  ;;  %v839_v0 = vld [vmem:[#allocation5 + $0x1638] sm:$0xff]  ;;  %v838_v3 = vld [vmem:[#allocation5 + $0x1630] sm:$0xff] }
 0x294   :  { %3202 = vmatpush2.msra.mxu1 %v870_v29  ;;  %3132 = vmatprep.subr.mxu0 %v739_v30  ;;  %v707_v4 = vld [vmem:[#allocation5 + $0x1218] sm:$0xff]  ;;  %v706_v6 = vld [vmem:[#allocation5 + $0x1210] sm:$0xff] }
 0x295   :  { %3203 = vmatprep.subr.mxu1 %v867_v31  ;;  %3133 = vmatpush2.msra.mxu0 %v738_v32  ;;  %v835_v5 = vld [vmem:[#allocation5 + $0x1618] sm:$0xff]  ;;  %v834_v8 = vld [vmem:[#allocation5 + $0x1610] sm:$0xff] }
 0x296   :  { %3204 = vmatpush2.msra.mxu1 %v866_v33  ;;  %3134 = vmatprep.subr.mxu0 %v735_v34  ;;  %v959_v10 = vld [vmem:[#allocation5 + $0x19f8] sm:$0xff]  ;;  %v958_v20 = vld [vmem:[#allocation5 + $0x19f0] sm:$0xff] }
 0x297   :  { %3205 = vmatprep.subr.mxu1 %v863_v35  ;;  %3135 = vmatpush2.msra.mxu0 %v734_v36  ;;  %v1087_v16 = vld [vmem:[#allocation5 + $0x1df8] sm:$0xff]  ;;  %v1086_v54 = vld [vmem:[#allocation5 + $0x1df0] sm:$0xff] }
 0x298   :  { %3206 = vmatpush2.msra.mxu1 %v862_v38  ;;  %3136 = vmatprep.subr.mxu0 %v731_v40  ;;  %v955_v23 = vld [vmem:[#allocation5 + $0x19d8] sm:$0xff]  ;;  %v954_v25 = vld [vmem:[#allocation5 + $0x19d0] sm:$0xff] }
 0x299   :  { %3207 = vmatprep.subr.mxu1 %v859_v43  ;;  %3137 = vmatpush2.msra.mxu0 %v730_v45  ;;  %v1083_v24 = vld [vmem:[#allocation5 + $0x1dd8] sm:$0xff]  ;;  %v1082_v26 = vld [vmem:[#allocation5 + $0x1dd0] sm:$0xff] }
 0x29a   :  { %3208 = vmatpush2.msra.mxu1 %v858_v37  ;;  %3138 = vmatprep.subr.mxu0 %v727_v46  ;;  %v951_v27 = vld [vmem:[#allocation5 + $0x19b8] sm:$0xff]  ;;  %v950_v28 = vld [vmem:[#allocation5 + $0x19b0] sm:$0xff] }
 0x29b   :  { %3209 = vmatprep.subr.mxu1 %v855_v39  ;;  %3139 = vmatpush2.msra.mxu0 %v726_v13  ;;  %v947_v29 = vld [vmem:[#allocation5 + $0x1998] sm:$0xff]  ;;  %v946_v30 = vld [vmem:[#allocation5 + $0x1990] sm:$0xff] }
 0x29c   :  { %3210 = vmatpush2.msra.mxu1 %v854_v41  ;;  %3140 = vmatprep.subr.mxu0 %v723_v47  ;;  %v1074_v31 = vld [vmem:[#allocation5 + $0x1d90] sm:$0xff]  ;;  %v1071_v32 = vld [vmem:[#allocation5 + $0x1d78] sm:$0xff] }
 0x29d   :  { %3211 = vmatprep.subr.mxu1 %v851_v15  ;;  %3141 = vmatpush2.msra.mxu0 %v722_v44  ;;  %v942_v33 = vld [vmem:[#allocation5 + $0x1970] sm:$0xff]  ;;  %v939_v35 = vld [vmem:[#allocation5 + $0x1958] sm:$0xff] }
 0x29e   :  { %3212 = vmatpush2.msra.mxu1 %v850_v48  ;;  %3142 = vmatprep.subr.mxu0 %v719_v17  ;;  %v1070_v34 = vld [vmem:[#allocation5 + $0x1d70] sm:$0xff]  ;;  %v1067_v36 = vld [vmem:[#allocation5 + $0x1d58] sm:$0xff] }
 0x29f   :  { %3213 = vmatprep.subr.mxu1 %v847_v49  ;;  %3143 = vmatpush2.msra.mxu0 %v718_v50  ;;  %v938_v38 = vld [vmem:[#allocation5 + $0x1950] sm:$0xff]  ;;  %v935_v43 = vld [vmem:[#allocation5 + $0x1938] sm:$0xff] }
 0x2a0   :  { %3214 = vmatpush2.msra.mxu1 %v846_v19  ;;  %3144 = vmatprep.subr.mxu0 %v715_v51  ;;  %v1066_v40 = vld [vmem:[#allocation5 + $0x1d50] sm:$0xff]  ;;  %v1063_v45 = vld [vmem:[#allocation5 + $0x1d38] sm:$0xff] }
 0x2a1   :  { %3215 = vmatprep.subr.mxu1 %v843_v52  ;;  %3145 = vmatpush2.msra.mxu0 %v714_v53  ;;  %v934_v37 = vld [vmem:[#allocation5 + $0x1930] sm:$0xff]  ;;  %v931_v39 = vld [vmem:[#allocation5 + $0x1918] sm:$0xff] }
 0x2a2   :  { %3216 = vmatpush2.msra.mxu1 %v842_v56  ;;  %3146 = vmatprep.subr.mxu0 %v711_v60  ;;  %v1062_v46 = vld [vmem:[#allocation5 + $0x1d30] sm:$0xff]  ;;  %v1059_v13 = vld [vmem:[#allocation5 + $0x1d18] sm:$0xff] }
 0x2a3   :  { %3217 = vmatprep.subr.mxu1 %v839_v0  ;;  %3147 = vmatpush2.msra.mxu0 %v710_v2  ;;  %v930_v41 = vld [vmem:[#allocation5 + $0x1910] sm:$0xff]  ;;  %v927_v15 = vld [vmem:[#allocation5 + $0x18f8] sm:$0xff] }
 0x2a4   :  { %3218 = vmatpush2.msra.mxu1 %v838_v3  ;;  %3148 = vmatprep.subr.mxu0 %v707_v4  ;;  %v1058_v47 = vld [vmem:[#allocation5 + $0x1d10] sm:$0xff]  ;;  %v1055_v44 = vld [vmem:[#allocation5 + $0x1cf8] sm:$0xff] }
 0x2a5   :  { %3219 = vmatprep.subr.mxu1 %v835_v5  ;;  %3149 = vmatpush2.msra.mxu0 %v706_v6  ;;  %v926_v48 = vld [vmem:[#allocation5 + $0x18f0] sm:$0xff]  ;;  %v923_v49 = vld [vmem:[#allocation5 + $0x18d8] sm:$0xff] }
 0x2a6   :  { %3150 = vmatprep.mubr.f32.mxu0 %v4311_v7  ;;  %3220 = vmatpush2.msra.mxu1 %v834_v8  ;;  %v1079_v7 = vld [vmem:[#allocation5 + $0x1db8] sm:$0xff]  ;;  %v1054_v17 = vld [vmem:[#allocation5 + $0x1cf0] sm:$0xff] }
 0x2a7   :  { %3151 = vmatmul.mubr.f32.vlgmr.msra.gmra.mxu0 %v4313_v9  ;;  %3221 = vmatprep.mubr.f32.mxu1 %v4315_v11  ;;  %v1078_v9 = vld [vmem:[#allocation5 + $0x1db0] sm:$0xff]  ;;  %v1075_v11 = vld [vmem:[#allocation5 + $0x1d98] sm:$0xff] }
 0x2a8   :  { %3228 = vmatprep.subr.mxu0 %v959_v10  ;;  %3299 = vmatprep.subr.mxu1 %v1087_v16  ;;  %v1051_v50 = vld [vmem:[#allocation5 + $0x1cd8] sm:$0xff]  ;;  %v922_v19 = vld [vmem:[#allocation5 + $0x18d0] sm:$0xff] }
 0x2a9   :  { %3222 = vmatmul.mubr.f32.vlgmr.msra.gmra.mxu1 %v4317_v14  ;;  %3229 = vmatpush1.msra.mxu0 %v958_v20  ;;  %v943_v14 = vld [vmem:[#allocation5 + $0x1978] sm:$0xff]  ;;  %v1050_v51 = vld [vmem:[#allocation5 + $0x1cd0] sm:$0xff] }
 0x2aa   :  { %3300 = vmatpush1.msra.mxu1 %v1086_v54  ;;  %3230 = vmatprep.subr.mxu0 %v955_v23  ;;  %v919_v52 = vld [vmem:[#allocation5 + $0x18b8] sm:$0xff]  ;;  %v918_v56 = vld [vmem:[#allocation5 + $0x18b0] sm:$0xff] }
 0x2ab   :  { %3301 = vmatprep.subr.mxu1 %v1083_v24  ;;  %3231 = vmatpush1.msra.mxu0 %v954_v25  ;;  %v1047_v53 = vld [vmem:[#allocation5 + $0x1cb8] sm:$0xff]  ;;  %v1046_v60 = vld [vmem:[#allocation5 + $0x1cb0] sm:$0xff] }
 0x2ac   :  { %3302 = vmatpush1.msra.mxu1 %v1082_v26  ;;  %3232 = vmatprep.subr.mxu0 %v951_v27  ;;  %v915_v0 = vld [vmem:[#allocation5 + $0x1898] sm:$0xff]  ;;  %v914_v3 = vld [vmem:[#allocation5 + $0x1890] sm:$0xff] }
 0x2ad   :  { %3303 = vmatprep.subr.mxu1 %v1079_v7  ;;  %3233 = vmatpush1.msra.mxu0 %v950_v28  ;;  %v1043_v2 = vld [vmem:[#allocation5 + $0x1c98] sm:$0xff]  ;;  %v1042_v4 = vld [vmem:[#allocation5 + $0x1c90] sm:$0xff] }
 0x2ae   :  { %3304 = vmatpush1.msra.mxu1 %v1078_v9  ;;  %3234 = vmatprep.subr.mxu0 %v947_v29  ;;  %v911_v5 = vld [vmem:[#allocation5 + $0x1878] sm:$0xff]  ;;  %v910_v8 = vld [vmem:[#allocation5 + $0x1870] sm:$0xff] }
 0x2af   :  { %3305 = vmatprep.subr.mxu1 %v1075_v11  ;;  %3235 = vmatpush1.msra.mxu0 %v946_v30  ;;  %v1039_v6 = vld [vmem:[#allocation5 + $0x1c78] sm:$0xff]  ;;  %v1038_v10 = vld [vmem:[#allocation5 + $0x1c70] sm:$0xff] }
 0x2b0   :  { %3306 = vmatpush1.msra.mxu1 %v1074_v31  ;;  %3236 = vmatprep.subr.mxu0 %v943_v14  ;;  %v907_v16 = vld [vmem:[#allocation5 + $0x1858] sm:$0xff]  ;;  %v906_v54 = vld [vmem:[#allocation5 + $0x1850] sm:$0xff] }
 0x2b1   :  { %3307 = vmatprep.subr.mxu1 %v1071_v32  ;;  %3237 = vmatpush1.msra.mxu0 %v942_v33  ;;  %v1035_v20 = vld [vmem:[#allocation5 + $0x1c58] sm:$0xff]  ;;  %v1034_v23 = vld [vmem:[#allocation5 + $0x1c50] sm:$0xff] }
 0x2b2   :  { %3308 = vmatpush1.msra.mxu1 %v1070_v34  ;;  %3238 = vmatprep.subr.mxu0 %v939_v35  ;;  %v903_v24 = vld [vmem:[#allocation5 + $0x1838] sm:$0xff]  ;;  %v902_v26 = vld [vmem:[#allocation5 + $0x1830] sm:$0xff] }
 0x2b3   :  { %3309 = vmatprep.subr.mxu1 %v1067_v36  ;;  %3239 = vmatpush1.msra.mxu0 %v938_v38  ;;  %v1031_v25 = vld [vmem:[#allocation5 + $0x1c38] sm:$0xff]  ;;  %v1030_v27 = vld [vmem:[#allocation5 + $0x1c30] sm:$0xff] }
 0x2b4   :  { %3310 = vmatpush1.msra.mxu1 %v1066_v40  ;;  %3240 = vmatprep.subr.mxu0 %v935_v43  ;;  %v899_v7 = vld [vmem:[#allocation5 + $0x1818] sm:$0xff]  ;;  %v898_v9 = vld [vmem:[#allocation5 + $0x1810] sm:$0xff] }
 0x2b5   :  { %3311 = vmatprep.subr.mxu1 %v1063_v45  ;;  %3241 = vmatpush1.msra.mxu0 %v934_v37  ;;  %v1027_v28 = vld [vmem:[#allocation5 + $0x1c18] sm:$0xff]  ;;  %v1026_v29 = vld [vmem:[#allocation5 + $0x1c10] sm:$0xff] }
 0x2b6   :  { %3312 = vmatpush1.msra.mxu1 %v1062_v46  ;;  %3242 = vmatprep.subr.mxu0 %v931_v39  ;;  %v1023_v11 = vld [vmem:[#allocation5 + $0x1bf8] sm:$0xff]  ;;  %v1022_v31 = vld [vmem:[#allocation5 + $0x1bf0] sm:$0xff] }
 0x2b7   :  { %3313 = vmatprep.subr.mxu1 %v1059_v13  ;;  %3243 = vmatpush1.msra.mxu0 %v930_v41  ;;  %v1151_v30 = vld [vmem:[#allocation5 + $0x1ff8] sm:$0xff]  ;;  %v1150_v14 = vld [vmem:[#allocation5 + $0x1ff0] sm:$0xff] }
 0x2b8   :  { %3314 = vmatpush1.msra.mxu1 %v1058_v47  ;;  %3244 = vmatprep.subr.mxu0 %v927_v15  ;;  %v1019_v32 = vld [vmem:[#allocation5 + $0x1bd8] sm:$0xff]  ;;  %v1018_v34 = vld [vmem:[#allocation5 + $0x1bd0] sm:$0xff] }
 0x2b9   :  { %3315 = vmatprep.subr.mxu1 %v1055_v44  ;;  %3245 = vmatpush1.msra.mxu0 %v926_v48  ;;  %v1147_v33 = vld [vmem:[#allocation5 + $0x1fd8] sm:$0xff]  ;;  %v1146_v35 = vld [vmem:[#allocation5 + $0x1fd0] sm:$0xff] }
 0x2ba   :  { %3316 = vmatpush1.msra.mxu1 %v1054_v17  ;;  %3246 = vmatprep.subr.mxu0 %v923_v49  ;;  %v1015_v36 = vld [vmem:[#allocation5 + $0x1bb8] sm:$0xff]  ;;  %v1014_v40 = vld [vmem:[#allocation5 + $0x1bb0] sm:$0xff] }
 0x2bb   :  { %3317 = vmatprep.subr.mxu1 %v1051_v50  ;;  %3247 = vmatpush1.msra.mxu0 %v922_v19  ;;  %v1143_v38 = vld [vmem:[#allocation5 + $0x1fb8] sm:$0xff]  ;;  %v1142_v43 = vld [vmem:[#allocation5 + $0x1fb0] sm:$0xff] }
 0x2bc   :  { %3318 = vmatpush1.msra.mxu1 %v1050_v51  ;;  %3248 = vmatprep.subr.mxu0 %v919_v52  ;;  %v1011_v45 = vld [vmem:[#allocation5 + $0x1b98] sm:$0xff]  ;;  %v1010_v46 = vld [vmem:[#allocation5 + $0x1b90] sm:$0xff] }
 0x2bd   :  { %3319 = vmatprep.subr.mxu1 %v1047_v53  ;;  %3249 = vmatpush1.msra.mxu0 %v918_v56  ;;  %v1139_v37 = vld [vmem:[#allocation5 + $0x1f98] sm:$0xff]  ;;  %v1138_v39 = vld [vmem:[#allocation5 + $0x1f90] sm:$0xff] }
 0x2be   :  { %3320 = vmatpush1.msra.mxu1 %v1046_v60  ;;  %3250 = vmatprep.subr.mxu0 %v915_v0  ;;  %v1007_v13 = vld [vmem:[#allocation5 + $0x1b78] sm:$0xff]  ;;  %v1006_v47 = vld [vmem:[#allocation5 + $0x1b70] sm:$0xff] }
 0x2bf   :  { %3321 = vmatprep.subr.mxu1 %v1043_v2  ;;  %3251 = vmatpush1.msra.mxu0 %v914_v3  ;;  %v1135_v41 = vld [vmem:[#allocation5 + $0x1f78] sm:$0xff]  ;;  %v1134_v15 = vld [vmem:[#allocation5 + $0x1f70] sm:$0xff] }
 0x2c0   :  { %3322 = vmatpush1.msra.mxu1 %v1042_v4  ;;  %3252 = vmatprep.subr.mxu0 %v911_v5  ;;  %v1003_v44 = vld [vmem:[#allocation5 + $0x1b58] sm:$0xff]  ;;  %v1002_v17 = vld [vmem:[#allocation5 + $0x1b50] sm:$0xff] }
 0x2c1   :  { %3323 = vmatprep.subr.mxu1 %v1039_v6  ;;  %3253 = vmatpush1.msra.mxu0 %v910_v8  ;;  %v1131_v48 = vld [vmem:[#allocation5 + $0x1f58] sm:$0xff]  ;;  %v1130_v49 = vld [vmem:[#allocation5 + $0x1f50] sm:$0xff] }
 0x2c2   :  { %3324 = vmatpush1.msra.mxu1 %v1038_v10  ;;  %3254 = vmatprep.subr.mxu0 %v907_v16  ;;  %v999_v50 = vld [vmem:[#allocation5 + $0x1b38] sm:$0xff]  ;;  %v998_v51 = vld [vmem:[#allocation5 + $0x1b30] sm:$0xff] }
 0x2c3   :  { %3325 = vmatprep.subr.mxu1 %v1035_v20  ;;  %3255 = vmatpush1.msra.mxu0 %v906_v54  ;;  %v1127_v19 = vld [vmem:[#allocation5 + $0x1f38] sm:$0xff]  ;;  %v1126_v52 = vld [vmem:[#allocation5 + $0x1f30] sm:$0xff] }
 0x2c4   :  { %3326 = vmatpush1.msra.mxu1 %v1034_v23  ;;  %3256 = vmatprep.subr.mxu0 %v903_v24  ;;  %v995_v53 = vld [vmem:[#allocation5 + $0x1b18] sm:$0xff]  ;;  %v994_v60 = vld [vmem:[#allocation5 + $0x1b10] sm:$0xff] }
 0x2c5   :  { %3327 = vmatprep.subr.mxu1 %v1031_v25  ;;  %3257 = vmatpush1.msra.mxu0 %v902_v26  ;;  %v1123_v56 = vld [vmem:[#allocation5 + $0x1f18] sm:$0xff]  ;;  %v1122_v0 = vld [vmem:[#allocation5 + $0x1f10] sm:$0xff] }
 0x2c6   :  { %3328 = vmatpush1.msra.mxu1 %v1030_v27  ;;  %3258 = vmatprep.subr.mxu0 %v899_v7  ;;  %v991_v2 = vld [vmem:[#allocation5 + $0x1af8] sm:$0xff]  ;;  %v990_v4 = vld [vmem:[#allocation5 + $0x1af0] sm:$0xff] }
 0x2c7   :  { %3329 = vmatprep.subr.mxu1 %v1027_v28  ;;  %3259 = vmatpush1.msra.mxu0 %v898_v9  ;;  %v1119_v3 = vld [vmem:[#allocation5 + $0x1ef8] sm:$0xff]  ;;  %v1118_v5 = vld [vmem:[#allocation5 + $0x1ef0] sm:$0xff] }
 0x2c8   :  { %3330 = vmatpush1.msra.mxu1 %v1026_v29  ;;  %3260 = vmatprep.subr.mxu0 %v1023_v11  ;;  %v987_v6 = vld [vmem:[#allocation5 + $0x1ad8] sm:$0xff]  ;;  %v986_v10 = vld [vmem:[#allocation5 + $0x1ad0] sm:$0xff] }
 0x2c9   :  { %3331 = vmatprep.subr.mxu1 %v1151_v30  ;;  %3261 = vmatpush2.msra.mxu0 %v1022_v31  ;;  %v1115_v8 = vld [vmem:[#allocation5 + $0x1ed8] sm:$0xff]  ;;  %v1114_v16 = vld [vmem:[#allocation5 + $0x1ed0] sm:$0xff] }
 0x2ca   :  { %3332 = vmatpush2.msra.mxu1 %v1150_v14  ;;  %3262 = vmatprep.subr.mxu0 %v1019_v32  ;;  %v983_v20 = vld [vmem:[#allocation5 + $0x1ab8] sm:$0xff]  ;;  %v982_v23 = vld [vmem:[#allocation5 + $0x1ab0] sm:$0xff] }
 0x2cb   :  { %3333 = vmatprep.subr.mxu1 %v1147_v33  ;;  %3263 = vmatpush2.msra.mxu0 %v1018_v34  ;;  %v1111_v54 = vld [vmem:[#allocation5 + $0x1eb8] sm:$0xff]  ;;  %v1110_v24 = vld [vmem:[#allocation5 + $0x1eb0] sm:$0xff] }
 0x2cc   :  { %3334 = vmatpush2.msra.mxu1 %v1146_v35  ;;  %3264 = vmatprep.subr.mxu0 %v1015_v36  ;;  %v979_v25 = vld [vmem:[#allocation5 + $0x1a98] sm:$0xff]  ;;  %v978_v27 = vld [vmem:[#allocation5 + $0x1a90] sm:$0xff] }
 0x2cd   :  { %3335 = vmatprep.subr.mxu1 %v1143_v38  ;;  %3265 = vmatpush2.msra.mxu0 %v1014_v40  ;;  %v1107_v26 = vld [vmem:[#allocation5 + $0x1e98] sm:$0xff]  ;;  %v1106_v7 = vld [vmem:[#allocation5 + $0x1e90] sm:$0xff] }
 0x2ce   :  { %3336 = vmatpush2.msra.mxu1 %v1142_v43  ;;  %3266 = vmatprep.subr.mxu0 %v1011_v45  ;;  %v975_v28 = vld [vmem:[#allocation5 + $0x1a78] sm:$0xff]  ;;  %v974_v29 = vld [vmem:[#allocation5 + $0x1a70] sm:$0xff] }
 0x2cf   :  { %3337 = vmatprep.subr.mxu1 %v1139_v37  ;;  %3267 = vmatpush2.msra.mxu0 %v1010_v46  ;;  %v1103_v9 = vld [vmem:[#allocation5 + $0x1e78] sm:$0xff]  ;;  %v1102_v11 = vld [vmem:[#allocation5 + $0x1e70] sm:$0xff] }
 0x2d0   :  { %3338 = vmatpush2.msra.mxu1 %v1138_v39  ;;  %3268 = vmatprep.subr.mxu0 %v1007_v13  ;;  %v971_v30 = vld [vmem:[#allocation5 + $0x1a58] sm:$0xff]  ;;  %v970_v14 = vld [vmem:[#allocation5 + $0x1a50] sm:$0xff] }
 0x2d1   :  { %3339 = vmatprep.subr.mxu1 %v1135_v41  ;;  %3269 = vmatpush2.msra.mxu0 %v1006_v47  ;;  %v1099_v31 = vld [vmem:[#allocation5 + $0x1e58] sm:$0xff]  ;;  %v1098_v32 = vld [vmem:[#allocation5 + $0x1e50] sm:$0xff] }
 0x2d2   :  { %3340 = vmatpush2.msra.mxu1 %v1134_v15  ;;  %3270 = vmatprep.subr.mxu0 %v1003_v44  ;;  %v967_v33 = vld [vmem:[#allocation5 + $0x1a38] sm:$0xff]  ;;  %v966_v35 = vld [vmem:[#allocation5 + $0x1a30] sm:$0xff] }
 0x2d3   :  { %3341 = vmatprep.subr.mxu1 %v1131_v48  ;;  %3271 = vmatpush2.msra.mxu0 %v1002_v17  ;;  %v1095_v34 = vld [vmem:[#allocation5 + $0x1e38] sm:$0xff]  ;;  %v1094_v36 = vld [vmem:[#allocation5 + $0x1e30] sm:$0xff] }
 0x2d4   :  { %3342 = vmatpush2.msra.mxu1 %v1130_v49  ;;  %3272 = vmatprep.subr.mxu0 %v999_v50  ;;  %v963_v38 = vld [vmem:[#allocation5 + $0x1a18] sm:$0xff]  ;;  %v962_v43 = vld [vmem:[#allocation5 + $0x1a10] sm:$0xff] }
 0x2d5   :  { %3343 = vmatprep.subr.mxu1 %v1127_v19  ;;  %3273 = vmatpush2.msra.mxu0 %v998_v51  ;;  %v1091_v40 = vld [vmem:[#allocation5 + $0x1e18] sm:$0xff]  ;;  %v1090_v45 = vld [vmem:[#allocation5 + $0x1e10] sm:$0xff] }
 0x2d6   :  { %3344 = vmatpush2.msra.mxu1 %v1126_v52  ;;  %3274 = vmatprep.subr.mxu0 %v995_v53  ;;  %v1215_v37 = vld [vmem:[#allocation5 + $0x21f8] sm:$0xff]  ;;  %v1214_v39 = vld [vmem:[#allocation5 + $0x21f0] sm:$0xff] }
 0x2d7   :  { %3345 = vmatprep.subr.mxu1 %v1123_v56  ;;  %3275 = vmatpush2.msra.mxu0 %v994_v60  ;;  %v1343_v46 = vld [vmem:[#allocation5 + $0x25f8] sm:$0xff]  ;;  %v1342_v13 = vld [vmem:[#allocation5 + $0x25f0] sm:$0xff] }
 0x2d8   :  { %3346 = vmatpush2.msra.mxu1 %v1122_v0  ;;  %3276 = vmatprep.subr.mxu0 %v991_v2  ;;  %v1211_v41 = vld [vmem:[#allocation5 + $0x21d8] sm:$0xff]  ;;  %v1210_v15 = vld [vmem:[#allocation5 + $0x21d0] sm:$0xff] }
 0x2d9   :  { %3347 = vmatprep.subr.mxu1 %v1119_v3  ;;  %3277 = vmatpush2.msra.mxu0 %v990_v4  ;;  %v1339_v47 = vld [vmem:[#allocation5 + $0x25d8] sm:$0xff]  ;;  %v1338_v44 = vld [vmem:[#allocation5 + $0x25d0] sm:$0xff] }
 0x2da   :  { %3348 = vmatpush2.msra.mxu1 %v1118_v5  ;;  %3278 = vmatprep.subr.mxu0 %v987_v6  ;;  %v1207_v48 = vld [vmem:[#allocation5 + $0x21b8] sm:$0xff]  ;;  %v1206_v17 = vld [vmem:[#allocation5 + $0x21b0] sm:$0xff] }
 0x2db   :  { %3349 = vmatprep.subr.mxu1 %v1115_v8  ;;  %3279 = vmatpush2.msra.mxu0 %v986_v10  ;;  %v1203_v49 = vld [vmem:[#allocation5 + $0x2198] sm:$0xff]  ;;  %v1202_v50 = vld [vmem:[#allocation5 + $0x2190] sm:$0xff] }
 0x2dc   :  { %3350 = vmatpush2.msra.mxu1 %v1114_v16  ;;  %3280 = vmatprep.subr.mxu0 %v983_v20  ;;  %v1330_v19 = vld [vmem:[#allocation5 + $0x2590] sm:$0xff]  ;;  %v1327_v51 = vld [vmem:[#allocation5 + $0x2578] sm:$0xff] }
 0x2dd   :  { %3351 = vmatprep.subr.mxu1 %v1111_v54  ;;  %3281 = vmatpush2.msra.mxu0 %v982_v23  ;;  %v1198_v52 = vld [vmem:[#allocation5 + $0x2170] sm:$0xff]  ;;  %v1195_v56 = vld [vmem:[#allocation5 + $0x2158] sm:$0xff] }
 0x2de   :  { %3352 = vmatpush2.msra.mxu1 %v1110_v24  ;;  %3282 = vmatprep.subr.mxu0 %v979_v25  ;;  %v1326_v53 = vld [vmem:[#allocation5 + $0x2570] sm:$0xff]  ;;  %v1323_v60 = vld [vmem:[#allocation5 + $0x2558] sm:$0xff] }
 0x2df   :  { %3353 = vmatprep.subr.mxu1 %v1107_v26  ;;  %3283 = vmatpush2.msra.mxu0 %v978_v27  ;;  %v1194_v0 = vld [vmem:[#allocation5 + $0x2150] sm:$0xff]  ;;  %v1191_v3 = vld [vmem:[#allocation5 + $0x2138] sm:$0xff] }
 0x2e0   :  { %3354 = vmatpush2.msra.mxu1 %v1106_v7  ;;  %3284 = vmatprep.subr.mxu0 %v975_v28  ;;  %v1322_v2 = vld [vmem:[#allocation5 + $0x2550] sm:$0xff]  ;;  %v1319_v4 = vld [vmem:[#allocation5 + $0x2538] sm:$0xff] }
 0x2e1   :  { %3355 = vmatprep.subr.mxu1 %v1103_v9  ;;  %3285 = vmatpush2.msra.mxu0 %v974_v29  ;;  %v1190_v5 = vld [vmem:[#allocation5 + $0x2130] sm:$0xff]  ;;  %v1187_v8 = vld [vmem:[#allocation5 + $0x2118] sm:$0xff] }
 0x2e2   :  { %3356 = vmatpush2.msra.mxu1 %v1102_v11  ;;  %3286 = vmatprep.subr.mxu0 %v971_v30  ;;  %v1318_v6 = vld [vmem:[#allocation5 + $0x2530] sm:$0xff]  ;;  %v1315_v10 = vld [vmem:[#allocation5 + $0x2518] sm:$0xff] }
 0x2e3   :  { %3357 = vmatprep.subr.mxu1 %v1099_v31  ;;  %3287 = vmatpush2.msra.mxu0 %v970_v14  ;;  %v1186_v16 = vld [vmem:[#allocation5 + $0x2110] sm:$0xff]  ;;  %v1183_v54 = vld [vmem:[#allocation5 + $0x20f8] sm:$0xff] }
 0x2e4   :  { %3358 = vmatpush2.msra.mxu1 %v1098_v32  ;;  %3288 = vmatprep.subr.mxu0 %v967_v33  ;;  %v1314_v20 = vld [vmem:[#allocation5 + $0x2510] sm:$0xff]  ;;  %v1311_v23 = vld [vmem:[#allocation5 + $0x24f8] sm:$0xff] }
 0x2e5   :  { %3359 = vmatprep.subr.mxu1 %v1095_v34  ;;  %3289 = vmatpush2.msra.mxu0 %v966_v35  ;;  %v1182_v24 = vld [vmem:[#allocation5 + $0x20f0] sm:$0xff]  ;;  %v1179_v26 = vld [vmem:[#allocation5 + $0x20d8] sm:$0xff] }
 0x2e6   :  { %3360 = vmatpush2.msra.mxu1 %v1094_v36  ;;  %3290 = vmatprep.subr.mxu0 %v963_v38  ;;  %v1310_v25 = vld [vmem:[#allocation5 + $0x24f0] sm:$0xff]  ;;  %v1307_v27 = vld [vmem:[#allocation5 + $0x24d8] sm:$0xff] }
 0x2e7   :  { %3361 = vmatprep.subr.mxu1 %v1091_v40  ;;  %3291 = vmatpush2.msra.mxu0 %v962_v43  ;;  %v1178_v7 = vld [vmem:[#allocation5 + $0x20d0] sm:$0xff]  ;;  %v1175_v9 = vld [vmem:[#allocation5 + $0x20b8] sm:$0xff] }
 0x2e8   :  { %3292 = vmatprep.mubr.f32.mxu0 %v4327_v57  ;;  %3362 = vmatpush2.msra.mxu1 %v1090_v45  ;;  %v1335_v57 = vld [vmem:[#allocation5 + $0x25b8] sm:$0xff]  ;;  %v1306_v28 = vld [vmem:[#allocation5 + $0x24d0] sm:$0xff] }
 0x2e9   :  { %3293 = vmatmul.mubr.f32.vlgmr.msra.gmra.mxu0 %v4329_v59  ;;  %3363 = vmatprep.mubr.f32.mxu1 %v4331_v61  ;;  %v1334_v59 = vld [vmem:[#allocation5 + $0x25b0] sm:$0xff]  ;;  %v1331_v61 = vld [vmem:[#allocation5 + $0x2598] sm:$0xff] }
 0x2ea   :  { %3370 = vmatprep.subr.mxu0 %v1215_v37  ;;  %3441 = vmatprep.subr.mxu1 %v1343_v46  ;;  %v1303_v29 = vld [vmem:[#allocation5 + $0x24b8] sm:$0xff]  ;;  %v1174_v11 = vld [vmem:[#allocation5 + $0x20b0] sm:$0xff] }
 0x2eb   :  { %3364 = vmatmul.mubr.f32.vlgmr.msra.gmra.mxu1 %v4333_v63  ;;  %3371 = vmatpush1.msra.mxu0 %v1214_v39  ;;  %v1199_v63 = vld [vmem:[#allocation5 + $0x2178] sm:$0xff]  ;;  %v1302_v30 = vld [vmem:[#allocation5 + $0x24b0] sm:$0xff] }
 0x2ec   :  { %3442 = vmatpush1.msra.mxu1 %v1342_v13  ;;  %3372 = vmatprep.subr.mxu0 %v1211_v41  ;;  %v1171_v31 = vld [vmem:[#allocation5 + $0x2098] sm:$0xff]  ;;  %v1170_v32 = vld [vmem:[#allocation5 + $0x2090] sm:$0xff] }
 0x2ed   :  { %3443 = vmatprep.subr.mxu1 %v1339_v47  ;;  %3373 = vmatpush1.msra.mxu0 %v1210_v15  ;;  %v1299_v14 = vld [vmem:[#allocation5 + $0x2498] sm:$0xff]  ;;  %v1298_v33 = vld [vmem:[#allocation5 + $0x2490] sm:$0xff] }
 0x2ee   :  { %3444 = vmatpush1.msra.mxu1 %v1338_v44  ;;  %3374 = vmatprep.subr.mxu0 %v1207_v48  ;;  %v1167_v34 = vld [vmem:[#allocation5 + $0x2078] sm:$0xff]  ;;  %v1166_v36 = vld [vmem:[#allocation5 + $0x2070] sm:$0xff] }
 0x2ef   :  { %3445 = vmatprep.subr.mxu1 %v1335_v57  ;;  %3375 = vmatpush1.msra.mxu0 %v1206_v17  ;;  %v1295_v35 = vld [vmem:[#allocation5 + $0x2478] sm:$0xff]  ;;  %v1294_v38 = vld [vmem:[#allocation5 + $0x2470] sm:$0xff] }
 0x2f0   :  { %3446 = vmatpush1.msra.mxu1 %v1334_v59  ;;  %3376 = vmatprep.subr.mxu0 %v1203_v49  ;;  %v1163_v40 = vld [vmem:[#allocation5 + $0x2058] sm:$0xff]  ;;  %v1162_v45 = vld [vmem:[#allocation5 + $0x2050] sm:$0xff] }
 0x2f1   :  { %3447 = vmatprep.subr.mxu1 %v1331_v61  ;;  %3377 = vmatpush1.msra.mxu0 %v1202_v50  ;;  %v1291_v43 = vld [vmem:[#allocation5 + $0x2458] sm:$0xff]  ;;  %v1290_v37 = vld [vmem:[#allocation5 + $0x2450] sm:$0xff] }
 0x2f2   :  { %3448 = vmatpush1.msra.mxu1 %v1330_v19  ;;  %3378 = vmatprep.subr.mxu0 %v1199_v63  ;;  %v1159_v46 = vld [vmem:[#allocation5 + $0x2038] sm:$0xff]  ;;  %v1158_v13 = vld [vmem:[#allocation5 + $0x2030] sm:$0xff] }
 0x2f3   :  { %3449 = vmatprep.subr.mxu1 %v1327_v51  ;;  %3379 = vmatpush1.msra.mxu0 %v1198_v52  ;;  %v1287_v39 = vld [vmem:[#allocation5 + $0x2438] sm:$0xff]  ;;  %v1286_v41 = vld [vmem:[#allocation5 + $0x2430] sm:$0xff] }
 0x2f4   :  { %3450 = vmatpush1.msra.mxu1 %v1326_v53  ;;  %3380 = vmatprep.subr.mxu0 %v1195_v56  ;;  %v1155_v47 = vld [vmem:[#allocation5 + $0x2018] sm:$0xff]  ;;  %v1154_v44 = vld [vmem:[#allocation5 + $0x2010] sm:$0xff] }
 0x2f5   :  { %3451 = vmatprep.subr.mxu1 %v1323_v60  ;;  %3381 = vmatpush1.msra.mxu0 %v1194_v0  ;;  %v1283_v15 = vld [vmem:[#allocation5 + $0x2418] sm:$0xff]  ;;  %v1282_v48 = vld [vmem:[#allocation5 + $0x2410] sm:$0xff] }
 0x2f6   :  { %3452 = vmatpush1.msra.mxu1 %v1322_v2  ;;  %3382 = vmatprep.subr.mxu0 %v1191_v3  ;;  %v1279_v57 = vld [vmem:[#allocation5 + $0x23f8] sm:$0xff]  ;;  %v1278_v59 = vld [vmem:[#allocation5 + $0x23f0] sm:$0xff] }
 0x2f7   :  { %3453 = vmatprep.subr.mxu1 %v1319_v4  ;;  %3383 = vmatpush1.msra.mxu0 %v1190_v5  ;;  %v1407_v17 = vld [vmem:[#allocation5 + $0x27f8] sm:$0xff]  ;;  %v1406_v49 = vld [vmem:[#allocation5 + $0x27f0] sm:$0xff] }
 0x2f8   :  { %3454 = vmatpush1.msra.mxu1 %v1318_v6  ;;  %3384 = vmatprep.subr.mxu0 %v1187_v8  ;;  %v1275_v61 = vld [vmem:[#allocation5 + $0x23d8] sm:$0xff]  ;;  %v1274_v19 = vld [vmem:[#allocation5 + $0x23d0] sm:$0xff] }
 0x2f9   :  { %3455 = vmatprep.subr.mxu1 %v1315_v10  ;;  %3385 = vmatpush1.msra.mxu0 %v1186_v16  ;;  %v1403_v50 = vld [vmem:[#allocation5 + $0x27d8] sm:$0xff]  ;;  %v1402_v63 = vld [vmem:[#allocation5 + $0x27d0] sm:$0xff] }
 0x2fa   :  { %3456 = vmatpush1.msra.mxu1 %v1314_v20  ;;  %3386 = vmatprep.subr.mxu0 %v1183_v54  ;;  %v1271_v51 = vld [vmem:[#allocation5 + $0x23b8] sm:$0xff]  ;;  %v1270_v53 = vld [vmem:[#allocation5 + $0x23b0] sm:$0xff] }
 0x2fb   :  { %3457 = vmatprep.subr.mxu1 %v1311_v23  ;;  %3387 = vmatpush1.msra.mxu0 %v1182_v24  ;;  %v1399_v52 = vld [vmem:[#allocation5 + $0x27b8] sm:$0xff]  ;;  %v1398_v56 = vld [vmem:[#allocation5 + $0x27b0] sm:$0xff] }
 0x2fc   :  { %3458 = vmatpush1.msra.mxu1 %v1310_v25  ;;  %3388 = vmatprep.subr.mxu0 %v1179_v26  ;;  %v1267_v60 = vld [vmem:[#allocation5 + $0x2398] sm:$0xff]  ;;  %v1266_v2 = vld [vmem:[#allocation5 + $0x2390] sm:$0xff] }
 0x2fd   :  { %3459 = vmatprep.subr.mxu1 %v1307_v27  ;;  %3389 = vmatpush1.msra.mxu0 %v1178_v7  ;;  %v1395_v0 = vld [vmem:[#allocation5 + $0x2798] sm:$0xff]  ;;  %v1394_v3 = vld [vmem:[#allocation5 + $0x2790] sm:$0xff] }
 0x2fe   :  { %3460 = vmatpush1.msra.mxu1 %v1306_v28  ;;  %3390 = vmatprep.subr.mxu0 %v1175_v9  ;;  %v1263_v4 = vld [vmem:[#allocation5 + $0x2378] sm:$0xff]  ;;  %v1262_v6 = vld [vmem:[#allocation5 + $0x2370] sm:$0xff] }
 0x2ff   :  { %3461 = vmatprep.subr.mxu1 %v1303_v29  ;;  %3391 = vmatpush1.msra.mxu0 %v1174_v11  ;;  %v1391_v5 = vld [vmem:[#allocation5 + $0x2778] sm:$0xff]  ;;  %v1390_v8 = vld [vmem:[#allocation5 + $0x2770] sm:$0xff] }
 0x300   :  { %3462 = vmatpush1.msra.mxu1 %v1302_v30  ;;  %3392 = vmatprep.subr.mxu0 %v1171_v31  ;;  %v1259_v10 = vld [vmem:[#allocation5 + $0x2358] sm:$0xff]  ;;  %v1258_v20 = vld [vmem:[#allocation5 + $0x2350] sm:$0xff] }
 0x301   :  { %3463 = vmatprep.subr.mxu1 %v1299_v14  ;;  %3393 = vmatpush1.msra.mxu0 %v1170_v32  ;;  %v1387_v16 = vld [vmem:[#allocation5 + $0x2758] sm:$0xff]  ;;  %v1386_v54 = vld [vmem:[#allocation5 + $0x2750] sm:$0xff] }
 0x302   :  { %3464 = vmatpush1.msra.mxu1 %v1298_v33  ;;  %3394 = vmatprep.subr.mxu0 %v1167_v34  ;;  %v1255_v23 = vld [vmem:[#allocation5 + $0x2338] sm:$0xff]  ;;  %v1254_v25 = vld [vmem:[#allocation5 + $0x2330] sm:$0xff] }
 0x303   :  { %3465 = vmatprep.subr.mxu1 %v1295_v35  ;;  %3395 = vmatpush1.msra.mxu0 %v1166_v36  ;;  %v1383_v24 = vld [vmem:[#allocation5 + $0x2738] sm:$0xff]  ;;  %v1382_v26 = vld [vmem:[#allocation5 + $0x2730] sm:$0xff] }
 0x304   :  { %3466 = vmatpush1.msra.mxu1 %v1294_v38  ;;  %3396 = vmatprep.subr.mxu0 %v1163_v40  ;;  %v1251_v27 = vld [vmem:[#allocation5 + $0x2318] sm:$0xff]  ;;  %v1250_v28 = vld [vmem:[#allocation5 + $0x2310] sm:$0xff] }
 0x305   :  { %3467 = vmatprep.subr.mxu1 %v1291_v43  ;;  %3397 = vmatpush1.msra.mxu0 %v1162_v45  ;;  %v1379_v7 = vld [vmem:[#allocation5 + $0x2718] sm:$0xff]  ;;  %v1378_v9 = vld [vmem:[#allocation5 + $0x2710] sm:$0xff] }
 0x306   :  { %3468 = vmatpush1.msra.mxu1 %v1290_v37  ;;  %3398 = vmatprep.subr.mxu0 %v1159_v46  ;;  %v1247_v29 = vld [vmem:[#allocation5 + $0x22f8] sm:$0xff]  ;;  %v1246_v30 = vld [vmem:[#allocation5 + $0x22f0] sm:$0xff] }
 0x307   :  { %3469 = vmatprep.subr.mxu1 %v1287_v39  ;;  %3399 = vmatpush1.msra.mxu0 %v1158_v13  ;;  %v1375_v11 = vld [vmem:[#allocation5 + $0x26f8] sm:$0xff]  ;;  %v1374_v31 = vld [vmem:[#allocation5 + $0x26f0] sm:$0xff] }
 0x308   :  { %3470 = vmatpush1.msra.mxu1 %v1286_v41  ;;  %3400 = vmatprep.subr.mxu0 %v1155_v47  ;;  %v1243_v14 = vld [vmem:[#allocation5 + $0x22d8] sm:$0xff]  ;;  %v1242_v33 = vld [vmem:[#allocation5 + $0x22d0] sm:$0xff] }
 0x309   :  { %3471 = vmatprep.subr.mxu1 %v1283_v15  ;;  %3401 = vmatpush1.msra.mxu0 %v1154_v44  ;;  %v1371_v32 = vld [vmem:[#allocation5 + $0x26d8] sm:$0xff]  ;;  %v1370_v34 = vld [vmem:[#allocation5 + $0x26d0] sm:$0xff] }
 0x30a   :  { %3472 = vmatpush1.msra.mxu1 %v1282_v48  ;;  %3402 = vmatprep.subr.mxu0 %v1279_v57  ;;  %v1239_v35 = vld [vmem:[#allocation5 + $0x22b8] sm:$0xff]  ;;  %v1238_v38 = vld [vmem:[#allocation5 + $0x22b0] sm:$0xff] }
 0x30b   :  { %3473 = vmatprep.subr.mxu1 %v1407_v17  ;;  %3403 = vmatpush2.msra.mxu0 %v1278_v59  ;;  %v1367_v36 = vld [vmem:[#allocation5 + $0x26b8] sm:$0xff]  ;;  %v1366_v40 = vld [vmem:[#allocation5 + $0x26b0] sm:$0xff] }
 0x30c   :  { %3474 = vmatpush2.msra.mxu1 %v1406_v49  ;;  %3404 = vmatprep.subr.mxu0 %v1275_v61  ;;  %v1235_v43 = vld [vmem:[#allocation5 + $0x2298] sm:$0xff]  ;;  %v1234_v37 = vld [vmem:[#allocation5 + $0x2290] sm:$0xff] }
 0x30d   :  { %3475 = vmatprep.subr.mxu1 %v1403_v50  ;;  %3405 = vmatpush2.msra.mxu0 %v1274_v19  ;;  %v1363_v45 = vld [vmem:[#allocation5 + $0x2698] sm:$0xff]  ;;  %v1362_v46 = vld [vmem:[#allocation5 + $0x2690] sm:$0xff] }
 0x30e   :  { %3476 = vmatpush2.msra.mxu1 %v1402_v63  ;;  %3406 = vmatprep.subr.mxu0 %v1271_v51  ;;  %v1231_v39 = vld [vmem:[#allocation5 + $0x2278] sm:$0xff]  ;;  %v1230_v41 = vld [vmem:[#allocation5 + $0x2270] sm:$0xff] }
 0x30f   :  { %3477 = vmatprep.subr.mxu1 %v1399_v52  ;;  %3407 = vmatpush2.msra.mxu0 %v1270_v53  ;;  %v1359_v13 = vld [vmem:[#allocation5 + $0x2678] sm:$0xff]  ;;  %v1358_v47 = vld [vmem:[#allocation5 + $0x2670] sm:$0xff] }
 0x310   :  { %3478 = vmatpush2.msra.mxu1 %v1398_v56  ;;  %3408 = vmatprep.subr.mxu0 %v1267_v60  ;;  %v1227_v15 = vld [vmem:[#allocation5 + $0x2258] sm:$0xff]  ;;  %v1226_v48 = vld [vmem:[#allocation5 + $0x2250] sm:$0xff] }
 0x311   :  { %3479 = vmatprep.subr.mxu1 %v1395_v0  ;;  %3409 = vmatpush2.msra.mxu0 %v1266_v2  ;;  %v1355_v44 = vld [vmem:[#allocation5 + $0x2658] sm:$0xff]  ;;  %v1354_v57 = vld [vmem:[#allocation5 + $0x2650] sm:$0xff] }
 0x312   :  { %3480 = vmatpush2.msra.mxu1 %v1394_v3  ;;  %3410 = vmatprep.subr.mxu0 %v1263_v4  ;;  %v1223_v17 = vld [vmem:[#allocation5 + $0x2238] sm:$0xff]  ;;  %v1222_v49 = vld [vmem:[#allocation5 + $0x2230] sm:$0xff] }
 0x313   :  { %3481 = vmatprep.subr.mxu1 %v1391_v5  ;;  %3411 = vmatpush2.msra.mxu0 %v1262_v6  ;;  %v1351_v59 = vld [vmem:[#allocation5 + $0x2638] sm:$0xff]  ;;  %v1350_v61 = vld [vmem:[#allocation5 + $0x2630] sm:$0xff] }
 0x314   :  { %3482 = vmatpush2.msra.mxu1 %v1390_v8  ;;  %3412 = vmatprep.subr.mxu0 %v1259_v10  ;;  %v1219_v50 = vld [vmem:[#allocation5 + $0x2218] sm:$0xff]  ;;  %v1218_v63 = vld [vmem:[#allocation5 + $0x2210] sm:$0xff] }
 0x315   :  { %3483 = vmatprep.subr.mxu1 %v1387_v16  ;;  %3413 = vmatpush2.msra.mxu0 %v1258_v20  ;;  %v1347_v19 = vld [vmem:[#allocation5 + $0x2618] sm:$0xff]  ;;  %v1346_v51 = vld [vmem:[#allocation5 + $0x2610] sm:$0xff] }
 0x316   :  { %3484 = vmatpush2.msra.mxu1 %v1386_v54  ;;  %3414 = vmatprep.subr.mxu0 %v1255_v23  ;;  %v1471_v52 = vld [vmem:[#allocation5 + $0x29f8] sm:$0xff]  ;;  %v1470_v56 = vld [vmem:[#allocation5 + $0x29f0] sm:$0xff] }
 0x317   :  { %3485 = vmatprep.subr.mxu1 %v1383_v24  ;;  %3415 = vmatpush2.msra.mxu0 %v1254_v25  ;;  %v1599_v53 = vld [vmem:[#allocation5 + $0x2df8] sm:$0xff]  ;;  %v1598_v60 = vld [vmem:[#allocation5 + $0x2df0] sm:$0xff] }
 0x318   :  { %3486 = vmatpush2.msra.mxu1 %v1382_v26  ;;  %3416 = vmatprep.subr.mxu0 %v1251_v27  ;;  %v1467_v0 = vld [vmem:[#allocation5 + $0x29d8] sm:$0xff]  ;;  %v1466_v3 = vld [vmem:[#allocation5 + $0x29d0] sm:$0xff] }
 0x319   :  { %3487 = vmatprep.subr.mxu1 %v1379_v7  ;;  %3417 = vmatpush2.msra.mxu0 %v1250_v28  ;;  %v1595_v2 = vld [vmem:[#allocation5 + $0x2dd8] sm:$0xff]  ;;  %v1594_v4 = vld [vmem:[#allocation5 + $0x2dd0] sm:$0xff] }
 0x31a   :  { %3488 = vmatpush2.msra.mxu1 %v1378_v9  ;;  %3418 = vmatprep.subr.mxu0 %v1247_v29  ;;  %v1463_v5 = vld [vmem:[#allocation5 + $0x29b8] sm:$0xff]  ;;  %v1462_v6 = vld [vmem:[#allocation5 + $0x29b0] sm:$0xff] }
 0x31b   :  { %3489 = vmatprep.subr.mxu1 %v1375_v11  ;;  %3419 = vmatpush2.msra.mxu0 %v1246_v30  ;;  %v1459_v8 = vld [vmem:[#allocation5 + $0x2998] sm:$0xff]  ;;  %v1458_v10 = vld [vmem:[#allocation5 + $0x2990] sm:$0xff] }
 0x31c   :  { %3490 = vmatpush2.msra.mxu1 %v1374_v31  ;;  %3420 = vmatprep.subr.mxu0 %v1243_v14  ;;  %v1586_v16 = vld [vmem:[#allocation5 + $0x2d90] sm:$0xff]  ;;  %v1583_v20 = vld [vmem:[#allocation5 + $0x2d78] sm:$0xff] }
 0x31d   :  { %3491 = vmatprep.subr.mxu1 %v1371_v32  ;;  %3421 = vmatpush2.msra.mxu0 %v1242_v33  ;;  %v1454_v54 = vld [vmem:[#allocation5 + $0x2970] sm:$0xff]  ;;  %v1451_v24 = vld [vmem:[#allocation5 + $0x2958] sm:$0xff] }
 0x31e   :  { %3492 = vmatpush2.msra.mxu1 %v1370_v34  ;;  %3422 = vmatprep.subr.mxu0 %v1239_v35  ;;  %v1582_v23 = vld [vmem:[#allocation5 + $0x2d70] sm:$0xff]  ;;  %v1579_v25 = vld [vmem:[#allocation5 + $0x2d58] sm:$0xff] }
 0x31f   :  { %3493 = vmatprep.subr.mxu1 %v1367_v36  ;;  %3423 = vmatpush2.msra.mxu0 %v1238_v38  ;;  %v1450_v26 = vld [vmem:[#allocation5 + $0x2950] sm:$0xff]  ;;  %v1447_v7 = vld [vmem:[#allocation5 + $0x2938] sm:$0xff] }
 0x320   :  { %3494 = vmatpush2.msra.mxu1 %v1366_v40  ;;  %3424 = vmatprep.subr.mxu0 %v1235_v43  ;;  %v1578_v27 = vld [vmem:[#allocation5 + $0x2d50] sm:$0xff]  ;;  %v1575_v28 = vld [vmem:[#allocation5 + $0x2d38] sm:$0xff] }
 0x321   :  { %3495 = vmatprep.subr.mxu1 %v1363_v45  ;;  %3425 = vmatpush2.msra.mxu0 %v1234_v37  ;;  %v1446_v9 = vld [vmem:[#allocation5 + $0x2930] sm:$0xff]  ;;  %v1443_v11 = vld [vmem:[#allocation5 + $0x2918] sm:$0xff] }
 0x322   :  { %3496 = vmatpush2.msra.mxu1 %v1362_v46  ;;  %3426 = vmatprep.subr.mxu0 %v1231_v39  ;;  %v1574_v29 = vld [vmem:[#allocation5 + $0x2d30] sm:$0xff]  ;;  %v1571_v30 = vld [vmem:[#allocation5 + $0x2d18] sm:$0xff]  ;;  %v1672_v46 = vsub.s32 1, %v4270_v42 }
 0x323   :  { %3497 = vmatprep.subr.mxu1 %v1359_v13  ;;  %3427 = vmatpush2.msra.mxu0 %v1230_v41  ;;  %v1442_v31 = vld [vmem:[#allocation5 + $0x2910] sm:$0xff]  ;;  %v1439_v32 = vld [vmem:[#allocation5 + $0x28f8] sm:$0xff]  ;;  %v4392_v41 = vld [vmem:[#allocation7] sm:$0xf] }
 0x324   :  { %3498 = vmatpush2.msra.mxu1 %v1358_v47  ;;  %3428 = vmatprep.subr.mxu0 %v1227_v15  ;;  %v1570_v14 = vld [vmem:[#allocation5 + $0x2d10] sm:$0xff]  ;;  %v1567_v33 = vld [vmem:[#allocation5 + $0x2cf8] sm:$0xff]  ;;  %v4394_v47 = vpop.f32.mrf.mxu0 }
 0x325   :  { %3499 = vmatprep.subr.mxu1 %v1355_v44  ;;  %3429 = vmatpush2.msra.mxu0 %v1226_v48  ;;  %v1438_v34 = vld [vmem:[#allocation5 + $0x28f0] sm:$0xff]  ;;  %v1435_v36 = vld [vmem:[#allocation5 + $0x28d8] sm:$0xff] }
 0x326   :  { %3500 = vmatpush2.msra.mxu1 %v1354_v57  ;;  %3430 = vmatprep.subr.mxu0 %v1223_v17  ;;  %v1566_v35 = vld [vmem:[#allocation5 + $0x2cf0] sm:$0xff]  ;;  %v1563_v38 = vld [vmem:[#allocation5 + $0x2cd8] sm:$0xff] }
 0x327   :  { %3501 = vmatprep.subr.mxu1 %v1351_v59  ;;  %3431 = vmatpush2.msra.mxu0 %v1222_v49  ;;  %v1434_v40 = vld [vmem:[#allocation5 + $0x28d0] sm:$0xff]  ;;  %v1431_v45 = vld [vmem:[#allocation5 + $0x28b8] sm:$0xff]  ;;  %v1673_v49 = vrot.slane %v4392_v41, %v1672_v46 }
 0x328   :  { %3502 = vmatpush2.msra.mxu1 %v1350_v61  ;;  %3432 = vmatprep.subr.mxu0 %v1219_v50  ;;  %v1562_v43 = vld [vmem:[#allocation5 + $0x2cd0] sm:$0xff]  ;;  %v1559_v37 = vld [vmem:[#allocation5 + $0x2cb8] sm:$0xff] }
 0x329   :  { %3503 = vmatprep.subr.mxu1 %v1347_v19  ;;  %3433 = vmatpush2.msra.mxu0 %v1218_v63  ;;  %v1430_v39 = vld [vmem:[#allocation5 + $0x28b0] sm:$0xff]  ;;  %v1427_v15 = vld [vmem:[#allocation5 + $0x2898] sm:$0xff]  ;;  %v4397_v19 = vpop.f32.mrf.mxu1  ;;  %v2018_v63 = vpop.f32.mrf.mxu0 }
 0x32a   :  { %3434 = vmatprep.mubr.f32.mxu0 %v4343_v55  ;;  %3504 = vmatpush2.msra.mxu1 %v1346_v51  ;;  %v1591_v55 = vld [vmem:[#allocation5 + $0x2db8] sm:$0xff]  ;;  %v1558_v13 = vld [vmem:[#allocation5 + $0x2cb0] sm:$0xff] }
 0x32b   :  { %3435 = vmatmul.mubr.f32.vlgmr.msra.gmra.mxu0 %v4345_v58  ;;  %3505 = vmatprep.mubr.f32.mxu1 %v4347_v62  ;;  %v1590_v58 = vld [vmem:[#allocation5 + $0x2db0] sm:$0xff]  ;;  %v1587_v62 = vld [vmem:[#allocation5 + $0x2d98] sm:$0xff] }
 0x32c   :  { %3512 = vmatprep.subr.mxu0 %v1471_v52  ;;  %3583 = vmatprep.subr.mxu1 %v1599_v53  ;;  %v1555_v44 = vld [vmem:[#allocation5 + $0x2c98] sm:$0xff]  ;;  %v1426_v48 = vld [vmem:[#allocation5 + $0x2890] sm:$0xff] }
 0x32d   :  { %3506 = vmatmul.mubr.f32.vlgmr.msra.gmra.mxu1 %v4349_v1  ;;  %3513 = vmatpush1.msra.mxu0 %v1470_v56  ;;  %v1455_v1 = vld [vmem:[#allocation5 + $0x2978] sm:$0xff]  ;;  %v1554_v57 = vld [vmem:[#allocation5 + $0x2c90] sm:$0xff] }
 0x32e   :  { %3584 = vmatpush1.msra.mxu1 %v1598_v60  ;;  %3514 = vmatprep.subr.mxu0 %v1467_v0  ;;  %v1423_v17 = vld [vmem:[#allocation5 + $0x2878] sm:$0xff]  ;;  %v1422_v61 = vld [vmem:[#allocation5 + $0x2870] sm:$0xff]  ;;  %v4399_v60 = vpop.f32.mrf.mxu0 }
 0x32f   :  { %3585 = vmatprep.subr.mxu1 %v1595_v2  ;;  %3515 = vmatpush1.msra.mxu0 %v1466_v3  ;;  %v1551_v59 = vld [vmem:[#allocation5 + $0x2c78] sm:$0xff]  ;;  %v1550_v50 = vld [vmem:[#allocation5 + $0x2c70] sm:$0xff]  ;;  %v2019_v3 = vadd.f32 %v2018_v63, %v1673_v49 }
 0x330   :  { %3586 = vmatpush1.msra.mxu1 %v1594_v4  ;;  %3516 = vmatprep.subr.mxu0 %v1463_v5  ;;  %v1419_v51 = vld [vmem:[#allocation5 + $0x2858] sm:$0xff]  ;;  %v1418_v53 = vld [vmem:[#allocation5 + $0x2850] sm:$0xff] }
 0x331   :  { %3587 = vmatprep.subr.mxu1 %v1591_v55  ;;  %3517 = vmatpush1.msra.mxu0 %v1462_v6  ;;  %v1547_v52 = vld [vmem:[#allocation5 + $0x2c58] sm:$0xff]  ;;  %v1546_v56 = vld [vmem:[#allocation5 + $0x2c50] sm:$0xff]  ;;  %v2089_v55 = vpop.f32.mrf.mxu1 }
 0x332   :  { %3588 = vmatpush1.msra.mxu1 %v1590_v58  ;;  %3518 = vmatprep.subr.mxu0 %v1459_v8  ;;  %v1415_v0 = vld [vmem:[#allocation5 + $0x2838] sm:$0xff]  ;;  %v1414_v4 = vld [vmem:[#allocation5 + $0x2830] sm:$0xff] }
 0x333   :  { %3589 = vmatprep.subr.mxu1 %v1587_v62  ;;  %3519 = vmatpush1.msra.mxu0 %v1458_v10  ;;  %v1543_v2 = vld [vmem:[#allocation5 + $0x2c38] sm:$0xff]  ;;  %v1542_v5 = vld [vmem:[#allocation5 + $0x2c30] sm:$0xff]  ;;  %v4401_v10 = vpop.f32.mrf.mxu1 }
 0x334   :  { %3590 = vmatpush1.msra.mxu1 %v1586_v16  ;;  %3520 = vmatprep.subr.mxu0 %v1455_v1  ;;  %v1411_v6 = vld [vmem:[#allocation5 + $0x2818] sm:$0xff]  ;;  %v1410_v8 = vld [vmem:[#allocation5 + $0x2810] sm:$0xff]  ;;  %v2160_v16 = vpop.f32.mrf.mxu0 }
 0x335   :  { %3591 = vmatprep.subr.mxu1 %v1583_v20  ;;  %3521 = vmatpush1.msra.mxu0 %v1454_v54  ;;  %v1539_v58 = vld [vmem:[#allocation5 + $0x2c18] sm:$0xff]  ;;  %v1538_v62 = vld [vmem:[#allocation5 + $0x2c10] sm:$0xff]  ;;  %v2090_v54 = vadd.f32 %v2089_v55, %v2019_v3 }
 0x336   :  { %3592 = vmatpush1.msra.mxu1 %v1582_v23  ;;  %3522 = vmatprep.subr.mxu0 %v1451_v24  ;;  %v1535_v1 = vld [vmem:[#allocation5 + $0x2bf8] sm:$0xff]  ;;  %v1534_v23 = vld [vmem:[#allocation5 + $0x2bf0] sm:$0xff] }
 0x337   :  { %3593 = vmatprep.subr.mxu1 %v1579_v25  ;;  %3523 = vmatpush1.msra.mxu0 %v1450_v26  ;;  %v1663_v20 = vld [vmem:[#allocation5 + $0x2ff8] sm:$0xff]  ;;  %v1662_v24 = vld [vmem:[#allocation5 + $0x2ff0] sm:$0xff]  ;;  %v4403_v25 = vpop.f32.mrf.mxu0 }
 0x338   :  { %3594 = vmatpush1.msra.mxu1 %v1578_v27  ;;  %3524 = vmatprep.subr.mxu0 %v1447_v7  ;;  %v1531_v26 = vld [vmem:[#allocation5 + $0x2bd8] sm:$0xff]  ;;  %v2161_v7 = vadd.f32 %v2160_v16, %v2090_v54  ;;  %v1506_v3 = vld [vmem:[#allocation5 + $0x2b10] sm:$0xff] }
 0x339   :  { %3595 = vmatprep.subr.mxu1 %v1575_v28  ;;  %3525 = vmatpush1.msra.mxu0 %v1446_v9  ;;  %v1659_v27 = vld [vmem:[#allocation5 + $0x2fd8] sm:$0xff]  ;;  %v1530_v28 = vld [vmem:[#allocation5 + $0x2bd0] sm:$0xff] }
 0x33a   :  { %3596 = vmatpush1.msra.mxu1 %v1574_v29  ;;  %3526 = vmatprep.subr.mxu0 %v1443_v11  ;;  %v1658_v9 = vld [vmem:[#allocation5 + $0x2fd0] sm:$0xff]  ;;  %v2231_v29 = vpop.f32.mrf.mxu1  ;;  %v1527_v11 = vld [vmem:[#allocation5 + $0x2bb8] sm:$0xff] }
 0x33b   :  { %3597 = vmatprep.subr.mxu1 %v1571_v30  ;;  %3527 = vmatpush1.msra.mxu0 %v1442_v31  ;;  %v1655_v30 = vld [vmem:[#allocation5 + $0x2fb8] sm:$0xff]  ;;  %v1526_v31 = vld [vmem:[#allocation5 + $0x2bb0] sm:$0xff] }
 0x33c   :  { %3598 = vmatpush1.msra.mxu1 %v1570_v14  ;;  %3528 = vmatprep.subr.mxu0 %v1439_v32  ;;  %v1654_v14 = vld [vmem:[#allocation5 + $0x2fb0] sm:$0xff]  ;;  %v4405_v32 = vpop.f32.mrf.mxu1  ;;  %v1503_v55 = vld [vmem:[#allocation5 + $0x2af8] sm:$0xff] }
 0x33d   :  { %3599 = vmatprep.subr.mxu1 %v1567_v33  ;;  %3529 = vmatpush1.msra.mxu0 %v1438_v34  ;;  %v2302_v33 = vpop.f32.mrf.mxu0  ;;  %v1523_v34 = vld [vmem:[#allocation5 + $0x2b98] sm:$0xff] }
 0x33e   :  { %3600 = vmatpush1.msra.mxu1 %v1566_v35  ;;  %3530 = vmatprep.subr.mxu0 %v1435_v36  ;;  %v1651_v35 = vld [vmem:[#allocation5 + $0x2f98] sm:$0xff]  ;;  %v2232_v36 = vadd.f32 %v2231_v29, %v2161_v7  ;;  %v1494_v29 = vld [vmem:[#allocation5 + $0x2ab0] sm:$0xff] }
 0x33f   :  { %3601 = vmatprep.subr.mxu1 %v1563_v38  ;;  %3531 = vmatpush1.msra.mxu0 %v1434_v40  ;;  %v1522_v38 = vld [vmem:[#allocation5 + $0x2b90] sm:$0xff]  ;;  %v1623_v7 = vld [vmem:[#allocation5 + $0x2eb8] sm:$0xff] }
 0x340   :  { %3602 = vmatpush1.msra.mxu1 %v1562_v43  ;;  %3532 = vmatprep.subr.mxu0 %v1431_v45  ;;  %v1650_v40 = vld [vmem:[#allocation5 + $0x2f90] sm:$0xff]  ;;  %v4407_v43 = vpop.f32.mrf.mxu0  ;;  %v1519_v45 = vld [vmem:[#allocation5 + $0x2b78] sm:$0xff]  ;;  %v2303_v46 = vadd.f32 %v2302_v33, %v2232_v36 }
 0x341   :  { %3603 = vmatprep.subr.mxu1 %v1559_v37  ;;  %3533 = vmatpush1.msra.mxu0 %v1430_v39  ;;  %v1647_v37 = vld [vmem:[#allocation5 + $0x2f78] sm:$0xff]  ;;  %v1518_v39 = vld [vmem:[#allocation5 + $0x2b70] sm:$0xff] }
 0x342   :  { %3604 = vmatpush1.msra.mxu1 %v1558_v13  ;;  %3534 = vmatprep.subr.mxu0 %v1427_v15  ;;  %v1646_v13 = vld [vmem:[#allocation5 + $0x2f70] sm:$0xff]  ;;  %v2373_v15 = vpop.f32.mrf.mxu1  ;;  %v2444_v49 = vpop.f32.mrf.mxu0 }
 0x343   :  { %3605 = vmatprep.subr.mxu1 %v1555_v44  ;;  %3535 = vmatpush1.msra.mxu0 %v1426_v48  ;;  %v1515_v44 = vld [vmem:[#allocation5 + $0x2b58] sm:$0xff]  ;;  %v2374_v63 = vadd.f32 %v2373_v15, %v2303_v46  ;;  %v1490_v33 = vld [vmem:[#allocation5 + $0x2a90] sm:$0xff] }
 0x344   :  { %3606 = vmatpush1.msra.mxu1 %v1554_v57  ;;  %3536 = vmatprep.subr.mxu0 %v1423_v17  ;;  %v1643_v48 = vld [vmem:[#allocation5 + $0x2f58] sm:$0xff]  ;;  %v1514_v57 = vld [vmem:[#allocation5 + $0x2b50] sm:$0xff] }
 0x345   :  { %3607 = vmatprep.subr.mxu1 %v1551_v59  ;;  %3537 = vmatpush1.msra.mxu0 %v1422_v61  ;;  %v1642_v17 = vld [vmem:[#allocation5 + $0x2f50] sm:$0xff]  ;;  %v4409_v59 = vpop.f32.mrf.mxu1  ;;  %v1511_v61 = vld [vmem:[#allocation5 + $0x2b38] sm:$0xff] }
 0x346   :  { %3608 = vmatpush1.msra.mxu1 %v1550_v50  ;;  %3538 = vmatprep.subr.mxu0 %v1419_v51  ;;  %v1639_v50 = vld [vmem:[#allocation5 + $0x2f38] sm:$0xff]  ;;  %v1510_v51 = vld [vmem:[#allocation5 + $0x2b30] sm:$0xff] }
 0x347   :  { %3609 = vmatprep.subr.mxu1 %v1547_v52  ;;  %3539 = vmatpush1.msra.mxu0 %v1418_v53  ;;  %v1638_v52 = vld [vmem:[#allocation5 + $0x2f30] sm:$0xff]  ;;  %v4411_v53 = vpop.f32.mrf.mxu0  ;;  %v1611_v15 = vld [vmem:[#allocation5 + $0x2e58] sm:$0xff] }
 0x348   :  { %3610 = vmatpush1.msra.mxu1 %v1546_v56  ;;  %3540 = vmatprep.subr.mxu0 %v1415_v0  ;;  %v1507_v56 = vld [vmem:[#allocation5 + $0x2b18] sm:$0xff]  ;;  %v1486_v46 = vld [vmem:[#allocation5 + $0x2a70] sm:$0xff] }
 0x349   :  { %3611 = vmatprep.subr.mxu1 %v1543_v2  ;;  %3541 = vmatpush1.msra.mxu0 %v1414_v4  ;;  %v1635_v0 = vld [vmem:[#allocation5 + $0x2f18] sm:$0xff]  ;;  %v2445_v2 = vadd.f32 %v2444_v49, %v2374_v63  ;;  %v1634_v4 = vld [vmem:[#allocation5 + $0x2f10] sm:$0xff]  ;;  %v2586_v16 = vpop.f32.mrf.mxu0 }
 0x34a   :  { %3612 = vmatpush1.msra.mxu1 %v1542_v5  ;;  %3542 = vmatprep.subr.mxu0 %v1411_v6  ;;  %v2515_v5 = vpop.f32.mrf.mxu1  ;;  %v1631_v6 = vld [vmem:[#allocation5 + $0x2ef8] sm:$0xff]  ;;  %v1478_v63 = vld [vmem:[#allocation5 + $0x2a30] sm:$0xff] }
 0x34b   :  { %3613 = vmatprep.subr.mxu1 %v1539_v58  ;;  %3543 = vmatpush1.msra.mxu0 %v1410_v8  ;;  %v1502_v58 = vld [vmem:[#allocation5 + $0x2af0] sm:$0xff]  ;;  %v2516_v54 = vadd.f32 %v2515_v5, %v2445_v2  ;;  %v1479_v49 = vld [vmem:[#allocation5 + $0x2a38] sm:$0xff] }
 0x34c   :  { %3614 = vmatpush1.msra.mxu1 %v1538_v62  ;;  %3544 = vmatprep.subr.mxu0 %v1535_v1  ;;  %v1630_v8 = vld [vmem:[#allocation5 + $0x2ef0] sm:$0xff]  ;;  %v4413_v62 = vpop.f32.mrf.mxu1  ;;  %v1499_v1 = vld [vmem:[#allocation5 + $0x2ad8] sm:$0xff] }
 0x34d   :  { %3615 = vmatprep.subr.mxu1 %v1663_v20  ;;  %3545 = vmatpush2.msra.mxu0 %v1534_v23  ;;  %v1627_v20 = vld [vmem:[#allocation5 + $0x2ed8] sm:$0xff]  ;;  %v1498_v23 = vld [vmem:[#allocation5 + $0x2ad0] sm:$0xff] }
 0x34e   :  { %3616 = vmatpush2.msra.mxu1 %v1662_v24  ;;  %3546 = vmatprep.subr.mxu0 %v1531_v26  ;;  %v1626_v24 = vld [vmem:[#allocation5 + $0x2ed0] sm:$0xff]  ;;  %v4415_v26 = vpop.f32.mrf.mxu0 }
 0x34f   :  { %3617 = vmatprep.subr.mxu1 %v1659_v27  ;;  %3547 = vmatpush2.msra.mxu0 %v1530_v28  ;;  %v1495_v27 = vld [vmem:[#allocation5 + $0x2ab8] sm:$0xff]  ;;  %v1668_v28 = vsub.s32 0, %v4270_v42  ;;  %v1474_v2 = vld [vmem:[#allocation5 + $0x2a10] sm:$0xff] }
 0x350   :  { %3618 = vmatpush2.msra.mxu1 %v1658_v9  ;;  %3548 = vmatprep.subr.mxu0 %v1527_v11  ;;  %v2587_v9 = vadd.f32 %v2586_v16, %v2516_v54  ;;  %v1622_v11 = vld [vmem:[#allocation5 + $0x2eb0] sm:$0xff]  ;;  %v2728_v36 = vpop.f32.mrf.mxu0  ;;  %v3721_v16 = vld [vmem:[#allocation8 + $0x1f8] sm:$0xff]  ;;  %v3686_v54 = vld [vmem:[#allocation8 + $0xe0] sm:$0xff] }
 0x351   :  { %3619 = vmatprep.subr.mxu1 %v1655_v30  ;;  %3549 = vmatpush2.msra.mxu0 %v1526_v31  ;;  %v2657_v30 = vpop.f32.mrf.mxu1  ;;  %v1491_v31 = vld [vmem:[#allocation5 + $0x2a98] sm:$0xff] }
 0x352   :  { %3620 = vmatpush2.msra.mxu1 %v1654_v14  ;;  %3550 = vmatprep.subr.mxu0 %v1523_v34  ;;  %v1619_v14 = vld [vmem:[#allocation5 + $0x2e98] sm:$0xff]  ;;  %v1618_v34 = vld [vmem:[#allocation5 + $0x2e90] sm:$0xff] }
 0x353   :  { %3621 = vmatprep.subr.mxu1 %v1651_v35  ;;  %3551 = vmatpush2.msra.mxu0 %v1522_v38  ;;  %v4418_v35 = vpop.f32.mrf.mxu1  ;;  %v1487_v38 = vld [vmem:[#allocation5 + $0x2a78] sm:$0xff] }
 0x354   :  { %3622 = vmatpush2.msra.mxu1 %v1650_v40  ;;  %3552 = vmatprep.subr.mxu0 %v1519_v45  ;;  %v1615_v40 = vld [vmem:[#allocation5 + $0x2e78] sm:$0xff]  ;;  %v1669_v45 = vrot.slane %v4392_v41, %v1668_v28  ;;  %v3702_v28 = vld [vmem:[#allocation8 + $0x160] sm:$0xff] }
 0x355   :  { %3623 = vmatprep.subr.mxu1 %v1647_v37  ;;  %3553 = vmatpush2.msra.mxu0 %v1518_v39  ;;  %v2658_v37 = vadd.f32 %v2657_v30, %v2587_v9  ;;  %v1614_v39 = vld [vmem:[#allocation5 + $0x2e70] sm:$0xff]  ;;  %v3701_v30 = vld [vmem:[#allocation8 + $0x158] sm:$0xff] }
 0x356   :  { %3624 = vmatpush2.msra.mxu1 %v1646_v13  ;;  %3554 = vmatprep.subr.mxu0 %v1515_v44  ;;  %v1483_v13 = vld [vmem:[#allocation5 + $0x2a58] sm:$0xff] }
 0x357   :  { %3625 = vmatprep.subr.mxu1 %v1643_v48  ;;  %3555 = vmatpush2.msra.mxu0 %v1514_v57  ;;  %v2729_v44 = vadd.f32 %v2728_v36, %v2658_v37  ;;  %v1482_v48 = vld [vmem:[#allocation5 + $0x2a50] sm:$0xff]  ;;  %v3681_v37 = vld [vmem:[#allocation8 + $0xb8] sm:$0xff] }
 0x358   :  { %3626 = vmatpush2.msra.mxu1 %v1642_v17  ;;  %3556 = vmatprep.subr.mxu0 %v1511_v61  ;;  %v1610_v57 = vld [vmem:[#allocation5 + $0x2e50] sm:$0xff]  ;;  %v2799_v17 = vpop.f32.mrf.mxu1  ;;  %v1607_v61 = vld [vmem:[#allocation5 + $0x2e38] sm:$0xff] }
 0x359   :  { %3627 = vmatprep.subr.mxu1 %v1639_v50  ;;  %3557 = vmatpush2.msra.mxu0 %v1510_v51  ;;  %v2017_v50 = vadd.f32 %v4394_v47, %v1669_v45  ;;  %v1606_v51 = vld [vmem:[#allocation5 + $0x2e30] sm:$0xff]  ;;  %v3689_v47 = vld [vmem:[#allocation8 + $0xf8] sm:$0xff] }
 0x35a   :  { %3628 = vmatpush2.msra.mxu1 %v1638_v52  ;;  %3558 = vmatprep.subr.mxu0 %v1507_v56  ;;  %v1475_v52 = vld [vmem:[#allocation5 + $0x2a18] sm:$0xff]  ;;  %v3699_v45 = vld [vmem:[#allocation8 + $0x148] sm:$0xff] }
 0x35b   :  { %3629 = vmatprep.subr.mxu1 %v1635_v0  ;;  %3559 = vmatpush2.msra.mxu0 %v1506_v3  ;;  %v1603_v56 = vld [vmem:[#allocation5 + $0x2e18] sm:$0xff]  ;;  %v2800_v0 = vadd.f32 %v2799_v17, %v2729_v44  ;;  %v1602_v3 = vld [vmem:[#allocation5 + $0x2e10] sm:$0xff] }
 0x35c   :  { %3630 = vmatpush2.msra.mxu1 %v1634_v4  ;;  %3560 = vmatprep.subr.mxu0 %v1503_v55  ;;  %v2088_v4 = vadd.f32 %v4397_v19, %v2017_v50  ;;  %v3672_v19 = vld [vmem:[#allocation8 + $0x70] sm:$0xff]  ;;  %v3713_v44 = vld [vmem:[#allocation8 + $0x1b8] sm:$0xff] }
 0x35d   :  { %3631 = vmatprep.subr.mxu1 %v1631_v6  ;;  %3561 = vmatpush2.msra.mxu0 %v1502_v58  ;;  %v3655_v55 = vmax.f32 %v2800_v0, 0.0  ;;  %v3673_v6 = vld [vmem:[#allocation8 + $0x78] sm:$0xff]  ;;  %v3688_v58 = vld [vmem:[#allocation8 + $0xf0] sm:$0xff] }
 0x35e   :  { %3632 = vmatpush2.msra.mxu1 %v1630_v8  ;;  %3562 = vmatprep.subr.mxu0 %v1499_v1  ;;  %v2159_v5 = vadd.f32 %v4399_v60, %v2088_v4  ;;  %v3687_v8 = vld [vmem:[#allocation8 + $0xe8] sm:$0xff]  ;;  %v3720_v1 = vld [vmem:[#allocation8 + $0x1f0] sm:$0xff]  ;;  %v3697_v17 = vld [vmem:[#allocation8 + $0x138] sm:$0xff] }
 0x35f   :  { %3633 = vmatprep.subr.mxu1 %v1627_v20  ;;  %3563 = vmatpush2.msra.mxu0 %v1498_v23  ;;  %v3671_v20 = vld [vmem:[#allocation8 + $0x68] sm:$0xff]  ;;  %v3670_v23 = vld [vmem:[#allocation8 + $0x60] sm:$0xff]  ;;  %v3684_v9 = vld [vmem:[#allocation8 + $0xd0] sm:$0xff] }
 0x360   :  { %3634 = vmatpush2.msra.mxu1 %v1626_v24  ;;  %3564 = vmatprep.subr.mxu0 %v1495_v27  ;;  %v2230_v60 = vadd.f32 %v4401_v10, %v2159_v5  ;;  %v3703_v24 = vld [vmem:[#allocation8 + $0x168] sm:$0xff]  ;;  %v3685_v27 = vld [vmem:[#allocation8 + $0xd8] sm:$0xff]  ;;  %v3700_v36 = vld [vmem:[#allocation8 + $0x150] sm:$0xff] }
 0x361   :  { %3635 = vmatprep.subr.mxu1 %v1623_v7  ;;  %3565 = vmatpush2.msra.mxu0 %v1494_v29  ;;  %v3718_v7 = vld [vmem:[#allocation8 + $0x1e0] sm:$0xff]  ;;  %v3669_v10 = vld [vmem:[#allocation8 + $0x58] sm:$0xff]  ;;  %v3696_v50 = vld [vmem:[#allocation8 + $0x130] sm:$0xff] }
 0x362   :  { %3636 = vmatpush2.msra.mxu1 %v1622_v11  ;;  %3566 = vmatprep.subr.mxu0 %v1491_v31  ;;  %v3717_v29 = vld [vmem:[#allocation8 + $0x1d8] sm:$0xff]  ;;  %v3683_v31 = vld [vmem:[#allocation8 + $0xc8] sm:$0xff]  ;;  %v3676_v4 = vld [vmem:[#allocation8 + $0x90] sm:$0xff] }
 0x363   :  { %3637 = vmatprep.subr.mxu1 %v1619_v14  ;;  %3567 = vmatpush2.msra.mxu0 %v1490_v33  ;;  %v3716_v14 = vld [vmem:[#allocation8 + $0x1d0] sm:$0xff]  ;;  %v3677_v0 = vld [vmem:[#allocation8 + $0x98] sm:$0xff]  ;;  %v3675_v5 = vld [vmem:[#allocation8 + $0x88] sm:$0xff] }
 0x364   :  { %3638 = vmatpush2.msra.mxu1 %v1618_v34  ;;  %3568 = vmatprep.subr.mxu0 %v1487_v38  ;;  %v3667_v34 = vld [vmem:[#allocation8 + $0x48] sm:$0xff]  ;;  %v3682_v38 = vld [vmem:[#allocation8 + $0xc0] sm:$0xff] }
 0x365   :  { %3639 = vmatprep.subr.mxu1 %v1615_v40  ;;  %3569 = vmatpush2.msra.mxu0 %v1486_v46  ;;  %v3715_v40 = vld [vmem:[#allocation8 + $0x1c8] sm:$0xff]  ;;  %v3714_v46 = vld [vmem:[#allocation8 + $0x1c0] sm:$0xff] }
 0x366   :  { %3640 = vmatpush2.msra.mxu1 %v1614_v39  ;;  %3570 = vmatprep.subr.mxu0 %v1483_v13  ;;  %v3698_v13 = vld [vmem:[#allocation8 + $0x140] sm:$0xff] }
 0x367   :  { %3641 = vmatprep.subr.mxu1 %v1611_v15  ;;  %3571 = vmatpush2.msra.mxu0 %v1482_v48  ;;  %v3680_v15 = vld [vmem:[#allocation8 + $0xb0] sm:$0xff] }
 0x368   :  { %3642 = vmatpush2.msra.mxu1 %v1610_v57  ;;  %3572 = vmatprep.subr.mxu0 %v1479_v49  ;;  %v3664_v57 = vld [vmem:[#allocation8 + $0x30] sm:$0xff]  ;;  %v3679_v49 = vld [vmem:[#allocation8 + $0xa8] sm:$0xff] }
 0x369   :  { %3643 = vmatprep.subr.mxu1 %v1607_v61  ;;  %3573 = vmatpush2.msra.mxu0 %v1478_v63  ;;  %v3712_v61 = vld [vmem:[#allocation8 + $0x1b0] sm:$0xff]  ;;  %v3678_v63 = vld [vmem:[#allocation8 + $0xa0] sm:$0xff] }
 0x36a   :  { %3644 = vmatpush2.msra.mxu1 %v1606_v51  ;;  %3574 = vmatprep.subr.mxu0 %v1475_v52  ;;  %v3711_v51 = vld [vmem:[#allocation8 + $0x1a8] sm:$0xff] }
 0x36b   :  { %3645 = vmatprep.subr.mxu1 %v1603_v56  ;;  %3575 = vmatpush2.msra.mxu0 %v1474_v2  ;;  %v3695_v56 = vld [vmem:[#allocation8 + $0x128] sm:$0xff] }
 0x36c   :  { %3576 = vmatprep.mubr.f32.mxu0 %v4359_v12  ;;  %3646 = vmatpush2.msra.mxu1 %v1602_v3  ;;  %v3705_v12 = vld [vmem:[#allocation8 + $0x178] sm:$0xff] }
 0x36d   :  { %3647 = vmatprep.mubr.f32.mxu1 %v4363_v21  ;;  %3577 = vmatmul.mubr.f32.vlgmr.msra.gmra.mxu0 %v4361_v18  ;;  %v3704_v21 = vld [vmem:[#allocation8 + $0x170] sm:$0xff]  ;;  %v3719_v18 = vld [vmem:[#allocation8 + $0x1e8] sm:$0xff]  ;;  %v3661_v3 = vld [vmem:[#allocation8 + $0x18] sm:$0xff] }
 0x36e   :  { %3648 = vmatmul.mubr.f32.vlgmr.msra.gmra.mxu1 %v4365_v22  ;;  %3945 = vmatprep.subr.mxu0 %v3689_v47  ;;  %v2301_v22 = vadd.f32 %v4403_v25, %v2230_v60  ;;  %v3668_v25 = vld [vmem:[#allocation8 + $0x50] sm:$0xff]  ;;  %v3707_v60 = vld [vmem:[#allocation8 + $0x188] sm:$0xff] }
 0x36f   :  { %3793 = vmatprep.mubr.f32.mxu0 %v3655_v55  ;;  %3946 = vmatpush3.msra.mxu0 %v3673_v6  ;;  %v3660_v47 = vld [vmem:[#allocation8 + $0x10] sm:$0xff]  ;;  %v3659_v55 = vld [vmem:[#allocation8 + $0x8] sm:$0xff]  ;;  %v3674_v6 = vld [vmem:[#allocation8 + $0x80] sm:$0xff] }
 0x370   :  { %3947 = vmatprep.subr.mxu0 %v3688_v58  ;;  %3980 = vmatprep.subr.mxu1 %v3721_v16  ;;  %v2372_v11 = vadd.f32 %v4405_v32, %v2301_v22  ;;  %v3666_v32 = vld [vmem:[#allocation8 + $0x40] sm:$0xff]  ;;  %v3709_v16 = vld [vmem:[#allocation8 + $0x198] sm:$0xff]  ;;  %v1680_v22 = vsub.s32 3, %v4270_v42 }
 0x371   :  { %3948 = vmatpush3.msra.mxu0 %v3672_v19  ;;  %3981 = vmatpush3.msra.mxu1 %v3705_v12  ;;  %v3658_v58 = vld [vmem:[#allocation8] sm:$0xff]  ;;  %v3693_v12 = vld [vmem:[#allocation8 + $0x118] sm:$0xff] }
 0x372   :  { %3949 = vmatprep.subr.mxu0 %v3687_v8  ;;  %3982 = vmatprep.subr.mxu1 %v3720_v1  ;;  %v2443_v33 = vadd.f32 %v4407_v43, %v2372_v11  ;;  %v3665_v43 = vld [vmem:[#allocation8 + $0x38] sm:$0xff]  ;;  %v3710_v19 = vld [vmem:[#allocation8 + $0x1a0] sm:$0xff]  ;;  %v3692_v1 = vld [vmem:[#allocation8 + $0x110] sm:$0xff] }
 0x373   :  { %3950 = vmatpush3.msra.mxu0 %v3671_v20  ;;  %3983 = vmatpush3.msra.mxu1 %v3704_v21  ;;  %v3694_v8 = vld [vmem:[#allocation8 + $0x120] sm:$0xff]  ;;  %v3691_v20 = vld [vmem:[#allocation8 + $0x108] sm:$0xff] }
 0x374   :  { %3951 = vmatprep.subr.mxu0 %v3686_v54  ;;  %3984 = vmatprep.subr.mxu1 %v3719_v18  ;;  %v2514_v39 = vadd.f32 %v4409_v59, %v2443_v33  ;;  %v3663_v59 = vld [vmem:[#allocation8 + $0x28] sm:$0xff]  ;;  %v3706_v21 = vld [vmem:[#allocation8 + $0x180] sm:$0xff]  ;;  %v1676_v18 = vsub.s32 2, %v4270_v42 }
 0x375   :  { %3952 = vmatpush3.msra.mxu0 %v3670_v23  ;;  %3985 = vmatpush3.msra.mxu1 %v3703_v24  ;;  %v3690_v54 = vld [vmem:[#allocation8 + $0x100] sm:$0xff]  ;;  %v2868_v23 = vpop.f32.mrf.mxu0 }
 0x376   :  { %3953 = vmatprep.subr.mxu0 %v3685_v27  ;;  %3986 = vmatprep.subr.mxu1 %v3718_v7  ;;  %v2585_v48 = vadd.f32 %v4411_v53, %v2514_v39  ;;  %v3662_v53 = vld [vmem:[#allocation8 + $0x20] sm:$0xff]  ;;  %v1677_v24 = vrot.slane %v4392_v41, %v1676_v18  ;;  %v1681_v27 = vrot.slane %v4392_v41, %v1680_v22  ;;  %v2939_v7 = vpop.f32.mrf.mxu1 }
 0x377   :  { %3954 = vmatpush3.msra.mxu0 %v3669_v10  ;;  %3987 = vmatpush3.msra.mxu1 %v3702_v28  ;;  %v2870_v10 = vpop.f32.mrf.mxu0 }
 0x378   :  { %3955 = vmatprep.subr.mxu0 %v3684_v9  ;;  %3988 = vmatprep.subr.mxu1 %v3717_v29  ;;  %v2656_v52 = vadd.f32 %v4413_v62, %v2585_v48  ;;  %v2869_v28 = vadd.f32 %v2868_v23, %v1677_v24  ;;  %v2871_v29 = vadd.f32 %v2870_v10, %v1681_v27  ;;  %v2941_v11 = vpop.f32.mrf.mxu1  ;;  %v3943_v23 = vld [vmem:[#allocation2] ss:$0 sm:$0xff] }
 0x379   :  { %3956 = vmatpush3.msra.mxu0 %v3668_v25  ;;  %3989 = vmatpush3.msra.mxu1 %v3701_v30  ;;  %v3010_v9 = vpop.f32.mrf.mxu0 }
 0x37a   :  { %3957 = vmatprep.subr.mxu0 %v3683_v31  ;;  %3990 = vmatprep.subr.mxu1 %v3716_v14  ;;  %v2727_v2 = vadd.f32 %v4415_v26, %v2656_v52  ;;  %v2940_v25 = vadd.f32 %v2939_v7, %v2869_v28  ;;  %v3081_v30 = vpop.f32.mrf.mxu1  ;;  %v2942_v14 = vadd.f32 %v2941_v11, %v2871_v29 }
 0x37b   :  { %3958 = vmatpush3.msra.mxu0 %v3667_v34  ;;  %3991 = vmatpush3.msra.mxu1 %v3700_v36  ;;  %v3012_v31 = vpop.f32.mrf.mxu0 }
 0x37c   :  { %3959 = vmatprep.subr.mxu0 %v3682_v38  ;;  %3992 = vmatprep.subr.mxu1 %v3715_v40  ;;  %v2798_v62 = vadd.f32 %v4418_v35, %v2727_v2  ;;  %v3708_v35 = vld [vmem:[#allocation8 + $0x190] sm:$0xff]  ;;  %v3011_v33 = vadd.f32 %v3010_v9, %v2940_v25  ;;  %v3013_v36 = vadd.f32 %v3012_v31, %v2942_v14  ;;  %v3083_v38 = vpop.f32.mrf.mxu1 }
 0x37d   :  { %3960 = vmatpush3.msra.mxu0 %v3666_v32  ;;  %3993 = vmatpush3.msra.mxu1 %v3699_v45  ;;  %v3152_v34 = vpop.f32.mrf.mxu0 }
 0x37e   :  { %3961 = vmatprep.subr.mxu0 %v3681_v37  ;;  %3994 = vmatprep.subr.mxu1 %v3714_v46  ;;  %v3654_v26 = vmax.f32 %v2798_v62, 0.0  ;;  %v3082_v42 = vadd.f32 %v3081_v30, %v3011_v33  ;;  %v3223_v40 = vpop.f32.mrf.mxu1  ;;  %v3084_v45 = vadd.f32 %v3083_v38, %v3013_v36 }
 0x37f   :  { %3962 = vmatpush3.msra.mxu0 %v3665_v43  ;;  %3995 = vmatpush3.msra.mxu1 %v3698_v13  ;;  %v3154_v32 = vpop.f32.mrf.mxu0 }
 0x380   :  { %3963 = vmatprep.subr.mxu0 %v3680_v15  ;;  %3996 = vmatprep.subr.mxu1 %v3713_v44  ;;  %v3153_v37 = vadd.f32 %v3152_v34, %v3082_v42  ;;  %v3155_v46 = vadd.f32 %v3154_v32, %v3084_v45  ;;  %v3225_v39 = vpop.f32.mrf.mxu1 }
 0x381   :  { %3964 = vmatpush3.msra.mxu0 %v3664_v57  ;;  %3997 = vmatpush3.msra.mxu1 %v3697_v17 }
 0x382   :  { %3965 = vmatprep.subr.mxu0 %v3679_v49  ;;  %3998 = vmatprep.subr.mxu1 %v3712_v61  ;;  %v3224_v43 = vadd.f32 %v3223_v40, %v3153_v37  ;;  %v3226_v44 = vadd.f32 %v3225_v39, %v3155_v46 }
 0x383   :  { %3966 = vmatpush3.msra.mxu0 %v3663_v59  ;;  %3999 = vmatpush3.msra.mxu1 %v3696_v50 }
 0x384   :  { %3967 = vmatprep.subr.mxu0 %v3678_v63  ;;  %4000 = vmatprep.subr.mxu1 %v3711_v51 }
 0x385   :  { %3968 = vmatpush3.msra.mxu0 %v3662_v53  ;;  %4001 = vmatpush3.msra.mxu1 %v3695_v56 }
 0x386   :  { %3969 = vmatprep.subr.mxu0 %v3677_v0  ;;  %4002 = vmatprep.subr.mxu1 %v3710_v19 }
 0x387   :  { %3970 = vmatpush3.msra.mxu0 %v3661_v3  ;;  %4003 = vmatpush3.msra.mxu1 %v3694_v8 }
 0x388   :  { %3971 = vmatprep.subr.mxu0 %v3676_v4  ;;  %4004 = vmatprep.subr.mxu1 %v3709_v16 }
 0x389   :  { %3972 = vmatpush3.msra.mxu0 %v3660_v47  ;;  %4005 = vmatpush3.msra.mxu1 %v3693_v12  ;;  %v3941_v12 = vld [vmem:[#allocation10] ss:$0 sm:$0xff] }
 0x38a   :  { %3973 = vmatprep.subr.mxu0 %v3675_v5  ;;  %4006 = vmatprep.subr.mxu1 %v3708_v35 }
 0x38b   :  { %3974 = vmatpush3.msra.mxu0 %v3659_v55  ;;  %4007 = vmatpush3.msra.mxu1 %v3692_v1 }
 0x38c   :  { %3975 = vmatprep.subr.mxu0 %v3674_v6  ;;  %4008 = vmatprep.subr.mxu1 %v3707_v60 }
 0x38d   :  { %3976 = vmatpush3.msra.mxu0 %v3658_v58  ;;  %4009 = vmatpush3.msra.mxu1 %v3691_v20 }
 0x38e   :  { %3794 = vmatmul.mubr.f32.vlgmr.msra.gmra.mxu0 %v3654_v26  ;;  %4010 = vmatprep.subr.mxu1 %v3706_v21 }
 0x38f   :  { %4011 = vmatpush3.msra.mxu1 %v3690_v54  ;;  %v3942_v54 = vld [vmem:[#allocation11] ss:$0 sm:$0xff] }
 0x3a9   :  { %v3294_v41 = vpop.f32.mrf.mxu0 }
 0x3aa   :  { %v3295_v48 = vadd.f32 %v3294_v41, %v3224_v43 }
 0x3ab   :  { %v3365_v13 = vpop.f32.mrf.mxu1  ;;  %v3296_v15 = vpop.f32.mrf.mxu0 }
 0x3ac   :  { %v3297_v17 = vadd.f32 %v3296_v15, %v3226_v44  ;;  %v3366_v61 = vadd.f32 %v3365_v13, %v3295_v48 }
 0x3ad   :  { %v3367_v49 = vpop.f32.mrf.mxu1 }
 0x3ae   :  { %v3368_v63 = vadd.f32 %v3367_v49, %v3297_v17 }
 0x3eb   :  { %v3436_v57 = vpop.f32.mrf.mxu0 }
 0x3ec   :  { %v3437_v51 = vadd.f32 %v3436_v57, %v3366_v61 }
 0x3ed   :  { %v3507_v59 = vpop.f32.mrf.mxu1  ;;  %v3438_v50 = vpop.f32.mrf.mxu0 }
 0x3ee   :  { %v3439_v52 = vadd.f32 %v3438_v50, %v3368_v63  ;;  %v3508_v56 = vadd.f32 %v3507_v59, %v3437_v51 }
 0x3ef   :  { %v3509_v53 = vpop.f32.mrf.mxu1 }
 0x3f0   :  { %v3510_v3 = vadd.f32 %v3509_v53, %v3439_v52 }
 0x42d   :  { %v3578_v0 = vpop.f32.mrf.mxu0 }
 0x42e   :  { %v3649_v2 = vpop.f32.mrf.mxu1  ;;  %v3579_v4 = vadd.f32 %v3578_v0, %v3508_v56 }
 0x42f   :  { %v3580_v47 = vpop.f32.mrf.mxu0 }
 0x430   :  { %v3581_v5 = vadd.f32 %v3580_v47, %v3510_v3  ;;  %v3650_v62 = vadd.f32 %v3649_v2, %v3579_v4  ;;  %v3651_v55 = vpop.f32.mrf.mxu1 }
 0x432   :  { %v3652_v6 = vadd.f32 %v3651_v55, %v3581_v5  ;;  %v3656_v26 = vmax.f32 %v3650_v62, 0.0 }
 0x434   :  { %v3657_v58 = vmax.f32 %v3652_v6, 0.0 }
 0x436   :  { %3863 = vmatprep.mubr.f32.mxu1 %v3657_v58 }
 0x437   :  { %3864 = vmatmul.mubr.f32.vlgmr.msra.gmra.mxu1 %v3656_v26 }
 0x44e   :  { %v3977_v19 = vpop.f32.mrf.mxu0 }
 0x450   :  { %v3978_v8 = vpop.f32.mrf.mxu0 }
 0x451   :  { %v3979_v16 = vadd.f32 %v3978_v8, %v3977_v19 }
 0x453   :  { %v3796_v60 = vadd.f32 %v3979_v16, %v3941_v12 }
 0x4f7   :  { %v4012_v35 = vpop.f32.mrf.mxu1 }
 0x4f9   :  { %v4013_v1 = vpop.f32.mrf.mxu1 }
 0x4fa   :  { %v4014_v20 = vadd.f32 %v4013_v1, %v4012_v35 }
 0x4fc   :  { %v3866_v21 = vadd.f32 %v4014_v20, %v3796_v60 }
 0x4fe   :  { %v3869_v18 = vmax.f32 %v3866_v21, 0.0 }
 0x500   :  { %v3877_v22 = vmul.f32 %v3942_v54, %v3869_v18 }
 0x502   :  { %3878 = vadd.xlane.f32.xlu0 %v3877_v22 }
 0x58b   :  { %v3879_v24 = vpop.xlane.xlu0 %3878 }
 0x58c   :  { %v3887_v27 = vadd.f32 %v3943_v23, %v3879_v24 }
 0x58e   :  { %v3944_v7 = vmul.f32 -1.442695, %v3887_v27 }
 0x590   :  { %4064 = vpow2.f32 %v3944_v7 }
 0x59d   :  { %v4065_v10 = vpop.eup %4064 }
 0x59e   :  { %v3891_v28 = vadd.f32 1.0, %v4065_v10 }
 0x5a0   :  { %4066 = vrcp.f32 %v3891_v28 }
 0x5ad   :  { %v4067_v9 = vpop.eup %4066 }
 0x5ae   :  { %3895 = vst.msk [vmem:[#allocation13] sm:$0xff] %vm3894_vm0, %v4067_v9 }
 0x5b5   :  { %v3914_v29 = vld [vmem:[#allocation13] sm:$0x3] }
 0x5b6   :  { %3915 = vst [vmem:[%s4451_s7] sm:$0x3] %v3914_v29 }
 0x5b7   :  { %3933 = vsyncpa [#allocation4], 1 }
 0x5b8   :  { %3934 = vsyncpa [#allocation6], 1 }
 0x5b9   :  { %3935 = vsyncpa [#allocation9], 1 }
 0x5ba   :  { %3936 = vsyncpa [#allocation12], 1 }

</bundles_post_ra>
